<compile_context>
chip_gen: v5e
topology: v5e:2x2
jax: 0.10.0
libtpu: 0.0.40
codegen_flags: <defaults>
</compile_context>

<pallas_src>
import functools

import jax
import jax.numpy as jnp
from jax import lax
from jax.experimental import pallas as pl
from jax.experimental.pallas import tpu as pltpu


def _round_up(c, m=128):
    return ((c + m - 1) // m) * m


# ----------------------------------------------------------------------------
# Fused Pallas kernel: the entire TCN for one batch tile.
# ----------------------------------------------------------------------------
def _tcn_fused_kernel(x_ref, *refs, layers, act_dtype):
    """refs = per-layer (w1, b1, w2, b2[, wd, bd]) refs, then the output ref.

    layers: static tuple of dicts {"dilation": int, "downsample": bool}.
    """
    o_ref = refs[-1]
    w_refs = refs[:-1]

    Bt, Lp, C0 = x_ref.shape
    R = Bt * Lp

    # Fold batch into matmul rows: (Bt, Lp, C) -> (Bt*Lp, C).
    # Lp % 16 == 0 (wrapper guarantees), so this reshape is a free view.
    x = x_ref[...].reshape(R, C0).astype(act_dtype)

    # Narrow (R, 1) within-sequence time index, hoisted once; per-layer compare
    # stays narrow and is consumed directly by jnp.where (no broadcast_to).
    t_idx = lax.broadcasted_iota(jnp.int32, (Bt, Lp, 1), 1).reshape(R, 1)

    i = 0
    for meta in layers:
        d = meta["dilation"]
        w1 = w_refs[i][...]
        b1 = w_refs[i + 1][...]
        w2 = w_refs[i + 2][...]
        b2 = w_refs[i + 3][...]
        i += 4
        if meta["downsample"]:
            wd = w_refs[i][...]
            bd = w_refs[i + 1][...]
            i += 2

        # Rows with t < d have no causal history -> zeroed (pad + Chomp1d).
        mask = t_idx >= d                                   # (R, 1)

        def dilated_conv(v, w, b):
            # Causal dilated conv (kernel_size=2) as ONE merged-K matmul:
            #   y[t] = W_a @ v[t-d] + W_b @ v[t] == concat([v[t-d], v[t]]) @ W.
            # Rolling the flattened (Bt*Lp, C) rows by d only contaminates the
            # first d rows of each sequence, which the mask zeroes anyway.
            # where + cast are fused into the matmul operand expression so no
            # standalone f32 'shifted' tensor is stored.
            shifted = jnp.where(mask, pltpu.roll(v, shift=d, axis=0),
                                0.0).astype(jnp.bfloat16)
            s = jnp.concatenate([shifted, v.astype(jnp.bfloat16)], axis=-1)
            y = jnp.dot(s, w, preferred_element_type=jnp.float32) + b
            return jnp.maximum(y, 0.0).astype(act_dtype)

        h = dilated_conv(x, w1, b1)       # conv1 + chomp + relu
        o = dilated_conv(h, w2, b2)       # conv2 + chomp + relu

        if meta["downsample"]:            # 1x1 conv residual branch
            res = (jnp.dot(x.astype(jnp.bfloat16), wd,
                           preferred_element_type=jnp.float32)
                   + bd).astype(act_dtype)
        else:
            res = x

        x = jnp.maximum(o + res, 0.0).astype(act_dtype)   # relu(out + res)

    o_ref[...] = x.reshape(Bt, Lp, x.shape[-1]).astype(o_ref.dtype)


# ----------------------------------------------------------------------------
# Wrapper: layout, padding, VMEM-aware batch tiling, pallas_call.
# ----------------------------------------------------------------------------
def _pick_batch_tile(B, Lp, fits, row_target=1024, row_cap=2048):
    """Largest divisor of B that (a) keeps grid length >= 2 when B >= 2 so the
    'parallel' batch axis can shard across v7x's two TensorCores, (b) stays
    under row_cap rows and the VMEM budget, (c) stops once row_target rows of
    MXU M are reached."""
    bt = 1
    max_bt = B if B < 2 else max(1, B // 2)
    for cand in range(1, max_bt + 1):
        if B % cand != 0:
            continue
        if cand * Lp > row_cap or not fits(cand):
            break
        bt = cand
        if cand * Lp >= row_target:
            break
    return bt


def temporal_conv_net(x_ncl, params, act_dtype=jnp.float32):
    """x_ncl: (B, C_in, L) float -> (B, C_out_last, L), matching the PyTorch module."""
    B, c_in, L = x_ncl.shape
    layers = params["layers"]
    c0p = params["c0_padded"]
    c_last = params["c_last"]
    c_last_p = layers[-1]["cout_p"]

    # Pad time to a multiple of 16 (bf16 sublane tiling) so the in-kernel
    # (Bt, Lp, C) <-> (Bt*Lp, C) reshape never materializes a copy.  Padded
    # rows never feed valid outputs (causal conv only looks backwards) and are
    # sliced off below.
    Lp = _round_up(L, 16)

    # NCL -> NLC (channels-last, lane-dense) in bf16; zero-pad channels to a
    # lane-aligned width.  Padded lanes stay exactly zero through every layer.
    x = jnp.transpose(x_ncl, (0, 2, 1)).astype(jnp.bfloat16)
    x = jnp.pad(x, ((0, 0), (0, Lp - L), (0, c0p - c_in)))

    # --- VMEM budget ---------------------------------------------------------
    weight_arrays = []
    for ly in layers:
        names = ("w1", "b1", "w2", "b2") + (("wd", "bd") if ly["downsample"] else ())
        weight_arrays += [ly[name] for name in names]
    weight_bytes = sum(int(a.size) * a.dtype.itemsize for a in weight_arrays)
    c_max_p = max([c0p] + [ly["cout_p"] for ly in layers])

    def est_bytes(bt, weight_buffers):
        rows = bt * Lp
        io = 2 * 2 * bt * Lp * (c0p + c_last_p)        # bf16 in/out, double-buffered
        live = 6 * rows * c_max_p * 4                  # f32 live intermediates
        return weight_buffers * weight_bytes + io + live

    bt = _pick_batch_tile(B, Lp, fits=lambda c: est_bytes(c, 2) <= (48 << 20))
    grid = (B // bt,)

    # Explicit scoped-VMEM limit (the default 16/32 MiB, not physical capacity,
    # is what caps tile size).  Clamp to 64 MiB so it is valid on v7x too.
    vmem_limit = max(32 << 20,
                     min(int(est_bytes(bt, 2) * 1.5) + (4 << 20), 64 << 20))

    meta = tuple({"dilation": ly["dilation"], "downsample": ly["downsample"]}
                 for ly in layers)
    kernel = functools.partial(_tcn_fused_kernel, layers=meta,
                               act_dtype=act_dtype)

    def build_and_call(single_buffer_weights):
        # Weights have constant index_maps; single-buffering them halves their
        # VMEM footprint (the whole point of keeping them resident).
        wmode = ({"pipeline_mode": pl.Buffered(1)}
                 if single_buffer_weights else {})
        flat_inputs = [x]
        in_specs = [pl.BlockSpec((bt, Lp, c0p), lambda b: (b, 0, 0))]
        for arr in weight_arrays:
            flat_inputs.append(arr)
            in_specs.append(pl.BlockSpec(arr.shape, lambda b: (0, 0), **wmode))
        return pl.pallas_call(
            kernel,
            out_shape=jax.ShapeDtypeStruct((B, Lp, c_last_p), jnp.bfloat16),
            grid=grid,
            in_specs=in_specs,
            out_specs=pl.BlockSpec((bt, Lp, c_last_p), lambda b: (b, 0, 0)),
            compiler_params=pltpu.CompilerParams(
                dimension_semantics=("parallel",),   # shard batch tiles across cores
                vmem_limit_bytes=vmem_limit),
        )(*flat_inputs)

    try:
        y = build_and_call(True)
    except Exception:
        # Fallback: default double-buffered weights (always supported).
        y = build_and_call(False)

    # Drop padded time steps / output channels, back to NCL, f32 for the caller.
    return jnp.transpose(y[:, :L, :c_last], (0, 2, 1)).astype(jnp.float32)


# ----------------------------------------------------------------------------
# Parameter init (mirrors the PyTorch module's shapes + init_weights).
# ----------------------------------------------------------------------------
def init_tcn_params(key, num_inputs, num_channels, kernel_size=2):
    assert kernel_size == 2, "taps are packed as a single concat-matmul (K=2)"
    layers = []
    c_in = num_inputs
    cin_p = _round_up(num_inputs)

    for i, c_out in enumerate(num_channels):
        cout_p = _round_up(c_out)
        key, k1, k2, k3, k4, k5, k6 = jax.random.split(key, 7)

        # Conv weights ~ N(0, 0.01) (init_weights).  weight_norm with g
        # initialized to ||v|| folds exactly back to v, so use v directly.
        w1 = 0.01 * jax.random.normal(k1, (c_out, c_in, 2), jnp.float32)
        w2 = 0.01 * jax.random.normal(k2, (c_out, c_out, 2), jnp.float32)
        b1 = 0.01 * jax.random.normal(k3, (c_out,), jnp.float32)
        b2 = 0.01 * jax.random.normal(k4, (c_out,), jnp.float32)

        def pack_two_tap(w, ci, ci_p, co, co_p):
            # w: (co, ci, 2).  Rows [0:ci] multiply x[t-d]; rows
            # [ci_p : ci_p+ci] multiply x[t].  Padded rows/cols are zero.
            W = jnp.zeros((2 * ci_p, co_p), jnp.float32)
            W = W.at[0:ci, 0:co].set(jnp.transpose(w[:, :, 0]))
            W = W.at[ci_p:ci_p + ci, 0:co].set(jnp.transpose(w[:, :, 1]))
            return W.astype(jnp.bfloat16)

        def pack_bias(b, co, co_p):
            return jnp.zeros((1, co_p), jnp.float32).at[0, 0:co].set(b)

        ly = {
            "dilation": 2 ** i,
            "downsample": c_in != c_out,
            "cout_p": cout_p,
            "w1": pack_two_tap(w1, c_in, cin_p, c_out, cout_p),
            "b1": pack_bias(b1, c_out, cout_p),
            "w2": pack_two_tap(w2, c_out, cout_p, c_out, cout_p),
            "b2": pack_bias(b2, c_out, cout_p),
        }
        if c_in != c_out:
            wd = 0.01 * jax.random.normal(k5, (c_out, c_in, 1), jnp.float32)
            bd = 0.01 * jax.random.normal(k6, (c_out,), jnp.float32)
            Wd = jnp.zeros((cin_p, cout_p), jnp.float32)
            Wd = Wd.at[0:c_in, 0:c_out].set(jnp.transpose(wd[:, :, 0]))
            ly["wd"] = Wd.astype(jnp.bfloat16)
            ly["bd"] = pack_bias(bd, c_out, cout_p)
        layers.append(ly)
        c_in, cin_p = c_out, cout_p

    params = {
        "layers": layers,
        "c0_padded": _round_up(num_inputs),
        "c_last": num_channels[-1],
    }
    return params, key


if __name__ == "__main__":
    key = jax.random.PRNGKey(0)
    B, C_in, L = 2, 8, 32
    num_channels = [64, 128, 256]
    kernel_size = 2

    key, xk = jax.random.split(key)
    x_ncl = jax.random.normal(xk, (B, C_in, L), dtype=jnp.float32)

    params, key = init_tcn_params(key, C_in, num_channels, kernel_size)

    y = temporal_conv_net(x_ncl, params)
    jax.block_until_ready(y)
    assert y.shape == (B, num_channels[-1], L), y.shape
    assert bool(jnp.all(jnp.isfinite(y)))
    print("KERNEL_OK")
</pallas_src>

<mosaic_0001>
module attributes {stable_mosaic.version = 11 : i64} {
  func.func @_tcn_fused_kernel(%arg0: i32, %arg1: memref<1x32x128xbf16, #tpu.memory_space<vmem>>, %arg2: memref<256x128xbf16, #tpu.memory_space<vmem>>, %arg3: memref<1x128xf32, #tpu.memory_space<vmem>>, %arg4: memref<256x128xbf16, #tpu.memory_space<vmem>>, %arg5: memref<1x128xf32, #tpu.memory_space<vmem>>, %arg6: memref<128x128xbf16, #tpu.memory_space<vmem>>, %arg7: memref<1x128xf32, #tpu.memory_space<vmem>>, %arg8: memref<256x128xbf16, #tpu.memory_space<vmem>>, %arg9: memref<1x128xf32, #tpu.memory_space<vmem>>, %arg10: memref<256x128xbf16, #tpu.memory_space<vmem>>, %arg11: memref<1x128xf32, #tpu.memory_space<vmem>>, %arg12: memref<128x128xbf16, #tpu.memory_space<vmem>>, %arg13: memref<1x128xf32, #tpu.memory_space<vmem>>, %arg14: memref<256x256xbf16, #tpu.memory_space<vmem>>, %arg15: memref<1x256xf32, #tpu.memory_space<vmem>>, %arg16: memref<512x256xbf16, #tpu.memory_space<vmem>>, %arg17: memref<1x256xf32, #tpu.memory_space<vmem>>, %arg18: memref<128x256xbf16, #tpu.memory_space<vmem>>, %arg19: memref<1x256xf32, #tpu.memory_space<vmem>>, %arg20: memref<1x32x256xbf16, #tpu.memory_space<vmem>>) attributes {dimension_semantics = [#tpu.dimension_semantics<parallel>], iteration_bounds = array<i64: 2>, scalar_prefetch = 0 : i64, scratch_operands = 0 : i64, tpu.core_type = #tpu.core_type<tc>, window_params = [{transform_indices = @transform_0, window_bounds = array<i64: 1, 32, 128>}, {pipeline_mode = #tpu.pipeline_mode<synchronous>, transform_indices = @transform_1, window_bounds = array<i64: 256, 128>}, {pipeline_mode = #tpu.pipeline_mode<synchronous>, transform_indices = @transform_2, window_bounds = array<i64: 1, 128>}, {pipeline_mode = #tpu.pipeline_mode<synchronous>, transform_indices = @transform_3, window_bounds = array<i64: 256, 128>}, {pipeline_mode = #tpu.pipeline_mode<synchronous>, transform_indices = @transform_4, window_bounds = array<i64: 1, 128>}, {pipeline_mode = #tpu.pipeline_mode<synchronous>, transform_indices = @transform_5, window_bounds = array<i64: 128, 128>}, {pipeline_mode = #tpu.pipeline_mode<synchronous>, transform_indices = @transform_6, window_bounds = array<i64: 1, 128>}, {pipeline_mode = #tpu.pipeline_mode<synchronous>, transform_indices = @transform_7, window_bounds = array<i64: 256, 128>}, {pipeline_mode = #tpu.pipeline_mode<synchronous>, transform_indices = @transform_8, window_bounds = array<i64: 1, 128>}, {pipeline_mode = #tpu.pipeline_mode<synchronous>, transform_indices = @transform_9, window_bounds = array<i64: 256, 128>}, {pipeline_mode = #tpu.pipeline_mode<synchronous>, transform_indices = @transform_10, window_bounds = array<i64: 1, 128>}, {pipeline_mode = #tpu.pipeline_mode<synchronous>, transform_indices = @transform_11, window_bounds = array<i64: 128, 128>}, {pipeline_mode = #tpu.pipeline_mode<synchronous>, transform_indices = @transform_12, window_bounds = array<i64: 1, 128>}, {pipeline_mode = #tpu.pipeline_mode<synchronous>, transform_indices = @transform_13, window_bounds = array<i64: 256, 256>}, {pipeline_mode = #tpu.pipeline_mode<synchronous>, transform_indices = @transform_14, window_bounds = array<i64: 1, 256>}, {pipeline_mode = #tpu.pipeline_mode<synchronous>, transform_indices = @transform_15, window_bounds = array<i64: 512, 256>}, {pipeline_mode = #tpu.pipeline_mode<synchronous>, transform_indices = @transform_16, window_bounds = array<i64: 1, 256>}, {pipeline_mode = #tpu.pipeline_mode<synchronous>, transform_indices = @transform_17, window_bounds = array<i64: 128, 256>}, {pipeline_mode = #tpu.pipeline_mode<synchronous>, transform_indices = @transform_18, window_bounds = array<i64: 1, 256>}, {transform_indices = @transform_19, window_bounds = array<i64: 1, 32, 256>}]} {
    %c0 = arith.constant 0 : index
    %c0_0 = arith.constant 0 : index
    %c0_1 = arith.constant 0 : index
    %0 = vector.load %arg1[%c0, %c0_0, %c0_1] : memref<1x32x128xbf16, #tpu.memory_space<vmem>>, vector<1x32x128xbf16>
    %1 = vector.shape_cast %0 : vector<1x32x128xbf16> to vector<32x128xbf16>
    %2 = arith.extf %1 : vector<32x128xbf16> to vector<32x128xf32>
    %3 = tpu.iota {dimensions = array<i32: 1>} : vector<1x32x1xi32>
    %4 = vector.shape_cast %3 : vector<1x32x1xi32> to vector<32x1xi32>
    %c0_2 = arith.constant 0 : index
    %c0_3 = arith.constant 0 : index
    %5 = vector.load %arg2[%c0_2, %c0_3] : memref<256x128xbf16, #tpu.memory_space<vmem>>, vector<256x128xbf16>
    %c0_4 = arith.constant 0 : index
    %c0_5 = arith.constant 0 : index
    %6 = vector.load %arg3[%c0_4, %c0_5] : memref<1x128xf32, #tpu.memory_space<vmem>>, vector<1x128xf32>
    %c0_6 = arith.constant 0 : index
    %c0_7 = arith.constant 0 : index
    %7 = vector.load %arg4[%c0_6, %c0_7] : memref<256x128xbf16, #tpu.memory_space<vmem>>, vector<256x128xbf16>
    %c0_8 = arith.constant 0 : index
    %c0_9 = arith.constant 0 : index
    %8 = vector.load %arg5[%c0_8, %c0_9] : memref<1x128xf32, #tpu.memory_space<vmem>>, vector<1x128xf32>
    %c0_10 = arith.constant 0 : index
    %c0_11 = arith.constant 0 : index
    %9 = vector.load %arg6[%c0_10, %c0_11] : memref<128x128xbf16, #tpu.memory_space<vmem>>, vector<128x128xbf16>
    %c0_12 = arith.constant 0 : index
    %c0_13 = arith.constant 0 : index
    %10 = vector.load %arg7[%c0_12, %c0_13] : memref<1x128xf32, #tpu.memory_space<vmem>>, vector<1x128xf32>
    %c1_i32 = arith.constant 1 : i32
    %11 = vector.broadcast %c1_i32 : i32 to vector<32x1xi32>
    %12 = arith.cmpi sge, %4, %11 : vector<32x1xi32>
    %c1_i32_14 = arith.constant 1 : i32
    %13 = tpu.dynamic_rotate %2 by %c1_i32_14 dim 0 : vector<32x128xf32>, i32 -> vector<32x128xf32>
    %cst = arith.constant 0.000000e+00 : f32
    %14 = vector.shape_cast %12 : vector<32x1xi1> to vector<32x1xi1>
    %15 = vector.broadcast %14 : vector<32x1xi1> to vector<32x128xi1>
    %16 = vector.broadcast %cst : f32 to vector<32x128xf32>
    %17 = arith.select %15, %13, %16 : vector<32x128xi1>, vector<32x128xf32>
    %18 = arith.truncf %17 : vector<32x128xf32> to vector<32x128xbf16>
    %19 = arith.truncf %2 : vector<32x128xf32> to vector<32x128xbf16>
    %20 = tpu.concatenate %18, %19 in 1 : vector<32x128xbf16>, vector<32x128xbf16> -> vector<32x256xbf16>
    %cst_15 = arith.constant dense<0.000000e+00> : vector<32x128xf32>
    %21 = tpu.matmul %20, %5, %cst_15 {dimension_numbers = #tpu.dot_dimension_numbers<[1], [0], [0], [1], [0, 0, 1, 1], [], []>} : vector<32x256xbf16>, vector<256x128xbf16>, vector<32x128xf32> -> vector<32x128xf32>
    %22 = vector.broadcast %6 : vector<1x128xf32> to vector<32x128xf32>
    %23 = arith.addf %21, %22 : vector<32x128xf32>
    %cst_16 = arith.constant 0.000000e+00 : f32
    %24 = vector.broadcast %cst_16 : f32 to vector<32x128xf32>
    %25 = arith.maximumf %23, %24 : vector<32x128xf32>
    %c1_i32_17 = arith.constant 1 : i32
    %26 = tpu.dynamic_rotate %25 by %c1_i32_17 dim 0 : vector<32x128xf32>, i32 -> vector<32x128xf32>
    %cst_18 = arith.constant 0.000000e+00 : f32
    %27 = vector.shape_cast %12 : vector<32x1xi1> to vector<32x1xi1>
    %28 = vector.broadcast %27 : vector<32x1xi1> to vector<32x128xi1>
    %29 = vector.broadcast %cst_18 : f32 to vector<32x128xf32>
    %30 = arith.select %28, %26, %29 : vector<32x128xi1>, vector<32x128xf32>
    %31 = arith.truncf %30 : vector<32x128xf32> to vector<32x128xbf16>
    %32 = arith.truncf %25 : vector<32x128xf32> to vector<32x128xbf16>
    %33 = tpu.concatenate %31, %32 in 1 : vector<32x128xbf16>, vector<32x128xbf16> -> vector<32x256xbf16>
    %cst_19 = arith.constant dense<0.000000e+00> : vector<32x128xf32>
    %34 = tpu.matmul %33, %7, %cst_19 {dimension_numbers = #tpu.dot_dimension_numbers<[1], [0], [0], [1], [0, 0, 1, 1], [], []>} : vector<32x256xbf16>, vector<256x128xbf16>, vector<32x128xf32> -> vector<32x128xf32>
    %35 = vector.broadcast %8 : vector<1x128xf32> to vector<32x128xf32>
    %36 = arith.addf %34, %35 : vector<32x128xf32>
    %cst_20 = arith.constant 0.000000e+00 : f32
    %37 = vector.broadcast %cst_20 : f32 to vector<32x128xf32>
    %38 = arith.maximumf %36, %37 : vector<32x128xf32>
    %39 = arith.truncf %2 : vector<32x128xf32> to vector<32x128xbf16>
    %cst_21 = arith.constant dense<0.000000e+00> : vector<32x128xf32>
    %40 = tpu.matmul %39, %9, %cst_21 {dimension_numbers = #tpu.dot_dimension_numbers<[1], [0], [0], [1], [0, 0, 1, 1], [], []>} : vector<32x128xbf16>, vector<128x128xbf16>, vector<32x128xf32> -> vector<32x128xf32>
    %41 = vector.broadcast %10 : vector<1x128xf32> to vector<32x128xf32>
    %42 = arith.addf %40, %41 : vector<32x128xf32>
    %43 = arith.addf %38, %42 : vector<32x128xf32>
    %cst_22 = arith.constant 0.000000e+00 : f32
    %44 = vector.broadcast %cst_22 : f32 to vector<32x128xf32>
    %45 = arith.maximumf %43, %44 : vector<32x128xf32>
    %c0_23 = arith.constant 0 : index
    %c0_24 = arith.constant 0 : index
    %46 = vector.load %arg8[%c0_23, %c0_24] : memref<256x128xbf16, #tpu.memory_space<vmem>>, vector<256x128xbf16>
    %c0_25 = arith.constant 0 : index
    %c0_26 = arith.constant 0 : index
    %47 = vector.load %arg9[%c0_25, %c0_26] : memref<1x128xf32, #tpu.memory_space<vmem>>, vector<1x128xf32>
    %c0_27 = arith.constant 0 : index
    %c0_28 = arith.constant 0 : index
    %48 = vector.load %arg10[%c0_27, %c0_28] : memref<256x128xbf16, #tpu.memory_space<vmem>>, vector<256x128xbf16>
    %c0_29 = arith.constant 0 : index
    %c0_30 = arith.constant 0 : index
    %49 = vector.load %arg11[%c0_29, %c0_30] : memref<1x128xf32, #tpu.memory_space<vmem>>, vector<1x128xf32>
    %c0_31 = arith.constant 0 : index
    %c0_32 = arith.constant 0 : index
    %50 = vector.load %arg12[%c0_31, %c0_32] : memref<128x128xbf16, #tpu.memory_space<vmem>>, vector<128x128xbf16>
    %c0_33 = arith.constant 0 : index
    %c0_34 = arith.constant 0 : index
    %51 = vector.load %arg13[%c0_33, %c0_34] : memref<1x128xf32, #tpu.memory_space<vmem>>, vector<1x128xf32>
    %c2_i32 = arith.constant 2 : i32
    %52 = vector.broadcast %c2_i32 : i32 to vector<32x1xi32>
    %53 = arith.cmpi sge, %4, %52 : vector<32x1xi32>
    %c2_i32_35 = arith.constant 2 : i32
    %54 = tpu.dynamic_rotate %45 by %c2_i32_35 dim 0 : vector<32x128xf32>, i32 -> vector<32x128xf32>
    %cst_36 = arith.constant 0.000000e+00 : f32
    %55 = vector.shape_cast %53 : vector<32x1xi1> to vector<32x1xi1>
    %56 = vector.broadcast %55 : vector<32x1xi1> to vector<32x128xi1>
    %57 = vector.broadcast %cst_36 : f32 to vector<32x128xf32>
    %58 = arith.select %56, %54, %57 : vector<32x128xi1>, vector<32x128xf32>
    %59 = arith.truncf %58 : vector<32x128xf32> to vector<32x128xbf16>
    %60 = arith.truncf %45 : vector<32x128xf32> to vector<32x128xbf16>
    %61 = tpu.concatenate %59, %60 in 1 : vector<32x128xbf16>, vector<32x128xbf16> -> vector<32x256xbf16>
    %cst_37 = arith.constant dense<0.000000e+00> : vector<32x128xf32>
    %62 = tpu.matmul %61, %46, %cst_37 {dimension_numbers = #tpu.dot_dimension_numbers<[1], [0], [0], [1], [0, 0, 1, 1], [], []>} : vector<32x256xbf16>, vector<256x128xbf16>, vector<32x128xf32> -> vector<32x128xf32>
    %63 = vector.broadcast %47 : vector<1x128xf32> to vector<32x128xf32>
    %64 = arith.addf %62, %63 : vector<32x128xf32>
    %cst_38 = arith.constant 0.000000e+00 : f32
    %65 = vector.broadcast %cst_38 : f32 to vector<32x128xf32>
    %66 = arith.maximumf %64, %65 : vector<32x128xf32>
    %c2_i32_39 = arith.constant 2 : i32
    %67 = tpu.dynamic_rotate %66 by %c2_i32_39 dim 0 : vector<32x128xf32>, i32 -> vector<32x128xf32>
    %cst_40 = arith.constant 0.000000e+00 : f32
    %68 = vector.shape_cast %53 : vector<32x1xi1> to vector<32x1xi1>
    %69 = vector.broadcast %68 : vector<32x1xi1> to vector<32x128xi1>
    %70 = vector.broadcast %cst_40 : f32 to vector<32x128xf32>
    %71 = arith.select %69, %67, %70 : vector<32x128xi1>, vector<32x128xf32>
    %72 = arith.truncf %71 : vector<32x128xf32> to vector<32x128xbf16>
    %73 = arith.truncf %66 : vector<32x128xf32> to vector<32x128xbf16>
    %74 = tpu.concatenate %72, %73 in 1 : vector<32x128xbf16>, vector<32x128xbf16> -> vector<32x256xbf16>
    %cst_41 = arith.constant dense<0.000000e+00> : vector<32x128xf32>
    %75 = tpu.matmul %74, %48, %cst_41 {dimension_numbers = #tpu.dot_dimension_numbers<[1], [0], [0], [1], [0, 0, 1, 1], [], []>} : vector<32x256xbf16>, vector<256x128xbf16>, vector<32x128xf32> -> vector<32x128xf32>
    %76 = vector.broadcast %49 : vector<1x128xf32> to vector<32x128xf32>
    %77 = arith.addf %75, %76 : vector<32x128xf32>
    %cst_42 = arith.constant 0.000000e+00 : f32
    %78 = vector.broadcast %cst_42 : f32 to vector<32x128xf32>
    %79 = arith.maximumf %77, %78 : vector<32x128xf32>
    %80 = arith.truncf %45 : vector<32x128xf32> to vector<32x128xbf16>
    %cst_43 = arith.constant dense<0.000000e+00> : vector<32x128xf32>
    %81 = tpu.matmul %80, %50, %cst_43 {dimension_numbers = #tpu.dot_dimension_numbers<[1], [0], [0], [1], [0, 0, 1, 1], [], []>} : vector<32x128xbf16>, vector<128x128xbf16>, vector<32x128xf32> -> vector<32x128xf32>
    %82 = vector.broadcast %51 : vector<1x128xf32> to vector<32x128xf32>
    %83 = arith.addf %81, %82 : vector<32x128xf32>
    %84 = arith.addf %79, %83 : vector<32x128xf32>
    %cst_44 = arith.constant 0.000000e+00 : f32
    %85 = vector.broadcast %cst_44 : f32 to vector<32x128xf32>
    %86 = arith.maximumf %84, %85 : vector<32x128xf32>
    %c0_45 = arith.constant 0 : index
    %c0_46 = arith.constant 0 : index
    %87 = vector.load %arg14[%c0_45, %c0_46] : memref<256x256xbf16, #tpu.memory_space<vmem>>, vector<256x256xbf16>
    %c0_47 = arith.constant 0 : index
    %c0_48 = arith.constant 0 : index
    %88 = vector.load %arg15[%c0_47, %c0_48] : memref<1x256xf32, #tpu.memory_space<vmem>>, vector<1x256xf32>
    %c0_49 = arith.constant 0 : index
    %c0_50 = arith.constant 0 : index
    %89 = vector.load %arg16[%c0_49, %c0_50] : memref<512x256xbf16, #tpu.memory_space<vmem>>, vector<512x256xbf16>
    %c0_51 = arith.constant 0 : index
    %c0_52 = arith.constant 0 : index
    %90 = vector.load %arg17[%c0_51, %c0_52] : memref<1x256xf32, #tpu.memory_space<vmem>>, vector<1x256xf32>
    %c0_53 = arith.constant 0 : index
    %c0_54 = arith.constant 0 : index
    %91 = vector.load %arg18[%c0_53, %c0_54] : memref<128x256xbf16, #tpu.memory_space<vmem>>, vector<128x256xbf16>
    %c0_55 = arith.constant 0 : index
    %c0_56 = arith.constant 0 : index
    %92 = vector.load %arg19[%c0_55, %c0_56] : memref<1x256xf32, #tpu.memory_space<vmem>>, vector<1x256xf32>
    %c4_i32 = arith.constant 4 : i32
    %93 = vector.broadcast %c4_i32 : i32 to vector<32x1xi32>
    %94 = arith.cmpi sge, %4, %93 : vector<32x1xi32>
    %c4_i32_57 = arith.constant 4 : i32
    %95 = tpu.dynamic_rotate %86 by %c4_i32_57 dim 0 : vector<32x128xf32>, i32 -> vector<32x128xf32>
    %cst_58 = arith.constant 0.000000e+00 : f32
    %96 = vector.shape_cast %94 : vector<32x1xi1> to vector<32x1xi1>
    %97 = vector.broadcast %96 : vector<32x1xi1> to vector<32x128xi1>
    %98 = vector.broadcast %cst_58 : f32 to vector<32x128xf32>
    %99 = arith.select %97, %95, %98 : vector<32x128xi1>, vector<32x128xf32>
    %100 = arith.truncf %99 : vector<32x128xf32> to vector<32x128xbf16>
    %101 = arith.truncf %86 : vector<32x128xf32> to vector<32x128xbf16>
    %102 = tpu.concatenate %100, %101 in 1 : vector<32x128xbf16>, vector<32x128xbf16> -> vector<32x256xbf16>
    %cst_59 = arith.constant dense<0.000000e+00> : vector<32x256xf32>
    %103 = tpu.matmul %102, %87, %cst_59 {dimension_numbers = #tpu.dot_dimension_numbers<[1], [0], [0], [1], [0, 0, 1, 1], [], []>} : vector<32x256xbf16>, vector<256x256xbf16>, vector<32x256xf32> -> vector<32x256xf32>
    %104 = vector.broadcast %88 : vector<1x256xf32> to vector<32x256xf32>
    %105 = arith.addf %103, %104 : vector<32x256xf32>
    %cst_60 = arith.constant 0.000000e+00 : f32
    %106 = vector.broadcast %cst_60 : f32 to vector<32x256xf32>
    %107 = arith.maximumf %105, %106 : vector<32x256xf32>
    %c4_i32_61 = arith.constant 4 : i32
    %108 = tpu.dynamic_rotate %107 by %c4_i32_61 dim 0 : vector<32x256xf32>, i32 -> vector<32x256xf32>
    %cst_62 = arith.constant 0.000000e+00 : f32
    %109 = vector.shape_cast %94 : vector<32x1xi1> to vector<32x1xi1>
    %110 = vector.broadcast %109 : vector<32x1xi1> to vector<32x256xi1>
    %111 = vector.broadcast %cst_62 : f32 to vector<32x256xf32>
    %112 = arith.select %110, %108, %111 : vector<32x256xi1>, vector<32x256xf32>
    %113 = arith.truncf %112 : vector<32x256xf32> to vector<32x256xbf16>
    %114 = arith.truncf %107 : vector<32x256xf32> to vector<32x256xbf16>
    %115 = tpu.concatenate %113, %114 in 1 : vector<32x256xbf16>, vector<32x256xbf16> -> vector<32x512xbf16>
    %cst_63 = arith.constant dense<0.000000e+00> : vector<32x256xf32>
    %116 = tpu.matmul %115, %89, %cst_63 {dimension_numbers = #tpu.dot_dimension_numbers<[1], [0], [0], [1], [0, 0, 1, 1], [], []>} : vector<32x512xbf16>, vector<512x256xbf16>, vector<32x256xf32> -> vector<32x256xf32>
    %117 = vector.broadcast %90 : vector<1x256xf32> to vector<32x256xf32>
    %118 = arith.addf %116, %117 : vector<32x256xf32>
    %cst_64 = arith.constant 0.000000e+00 : f32
    %119 = vector.broadcast %cst_64 : f32 to vector<32x256xf32>
    %120 = arith.maximumf %118, %119 : vector<32x256xf32>
    %121 = arith.truncf %86 : vector<32x128xf32> to vector<32x128xbf16>
    %cst_65 = arith.constant dense<0.000000e+00> : vector<32x256xf32>
    %122 = tpu.matmul %121, %91, %cst_65 {dimension_numbers = #tpu.dot_dimension_numbers<[1], [0], [0], [1], [0, 0, 1, 1], [], []>} : vector<32x128xbf16>, vector<128x256xbf16>, vector<32x256xf32> -> vector<32x256xf32>
    %123 = vector.broadcast %92 : vector<1x256xf32> to vector<32x256xf32>
    %124 = arith.addf %122, %123 : vector<32x256xf32>
    %125 = arith.addf %120, %124 : vector<32x256xf32>
    %cst_66 = arith.constant 0.000000e+00 : f32
    %126 = vector.broadcast %cst_66 : f32 to vector<32x256xf32>
    %127 = arith.maximumf %125, %126 : vector<32x256xf32>
    %128 = vector.shape_cast %127 : vector<32x256xf32> to vector<1x32x256xf32>
    %129 = arith.truncf %128 : vector<1x32x256xf32> to vector<1x32x256xbf16>
    %c0_67 = arith.constant 0 : index
    %c0_68 = arith.constant 0 : index
    %c0_69 = arith.constant 0 : index
    %130 = vector.load %arg20[%c0_67, %c0_68, %c0_69] : memref<1x32x256xbf16, #tpu.memory_space<vmem>>, vector<1x32x256xbf16>
    tpu.vector_store %arg20[%c0_67, %c0_68, %c0_69], %129 {strides = array<i32>} : memref<1x32x256xbf16, #tpu.memory_space<vmem>>, vector<1x32x256xbf16>,
    return
  }
  func.func @transform_0(%arg0: i32) -> (i32, i32, i32) {
    %c0_i32 = arith.constant 0 : i32
    %c0_i32_0 = arith.constant 0 : i32
    %c0_i32_1 = arith.constant 0 : i32
    return %arg0, %c0_i32, %c0_i32_0 : i32, i32, i32
  }
  func.func @transform_1(%arg0: i32) -> (i32, i32) {
    %c0_i32 = arith.constant 0 : i32
    %c0_i32_0 = arith.constant 0 : i32
    %c0_i32_1 = arith.constant 0 : i32
    return %c0_i32, %c0_i32_0 : i32, i32
  }
  func.func @transform_2(%arg0: i32) -> (i32, i32) {
    %c0_i32 = arith.constant 0 : i32
    %c0_i32_0 = arith.constant 0 : i32
    %c0_i32_1 = arith.constant 0 : i32
    return %c0_i32, %c0_i32_0 : i32, i32
  }
  func.func @transform_3(%arg0: i32) -> (i32, i32) {
    %c0_i32 = arith.constant 0 : i32
    %c0_i32_0 = arith.constant 0 : i32
    %c0_i32_1 = arith.constant 0 : i32
    return %c0_i32, %c0_i32_0 : i32, i32
  }
  func.func @transform_4(%arg0: i32) -> (i32, i32) {
    %c0_i32 = arith.constant 0 : i32
    %c0_i32_0 = arith.constant 0 : i32
    %c0_i32_1 = arith.constant 0 : i32
    return %c0_i32, %c0_i32_0 : i32, i32
  }
  func.func @transform_5(%arg0: i32) -> (i32, i32) {
    %c0_i32 = arith.constant 0 : i32
    %c0_i32_0 = arith.constant 0 : i32
    %c0_i32_1 = arith.constant 0 : i32
    return %c0_i32, %c0_i32_0 : i32, i32
  }
  func.func @transform_6(%arg0: i32) -> (i32, i32) {
    %c0_i32 = arith.constant 0 : i32
    %c0_i32_0 = arith.constant 0 : i32
    %c0_i32_1 = arith.constant 0 : i32
    return %c0_i32, %c0_i32_0 : i32, i32
  }
  func.func @transform_7(%arg0: i32) -> (i32, i32) {
    %c0_i32 = arith.constant 0 : i32
    %c0_i32_0 = arith.constant 0 : i32
    %c0_i32_1 = arith.constant 0 : i32
    return %c0_i32, %c0_i32_0 : i32, i32
  }
  func.func @transform_8(%arg0: i32) -> (i32, i32) {
    %c0_i32 = arith.constant 0 : i32
    %c0_i32_0 = arith.constant 0 : i32
    %c0_i32_1 = arith.constant 0 : i32
    return %c0_i32, %c0_i32_0 : i32, i32
  }
  func.func @transform_9(%arg0: i32) -> (i32, i32) {
    %c0_i32 = arith.constant 0 : i32
    %c0_i32_0 = arith.constant 0 : i32
    %c0_i32_1 = arith.constant 0 : i32
    return %c0_i32, %c0_i32_0 : i32, i32
  }
  func.func @transform_10(%arg0: i32) -> (i32, i32) {
    %c0_i32 = arith.constant 0 : i32
    %c0_i32_0 = arith.constant 0 : i32
    %c0_i32_1 = arith.constant 0 : i32
    return %c0_i32, %c0_i32_0 : i32, i32
  }
  func.func @transform_11(%arg0: i32) -> (i32, i32) {
    %c0_i32 = arith.constant 0 : i32
    %c0_i32_0 = arith.constant 0 : i32
    %c0_i32_1 = arith.constant 0 : i32
    return %c0_i32, %c0_i32_0 : i32, i32
  }
  func.func @transform_12(%arg0: i32) -> (i32, i32) {
    %c0_i32 = arith.constant 0 : i32
    %c0_i32_0 = arith.constant 0 : i32
    %c0_i32_1 = arith.constant 0 : i32
    return %c0_i32, %c0_i32_0 : i32, i32
  }
  func.func @transform_13(%arg0: i32) -> (i32, i32) {
    %c0_i32 = arith.constant 0 : i32
    %c0_i32_0 = arith.constant 0 : i32
    %c0_i32_1 = arith.constant 0 : i32
    return %c0_i32, %c0_i32_0 : i32, i32
  }
  func.func @transform_14(%arg0: i32) -> (i32, i32) {
    %c0_i32 = arith.constant 0 : i32
    %c0_i32_0 = arith.constant 0 : i32
    %c0_i32_1 = arith.constant 0 : i32
    return %c0_i32, %c0_i32_0 : i32, i32
  }
  func.func @transform_15(%arg0: i32) -> (i32, i32) {
    %c0_i32 = arith.constant 0 : i32
    %c0_i32_0 = arith.constant 0 : i32
    %c0_i32_1 = arith.constant 0 : i32
    return %c0_i32, %c0_i32_0 : i32, i32
  }
  func.func @transform_16(%arg0: i32) -> (i32, i32) {
    %c0_i32 = arith.constant 0 : i32
    %c0_i32_0 = arith.constant 0 : i32
    %c0_i32_1 = arith.constant 0 : i32
    return %c0_i32, %c0_i32_0 : i32, i32
  }
  func.func @transform_17(%arg0: i32) -> (i32, i32) {
    %c0_i32 = arith.constant 0 : i32
    %c0_i32_0 = arith.constant 0 : i32
    %c0_i32_1 = arith.constant 0 : i32
    return %c0_i32, %c0_i32_0 : i32, i32
  }
  func.func @transform_18(%arg0: i32) -> (i32, i32) {
    %c0_i32 = arith.constant 0 : i32
    %c0_i32_0 = arith.constant 0 : i32
    %c0_i32_1 = arith.constant 0 : i32
    return %c0_i32, %c0_i32_0 : i32, i32
  }
  func.func @transform_19(%arg0: i32) -> (i32, i32, i32) {
    %c0_i32 = arith.constant 0 : i32
    %c0_i32_0 = arith.constant 0 : i32
    %c0_i32_1 = arith.constant 0 : i32
    return %arg0, %c0_i32, %c0_i32_0 : i32, i32, i32
  }
}

module attributes {stable_mosaic.version = 11 : i64} {
  func.func @_tcn_fused_kernel(%arg0: i32, %arg1: memref<1x32x128xbf16, #tpu.memory_space<vmem>>, %arg2: memref<256x128xbf16, #tpu.memory_space<vmem>>, %arg3: memref<1x128xf32, #tpu.memory_space<vmem>>, %arg4: memref<256x128xbf16, #tpu.memory_space<vmem>>, %arg5: memref<1x128xf32, #tpu.memory_space<vmem>>, %arg6: memref<128x128xbf16, #tpu.memory_space<vmem>>, %arg7: memref<1x128xf32, #tpu.memory_space<vmem>>, %arg8: memref<256x128xbf16, #tpu.memory_space<vmem>>, %arg9: memref<1x128xf32, #tpu.memory_space<vmem>>, %arg10: memref<256x128xbf16, #tpu.memory_space<vmem>>, %arg11: memref<1x128xf32, #tpu.memory_space<vmem>>, %arg12: memref<128x128xbf16, #tpu.memory_space<vmem>>, %arg13: memref<1x128xf32, #tpu.memory_space<vmem>>, %arg14: memref<256x256xbf16, #tpu.memory_space<vmem>>, %arg15: memref<1x256xf32, #tpu.memory_space<vmem>>, %arg16: memref<512x256xbf16, #tpu.memory_space<vmem>>, %arg17: memref<1x256xf32, #tpu.memory_space<vmem>>, %arg18: memref<128x256xbf16, #tpu.memory_space<vmem>>, %arg19: memref<1x256xf32, #tpu.memory_space<vmem>>, %arg20: memref<1x32x256xbf16, #tpu.memory_space<vmem>>) attributes {dimension_semantics = [#tpu.dimension_semantics<parallel>], iteration_bounds = array<i64: 2>, scalar_prefetch = 0 : i64, scratch_operands = 0 : i64, tpu.core_type = #tpu.core_type<tc>, window_params = [{transform_indices = @transform_0, window_bounds = array<i64: 1, 32, 128>}, {pipeline_mode = #tpu.pipeline_mode<synchronous>, transform_indices = @transform_1, window_bounds = array<i64: 256, 128>}, {pipeline_mode = #tpu.pipeline_mode<synchronous>, transform_indices = @transform_2, window_bounds = array<i64: 1, 128>}, {pipeline_mode = #tpu.pipeline_mode<synchronous>, transform_indices = @transform_3, window_bounds = array<i64: 256, 128>}, {pipeline_mode = #tpu.pipeline_mode<synchronous>, transform_indices = @transform_4, window_bounds = array<i64: 1, 128>}, {pipeline_mode = #tpu.pipeline_mode<synchronous>, transform_indices = @transform_5, window_bounds = array<i64: 128, 128>}, {pipeline_mode = #tpu.pipeline_mode<synchronous>, transform_indices = @transform_6, window_bounds = array<i64: 1, 128>}, {pipeline_mode = #tpu.pipeline_mode<synchronous>, transform_indices = @transform_7, window_bounds = array<i64: 256, 128>}, {pipeline_mode = #tpu.pipeline_mode<synchronous>, transform_indices = @transform_8, window_bounds = array<i64: 1, 128>}, {pipeline_mode = #tpu.pipeline_mode<synchronous>, transform_indices = @transform_9, window_bounds = array<i64: 256, 128>}, {pipeline_mode = #tpu.pipeline_mode<synchronous>, transform_indices = @transform_10, window_bounds = array<i64: 1, 128>}, {pipeline_mode = #tpu.pipeline_mode<synchronous>, transform_indices = @transform_11, window_bounds = array<i64: 128, 128>}, {pipeline_mode = #tpu.pipeline_mode<synchronous>, transform_indices = @transform_12, window_bounds = array<i64: 1, 128>}, {pipeline_mode = #tpu.pipeline_mode<synchronous>, transform_indices = @transform_13, window_bounds = array<i64: 256, 256>}, {pipeline_mode = #tpu.pipeline_mode<synchronous>, transform_indices = @transform_14, window_bounds = array<i64: 1, 256>}, {pipeline_mode = #tpu.pipeline_mode<synchronous>, transform_indices = @transform_15, window_bounds = array<i64: 512, 256>}, {pipeline_mode = #tpu.pipeline_mode<synchronous>, transform_indices = @transform_16, window_bounds = array<i64: 1, 256>}, {pipeline_mode = #tpu.pipeline_mode<synchronous>, transform_indices = @transform_17, window_bounds = array<i64: 128, 256>}, {pipeline_mode = #tpu.pipeline_mode<synchronous>, transform_indices = @transform_18, window_bounds = array<i64: 1, 256>}, {transform_indices = @transform_19, window_bounds = array<i64: 1, 32, 256>}]} {
    %c0 = arith.constant 0 : index
    %c0_0 = arith.constant 0 : index
    %c0_1 = arith.constant 0 : index
    %0 = vector.load %arg1[%c0, %c0_0, %c0_1] : memref<1x32x128xbf16, #tpu.memory_space<vmem>>, vector<1x32x128xbf16>
    %1 = vector.shape_cast %0 : vector<1x32x128xbf16> to vector<32x128xbf16>
    %2 = arith.extf %1 : vector<32x128xbf16> to vector<32x128xf32>
    %3 = tpu.iota {dimensions = array<i32: 1>} : vector<1x32x1xi32>
    %4 = vector.shape_cast %3 : vector<1x32x1xi32> to vector<32x1xi32>
    %c0_2 = arith.constant 0 : index
    %c0_3 = arith.constant 0 : index
    %5 = vector.load %arg2[%c0_2, %c0_3] : memref<256x128xbf16, #tpu.memory_space<vmem>>, vector<256x128xbf16>
    %c0_4 = arith.constant 0 : index
    %c0_5 = arith.constant 0 : index
    %6 = vector.load %arg3[%c0_4, %c0_5] : memref<1x128xf32, #tpu.memory_space<vmem>>, vector<1x128xf32>
    %c0_6 = arith.constant 0 : index
    %c0_7 = arith.constant 0 : index
    %7 = vector.load %arg4[%c0_6, %c0_7] : memref<256x128xbf16, #tpu.memory_space<vmem>>, vector<256x128xbf16>
    %c0_8 = arith.constant 0 : index
    %c0_9 = arith.constant 0 : index
    %8 = vector.load %arg5[%c0_8, %c0_9] : memref<1x128xf32, #tpu.memory_space<vmem>>, vector<1x128xf32>
    %c0_10 = arith.constant 0 : index
    %c0_11 = arith.constant 0 : index
    %9 = vector.load %arg6[%c0_10, %c0_11] : memref<128x128xbf16, #tpu.memory_space<vmem>>, vector<128x128xbf16>
    %c0_12 = arith.constant 0 : index
    %c0_13 = arith.constant 0 : index
    %10 = vector.load %arg7[%c0_12, %c0_13] : memref<1x128xf32, #tpu.memory_space<vmem>>, vector<1x128xf32>
    %c1_i32 = arith.constant 1 : i32
    %11 = vector.broadcast %c1_i32 : i32 to vector<32x1xi32>
    %12 = arith.cmpi sge, %4, %11 : vector<32x1xi32>
    %c1_i32_14 = arith.constant 1 : i32
    %13 = tpu.dynamic_rotate %2 by %c1_i32_14 dim 0 : vector<32x128xf32>, i32 -> vector<32x128xf32>
    %cst = arith.constant 0.000000e+00 : f32
    %14 = vector.shape_cast %12 : vector<32x1xi1> to vector<32x1xi1>
    %15 = vector.broadcast %14 : vector<32x1xi1> to vector<32x128xi1>
    %16 = vector.broadcast %cst : f32 to vector<32x128xf32>
    %17 = arith.select %15, %13, %16 : vector<32x128xi1>, vector<32x128xf32>
    %18 = arith.truncf %17 : vector<32x128xf32> to vector<32x128xbf16>
    %19 = arith.truncf %2 : vector<32x128xf32> to vector<32x128xbf16>
    %20 = tpu.concatenate %18, %19 in 1 : vector<32x128xbf16>, vector<32x128xbf16> -> vector<32x256xbf16>
    %cst_15 = arith.constant dense<0.000000e+00> : vector<32x128xf32>
    %21 = tpu.matmul %20, %5, %cst_15 {dimension_numbers = #tpu.dot_dimension_numbers<[1], [0], [0], [1], [0, 0, 1, 1], [], []>} : vector<32x256xbf16>, vector<256x128xbf16>, vector<32x128xf32> -> vector<32x128xf32>
    %22 = vector.broadcast %6 : vector<1x128xf32> to vector<32x128xf32>
    %23 = arith.addf %21, %22 : vector<32x128xf32>
    %cst_16 = arith.constant 0.000000e+00 : f32
    %24 = vector.broadcast %cst_16 : f32 to vector<32x128xf32>
    %25 = arith.maximumf %23, %24 : vector<32x128xf32>
    %c1_i32_17 = arith.constant 1 : i32
    %26 = tpu.dynamic_rotate %25 by %c1_i32_17 dim 0 : vector<32x128xf32>, i32 -> vector<32x128xf32>
    %cst_18 = arith.constant 0.000000e+00 : f32
    %27 = vector.shape_cast %12 : vector<32x1xi1> to vector<32x1xi1>
    %28 = vector.broadcast %27 : vector<32x1xi1> to vector<32x128xi1>
    %29 = vector.broadcast %cst_18 : f32 to vector<32x128xf32>
    %30 = arith.select %28, %26, %29 : vector<32x128xi1>, vector<32x128xf32>
    %31 = arith.truncf %30 : vector<32x128xf32> to vector<32x128xbf16>
    %32 = arith.truncf %25 : vector<32x128xf32> to vector<32x128xbf16>
    %33 = tpu.concatenate %31, %32 in 1 : vector<32x128xbf16>, vector<32x128xbf16> -> vector<32x256xbf16>
    %cst_19 = arith.constant dense<0.000000e+00> : vector<32x128xf32>
    %34 = tpu.matmul %33, %7, %cst_19 {dimension_numbers = #tpu.dot_dimension_numbers<[1], [0], [0], [1], [0, 0, 1, 1], [], []>} : vector<32x256xbf16>, vector<256x128xbf16>, vector<32x128xf32> -> vector<32x128xf32>
    %35 = vector.broadcast %8 : vector<1x128xf32> to vector<32x128xf32>
    %36 = arith.addf %34, %35 : vector<32x128xf32>
    %cst_20 = arith.constant 0.000000e+00 : f32
    %37 = vector.broadcast %cst_20 : f32 to vector<32x128xf32>
    %38 = arith.maximumf %36, %37 : vector<32x128xf32>
    %39 = arith.truncf %2 : vector<32x128xf32> to vector<32x128xbf16>
    %cst_21 = arith.constant dense<0.000000e+00> : vector<32x128xf32>
    %40 = tpu.matmul %39, %9, %cst_21 {dimension_numbers = #tpu.dot_dimension_numbers<[1], [0], [0], [1], [0, 0, 1, 1], [], []>} : vector<32x128xbf16>, vector<128x128xbf16>, vector<32x128xf32> -> vector<32x128xf32>
    %41 = vector.broadcast %10 : vector<1x128xf32> to vector<32x128xf32>
    %42 = arith.addf %40, %41 : vector<32x128xf32>
    %43 = arith.addf %38, %42 : vector<32x128xf32>
    %cst_22 = arith.constant 0.000000e+00 : f32
    %44 = vector.broadcast %cst_22 : f32 to vector<32x128xf32>
    %45 = arith.maximumf %43, %44 : vector<32x128xf32>
    %c0_23 = arith.constant 0 : index
    %c0_24 = arith.constant 0 : index
    %46 = vector.load %arg8[%c0_23, %c0_24] : memref<256x128xbf16, #tpu.memory_space<vmem>>, vector<256x128xbf16>
    %c0_25 = arith.constant 0 : index
    %c0_26 = arith.constant 0 : index
    %47 = vector.load %arg9[%c0_25, %c0_26] : memref<1x128xf32, #tpu.memory_space<vmem>>, vector<1x128xf32>
    %c0_27 = arith.constant 0 : index
    %c0_28 = arith.constant 0 : index
    %48 = vector.load %arg10[%c0_27, %c0_28] : memref<256x128xbf16, #tpu.memory_space<vmem>>, vector<256x128xbf16>
    %c0_29 = arith.constant 0 : index
    %c0_30 = arith.constant 0 : index
    %49 = vector.load %arg11[%c0_29, %c0_30] : memref<1x128xf32, #tpu.memory_space<vmem>>, vector<1x128xf32>
    %c0_31 = arith.constant 0 : index
    %c0_32 = arith.constant 0 : index
    %50 = vector.load %arg12[%c0_31, %c0_32] : memref<128x128xbf16, #tpu.memory_space<vmem>>, vector<128x128xbf16>
    %c0_33 = arith.constant 0 : index
    %c0_34 = arith.constant 0 : index
    %51 = vector.load %arg13[%c0_33, %c0_34] : memref<1x128xf32, #tpu.memory_space<vmem>>, vector<1x128xf32>
    %c2_i32 = arith.constant 2 : i32
    %52 = vector.broadcast %c2_i32 : i32 to vector<32x1xi32>
    %53 = arith.cmpi sge, %4, %52 : vector<32x1xi32>
    %c2_i32_35 = arith.constant 2 : i32
    %54 = tpu.dynamic_rotate %45 by %c2_i32_35 dim 0 : vector<32x128xf32>, i32 -> vector<32x128xf32>
    %cst_36 = arith.constant 0.000000e+00 : f32
    %55 = vector.shape_cast %53 : vector<32x1xi1> to vector<32x1xi1>
    %56 = vector.broadcast %55 : vector<32x1xi1> to vector<32x128xi1>
    %57 = vector.broadcast %cst_36 : f32 to vector<32x128xf32>
    %58 = arith.select %56, %54, %57 : vector<32x128xi1>, vector<32x128xf32>
    %59 = arith.truncf %58 : vector<32x128xf32> to vector<32x128xbf16>
    %60 = arith.truncf %45 : vector<32x128xf32> to vector<32x128xbf16>
    %61 = tpu.concatenate %59, %60 in 1 : vector<32x128xbf16>, vector<32x128xbf16> -> vector<32x256xbf16>
    %cst_37 = arith.constant dense<0.000000e+00> : vector<32x128xf32>
    %62 = tpu.matmul %61, %46, %cst_37 {dimension_numbers = #tpu.dot_dimension_numbers<[1], [0], [0], [1], [0, 0, 1, 1], [], []>} : vector<32x256xbf16>, vector<256x128xbf16>, vector<32x128xf32> -> vector<32x128xf32>
    %63 = vector.broadcast %47 : vector<1x128xf32> to vector<32x128xf32>
    %64 = arith.addf %62, %63 : vector<32x128xf32>
    %cst_38 = arith.constant 0.000000e+00 : f32
    %65 = vector.broadcast %cst_38 : f32 to vector<32x128xf32>
    %66 = arith.maximumf %64, %65 : vector<32x128xf32>
    %c2_i32_39 = arith.constant 2 : i32
    %67 = tpu.dynamic_rotate %66 by %c2_i32_39 dim 0 : vector<32x128xf32>, i32 -> vector<32x128xf32>
    %cst_40 = arith.constant 0.000000e+00 : f32
    %68 = vector.shape_cast %53 : vector<32x1xi1> to vector<32x1xi1>
    %69 = vector.broadcast %68 : vector<32x1xi1> to vector<32x128xi1>
    %70 = vector.broadcast %cst_40 : f32 to vector<32x128xf32>
    %71 = arith.select %69, %67, %70 : vector<32x128xi1>, vector<32x128xf32>
    %72 = arith.truncf %71 : vector<32x128xf32> to vector<32x128xbf16>
    %73 = arith.truncf %66 : vector<32x128xf32> to vector<32x128xbf16>
    %74 = tpu.concatenate %72, %73 in 1 : vector<32x128xbf16>, vector<32x128xbf16> -> vector<32x256xbf16>
    %cst_41 = arith.constant dense<0.000000e+00> : vector<32x128xf32>
    %75 = tpu.matmul %74, %48, %cst_41 {dimension_numbers = #tpu.dot_dimension_numbers<[1], [0], [0], [1], [0, 0, 1, 1], [], []>} : vector<32x256xbf16>, vector<256x128xbf16>, vector<32x128xf32> -> vector<32x128xf32>
    %76 = vector.broadcast %49 : vector<1x128xf32> to vector<32x128xf32>
    %77 = arith.addf %75, %76 : vector<32x128xf32>
    %cst_42 = arith.constant 0.000000e+00 : f32
    %78 = vector.broadcast %cst_42 : f32 to vector<32x128xf32>
    %79 = arith.maximumf %77, %78 : vector<32x128xf32>
    %80 = arith.truncf %45 : vector<32x128xf32> to vector<32x128xbf16>
    %cst_43 = arith.constant dense<0.000000e+00> : vector<32x128xf32>
    %81 = tpu.matmul %80, %50, %cst_43 {dimension_numbers = #tpu.dot_dimension_numbers<[1], [0], [0], [1], [0, 0, 1, 1], [], []>} : vector<32x128xbf16>, vector<128x128xbf16>, vector<32x128xf32> -> vector<32x128xf32>
    %82 = vector.broadcast %51 : vector<1x128xf32> to vector<32x128xf32>
    %83 = arith.addf %81, %82 : vector<32x128xf32>
    %84 = arith.addf %79, %83 : vector<32x128xf32>
    %cst_44 = arith.constant 0.000000e+00 : f32
    %85 = vector.broadcast %cst_44 : f32 to vector<32x128xf32>
    %86 = arith.maximumf %84, %85 : vector<32x128xf32>
    %c0_45 = arith.constant 0 : index
    %c0_46 = arith.constant 0 : index
    %87 = vector.load %arg14[%c0_45, %c0_46] : memref<256x256xbf16, #tpu.memory_space<vmem>>, vector<256x256xbf16>
    %c0_47 = arith.constant 0 : index
    %c0_48 = arith.constant 0 : index
    %88 = vector.load %arg15[%c0_47, %c0_48] : memref<1x256xf32, #tpu.memory_space<vmem>>, vector<1x256xf32>
    %c0_49 = arith.constant 0 : index
    %c0_50 = arith.constant 0 : index
    %89 = vector.load %arg16[%c0_49, %c0_50] : memref<512x256xbf16, #tpu.memory_space<vmem>>, vector<512x256xbf16>
    %c0_51 = arith.constant 0 : index
    %c0_52 = arith.constant 0 : index
    %90 = vector.load %arg17[%c0_51, %c0_52] : memref<1x256xf32, #tpu.memory_space<vmem>>, vector<1x256xf32>
    %c0_53 = arith.constant 0 : index
    %c0_54 = arith.constant 0 : index
    %91 = vector.load %arg18[%c0_53, %c0_54] : memref<128x256xbf16, #tpu.memory_space<vmem>>, vector<128x256xbf16>
    %c0_55 = arith.constant 0 : index
    %c0_56 = arith.constant 0 : index
    %92 = vector.load %arg19[%c0_55, %c0_56] : memref<1x256xf32, #tpu.memory_space<vmem>>, vector<1x256xf32>
    %c4_i32 = arith.constant 4 : i32
    %93 = vector.broadcast %c4_i32 : i32 to vector<32x1xi32>
    %94 = arith.cmpi sge, %4, %93 : vector<32x1xi32>
    %c4_i32_57 = arith.constant 4 : i32
    %95 = tpu.dynamic_rotate %86 by %c4_i32_57 dim 0 : vector<32x128xf32>, i32 -> vector<32x128xf32>
    %cst_58 = arith.constant 0.000000e+00 : f32
    %96 = vector.shape_cast %94 : vector<32x1xi1> to vector<32x1xi1>
    %97 = vector.broadcast %96 : vector<32x1xi1> to vector<32x128xi1>
    %98 = vector.broadcast %cst_58 : f32 to vector<32x128xf32>
    %99 = arith.select %97, %95, %98 : vector<32x128xi1>, vector<32x128xf32>
    %100 = arith.truncf %99 : vector<32x128xf32> to vector<32x128xbf16>
    %101 = arith.truncf %86 : vector<32x128xf32> to vector<32x128xbf16>
    %102 = tpu.concatenate %100, %101 in 1 : vector<32x128xbf16>, vector<32x128xbf16> -> vector<32x256xbf16>
    %cst_59 = arith.constant dense<0.000000e+00> : vector<32x256xf32>
    %103 = tpu.matmul %102, %87, %cst_59 {dimension_numbers = #tpu.dot_dimension_numbers<[1], [0], [0], [1], [0, 0, 1, 1], [], []>} : vector<32x256xbf16>, vector<256x256xbf16>, vector<32x256xf32> -> vector<32x256xf32>
    %104 = vector.broadcast %88 : vector<1x256xf32> to vector<32x256xf32>
    %105 = arith.addf %103, %104 : vector<32x256xf32>
    %cst_60 = arith.constant 0.000000e+00 : f32
    %106 = vector.broadcast %cst_60 : f32 to vector<32x256xf32>
    %107 = arith.maximumf %105, %106 : vector<32x256xf32>
    %c4_i32_61 = arith.constant 4 : i32
    %108 = tpu.dynamic_rotate %107 by %c4_i32_61 dim 0 : vector<32x256xf32>, i32 -> vector<32x256xf32>
    %cst_62 = arith.constant 0.000000e+00 : f32
    %109 = vector.shape_cast %94 : vector<32x1xi1> to vector<32x1xi1>
    %110 = vector.broadcast %109 : vector<32x1xi1> to vector<32x256xi1>
    %111 = vector.broadcast %cst_62 : f32 to vector<32x256xf32>
    %112 = arith.select %110, %108, %111 : vector<32x256xi1>, vector<32x256xf32>
    %113 = arith.truncf %112 : vector<32x256xf32> to vector<32x256xbf16>
    %114 = arith.truncf %107 : vector<32x256xf32> to vector<32x256xbf16>
    %115 = tpu.concatenate %113, %114 in 1 : vector<32x256xbf16>, vector<32x256xbf16> -> vector<32x512xbf16>
    %cst_63 = arith.constant dense<0.000000e+00> : vector<32x256xf32>
    %116 = tpu.matmul %115, %89, %cst_63 {dimension_numbers = #tpu.dot_dimension_numbers<[1], [0], [0], [1], [0, 0, 1, 1], [], []>} : vector<32x512xbf16>, vector<512x256xbf16>, vector<32x256xf32> -> vector<32x256xf32>
    %117 = vector.broadcast %90 : vector<1x256xf32> to vector<32x256xf32>
    %118 = arith.addf %116, %117 : vector<32x256xf32>
    %cst_64 = arith.constant 0.000000e+00 : f32
    %119 = vector.broadcast %cst_64 : f32 to vector<32x256xf32>
    %120 = arith.maximumf %118, %119 : vector<32x256xf32>
    %121 = arith.truncf %86 : vector<32x128xf32> to vector<32x128xbf16>
    %cst_65 = arith.constant dense<0.000000e+00> : vector<32x256xf32>
    %122 = tpu.matmul %121, %91, %cst_65 {dimension_numbers = #tpu.dot_dimension_numbers<[1], [0], [0], [1], [0, 0, 1, 1], [], []>} : vector<32x128xbf16>, vector<128x256xbf16>, vector<32x256xf32> -> vector<32x256xf32>
    %123 = vector.broadcast %92 : vector<1x256xf32> to vector<32x256xf32>
    %124 = arith.addf %122, %123 : vector<32x256xf32>
    %125 = arith.addf %120, %124 : vector<32x256xf32>
    %cst_66 = arith.constant 0.000000e+00 : f32
    %126 = vector.broadcast %cst_66 : f32 to vector<32x256xf32>
    %127 = arith.maximumf %125, %126 : vector<32x256xf32>
    %128 = vector.shape_cast %127 : vector<32x256xf32> to vector<1x32x256xf32>
    %129 = arith.truncf %128 : vector<1x32x256xf32> to vector<1x32x256xbf16>
    %c0_67 = arith.constant 0 : index
    %c0_68 = arith.constant 0 : index
    %c0_69 = arith.constant 0 : index
    %130 = vector.load %arg20[%c0_67, %c0_68, %c0_69] : memref<1x32x256xbf16, #tpu.memory_space<vmem>>, vector<1x32x256xbf16>
    tpu.vector_store %arg20[%c0_67, %c0_68, %c0_69], %129 {strides = array<i32>} : memref<1x32x256xbf16, #tpu.memory_space<vmem>>, vector<1x32x256xbf16>,
    return
  }
  func.func @transform_0(%arg0: i32) -> (i32, i32, i32) {
    %c0_i32 = arith.constant 0 : i32
    %c0_i32_0 = arith.constant 0 : i32
    %c0_i32_1 = arith.constant 0 : i32
    return %arg0, %c0_i32, %c0_i32_0 : i32, i32, i32
  }
  func.func @transform_1(%arg0: i32) -> (i32, i32) {
    %c0_i32 = arith.constant 0 : i32
    %c0_i32_0 = arith.constant 0 : i32
    %c0_i32_1 = arith.constant 0 : i32
    return %c0_i32, %c0_i32_0 : i32, i32
  }
  func.func @transform_2(%arg0: i32) -> (i32, i32) {
    %c0_i32 = arith.constant 0 : i32
    %c0_i32_0 = arith.constant 0 : i32
    %c0_i32_1 = arith.constant 0 : i32
    return %c0_i32, %c0_i32_0 : i32, i32
  }
  func.func @transform_3(%arg0: i32) -> (i32, i32) {
    %c0_i32 = arith.constant 0 : i32
    %c0_i32_0 = arith.constant 0 : i32
    %c0_i32_1 = arith.constant 0 : i32
    return %c0_i32, %c0_i32_0 : i32, i32
  }
  func.func @transform_4(%arg0: i32) -> (i32, i32) {
    %c0_i32 = arith.constant 0 : i32
    %c0_i32_0 = arith.constant 0 : i32
    %c0_i32_1 = arith.constant 0 : i32
    return %c0_i32, %c0_i32_0 : i32, i32
  }
  func.func @transform_5(%arg0: i32) -> (i32, i32) {
    %c0_i32 = arith.constant 0 : i32
    %c0_i32_0 = arith.constant 0 : i32
    %c0_i32_1 = arith.constant 0 : i32
    return %c0_i32, %c0_i32_0 : i32, i32
  }
  func.func @transform_6(%arg0: i32) -> (i32, i32) {
    %c0_i32 = arith.constant 0 : i32
    %c0_i32_0 = arith.constant 0 : i32
    %c0_i32_1 = arith.constant 0 : i32
    return %c0_i32, %c0_i32_0 : i32, i32
  }
  func.func @transform_7(%arg0: i32) -> (i32, i32) {
    %c0_i32 = arith.constant 0 : i32
    %c0_i32_0 = arith.constant 0 : i32
    %c0_i32_1 = arith.constant 0 : i32
    return %c0_i32, %c0_i32_0 : i32, i32
  }
  func.func @transform_8(%arg0: i32) -> (i32, i32) {
    %c0_i32 = arith.constant 0 : i32
    %c0_i32_0 = arith.constant 0 : i32
    %c0_i32_1 = arith.constant 0 : i32
    return %c0_i32, %c0_i32_0 : i32, i32
  }
  func.func @transform_9(%arg0: i32) -> (i32, i32) {
    %c0_i32 = arith.constant 0 : i32
    %c0_i32_0 = arith.constant 0 : i32
    %c0_i32_1 = arith.constant 0 : i32
    return %c0_i32, %c0_i32_0 : i32, i32
  }
  func.func @transform_10(%arg0: i32) -> (i32, i32) {
    %c0_i32 = arith.constant 0 : i32
    %c0_i32_0 = arith.constant 0 : i32
    %c0_i32_1 = arith.constant 0 : i32
    return %c0_i32, %c0_i32_0 : i32, i32
  }
  func.func @transform_11(%arg0: i32) -> (i32, i32) {
    %c0_i32 = arith.constant 0 : i32
    %c0_i32_0 = arith.constant 0 : i32
    %c0_i32_1 = arith.constant 0 : i32
    return %c0_i32, %c0_i32_0 : i32, i32
  }
  func.func @transform_12(%arg0: i32) -> (i32, i32) {
    %c0_i32 = arith.constant 0 : i32
    %c0_i32_0 = arith.constant 0 : i32
    %c0_i32_1 = arith.constant 0 : i32
    return %c0_i32, %c0_i32_0 : i32, i32
  }
  func.func @transform_13(%arg0: i32) -> (i32, i32) {
    %c0_i32 = arith.constant 0 : i32
    %c0_i32_0 = arith.constant 0 : i32
    %c0_i32_1 = arith.constant 0 : i32
    return %c0_i32, %c0_i32_0 : i32, i32
  }
  func.func @transform_14(%arg0: i32) -> (i32, i32) {
    %c0_i32 = arith.constant 0 : i32
    %c0_i32_0 = arith.constant 0 : i32
    %c0_i32_1 = arith.constant 0 : i32
    return %c0_i32, %c0_i32_0 : i32, i32
  }
  func.func @transform_15(%arg0: i32) -> (i32, i32) {
    %c0_i32 = arith.constant 0 : i32
    %c0_i32_0 = arith.constant 0 : i32
    %c0_i32_1 = arith.constant 0 : i32
    return %c0_i32, %c0_i32_0 : i32, i32
  }
  func.func @transform_16(%arg0: i32) -> (i32, i32) {
    %c0_i32 = arith.constant 0 : i32
    %c0_i32_0 = arith.constant 0 : i32
    %c0_i32_1 = arith.constant 0 : i32
    return %c0_i32, %c0_i32_0 : i32, i32
  }
  func.func @transform_17(%arg0: i32) -> (i32, i32) {
    %c0_i32 = arith.constant 0 : i32
    %c0_i32_0 = arith.constant 0 : i32
    %c0_i32_1 = arith.constant 0 : i32
    return %c0_i32, %c0_i32_0 : i32, i32
  }
  func.func @transform_18(%arg0: i32) -> (i32, i32) {
    %c0_i32 = arith.constant 0 : i32
    %c0_i32_0 = arith.constant 0 : i32
    %c0_i32_1 = arith.constant 0 : i32
    return %c0_i32, %c0_i32_0 : i32, i32
  }
  func.func @transform_19(%arg0: i32) -> (i32, i32, i32) {
    %c0_i32 = arith.constant 0 : i32
    %c0_i32_0 = arith.constant 0 : i32
    %c0_i32_1 = arith.constant 0 : i32
    return %arg0, %c0_i32, %c0_i32_0 : i32, i32, i32
  }
}

</mosaic_0001>

<bundles_post_ra>
// kernel: tpu_custom_call.1
= control target key start
LH: loop header
LB: loop body
LE: loop exit
PB: predicated region body
PF: predicated region fallthrough
CT: control target
= control target key end

     0   :  { %s5524_s0 = inlined_call_operand.hbm [shape: bf16[2,32,128], index: 0, kind: input, shape index: {}]   ;;  %s5525_s1 = inlined_call_operand.hbm [shape: bf16[256,128], index: 1, kind: input, shape index: {}]   ;;  %s5526_s2 = inlined_call_operand.hbm [shape: f32[1,128], index: 2, kind: input, shape index: {}]   ;;  %s5527_s3 = inlined_call_operand.hbm [shape: bf16[256,128], index: 3, kind: input, shape index: {}]   ;;  %s5528_s4 = inlined_call_operand.hbm [shape: f32[1,128], index: 4, kind: input, shape index: {}]   ;;  %s5529_s5 = inlined_call_operand.hbm [shape: bf16[128,128], index: 5, kind: input, shape index: {}]   ;;  %s5530_s6 = inlined_call_operand.hbm [shape: f32[1,128], index: 6, kind: input, shape index: {}]   ;;  %s5531_s7 = inlined_call_operand.hbm [shape: bf16[256,128], index: 7, kind: input, shape index: {}]   ;;  %s5532_s8 = inlined_call_operand.vmem [shape: f32[1,128], index: 8, kind: input, shape index: {}]   ;;  %s5533_s9 = inlined_call_operand.hbm [shape: bf16[256,128], index: 9, kind: input, shape index: {}]   ;;  %s5534_s10 = inlined_call_operand.vmem [shape: f32[1,128], index: 10, kind: input, shape index: {}]   ;;  %s5535_s11 = inlined_call_operand.hbm [shape: bf16[128,128], index: 11, kind: input, shape index: {}]   ;;  %s5536_s12 = inlined_call_operand.vmem [shape: f32[1,128], index: 12, kind: input, shape index: {}]   ;;  %s5537_s13 = inlined_call_operand.hbm [shape: bf16[256,256], index: 13, kind: input, shape index: {}]   ;;  %s5538_s14 = inlined_call_operand.vmem [shape: f32[1,256], index: 14, kind: input, shape index: {}]   ;;  %s5539_s15 = inlined_call_operand.hbm [shape: bf16[512,256], index: 15, kind: input, shape index: {}]   ;;  %s5540_s16 = inlined_call_operand.vmem [shape: f32[1,256], index: 16, kind: input, shape index: {}]   ;;  %s5541_s17 = inlined_call_operand.hbm [shape: bf16[128,256], index: 17, kind: input, shape index: {}]   ;;  %s5542_s18 = inlined_call_operand.vmem [shape: f32[1,256], index: 18, kind: input, shape index: {}]   ;;  %s5543_s19 = inlined_call_operand.hbm [shape: bf16[2,32,256], index: 19, kind: output, shape index: {}]  }
   0x1   :  { %5550 = sst [smem:[#allocation32_spill]] %s5524_s0 }
   0x2   :  { %5551 = sst [smem:[#allocation33_spill]] %s5525_s1 }
   0x3   :  { %5552 = sst [smem:[#allocation34_spill]] %s5526_s2 }
   0x4   :  { %5553 = sst [smem:[#allocation35_spill]] %s5527_s3 }
   0x5   :  { %5554 = sst [smem:[#allocation36_spill]] %s5528_s4 }
   0x6   :  { %5555 = sst [smem:[#allocation37_spill]] %s5529_s5 }
   0x7   :  { %5556 = sst [smem:[#allocation38_spill]] %s5530_s6 }
   0x8   :  { %5557 = sst [smem:[#allocation39_spill]] %s5531_s7 }
   0x9   :  { %5558 = sst [smem:[#allocation40_spill]] %s5533_s9 }
   0xa   :  { %5559 = sst [smem:[#allocation41_spill]] %s5535_s11 }
   0xb   :  { %5560 = sst [smem:[#allocation42_spill]] %s5536_s12 }
   0xc   :  { %5561 = sst [smem:[#allocation43_spill]] %s5537_s13 }
   0xd   :  { %5562 = sst [smem:[#allocation44_spill]] %s5538_s14 }
   0xe   :  { %5563 = sst [smem:[#allocation45_spill]] %s5539_s15 }
   0xf   :  { %5564 = sst [smem:[#allocation46_spill]] %s5540_s16 }
  0x10   :  { %5565 = sst [smem:[#allocation47_spill]] %s5542_s18 }
  0x11   :  { %5566 = sst [smem:[#allocation48_spill]] %s5543_s19 }
  0x12   :  { %24 = vsyncpa [#allocation3], 0 }
  0x13   :  { %26 = vsyncpa [#allocation3 + $0x1], 0 }
  0x14   :  { %27 = vsyncpa [#allocation6], 0 }
  0x15   :  { %28 = vsyncpa [#allocation9], 0 }
  0x16   :  { %29 = vsyncpa [#allocation12], 0 }
  0x17   :  { %30 = vsyncpa [#allocation15], 0 }
  0x18   :  { %31 = vsyncpa [#allocation18], 0 }
  0x19   :  { %32 = vsyncpa [#allocation21], 0 }
  0x1a   :  { %33 = vsyncpa [#allocation4], 0 }
  0x1b   :  { %35 = vsyncpa [#allocation4 + $0x1], 0  ;;  %s5029_s0 = smov 0   ;;  %s5031_s30 = smov 0  }
  0x1c   :  { %s5033_s20 = smov 0   ;;  %s5035_s21 = smov 0  }
  0x1d LB: > { %s5567_s2 = sld [smem:[#allocation33_spill]]  ;;  %s5053_s24 = sadd.s32 4294967295, %s4909_s21   ;;  %s4909_s21 = sphi %s5035_s21, %s5597_s21   ;;  %s4905_s20 = sphi %s5033_s20, %s5596_s20   ;;  %s4901_s30 = sphi %s5031_s30, %s5595_s30   ;;  %s4897_s0 = sphi %s5029_s0, %s5594_s0  }
  0x1e   : > { %p3241_p0 = scmp.ge.s32.totalorder %s4909_s21, 1  ;;  %p62_p1 = scmp.eq.s32.totalorder %s5053_s24, 0 }
  0x1f   : > { %p476_p2 = scmp.lt.s32.totalorder %s4909_s21, 3  ;;  %s4911_s3 = smov [#allocation5]  }
  0x20   : > { %s489_s26 = sshll.u32 %s4911_s3, 4  ;;  %s5569_s29 = sld [smem:[#allocation35_spill]]  ;;  %s490_s26 = int_to_ptr.vmem [resolvable:$true] %s489_s26 }
  0x21   : > { %p5058_p3 = pnand %p3241_p0, %p476_p2  ;;  %s5571_s5 = sld [smem:[#allocation37_spill]] }
  0x22   : > { %s4912_s18 = smov [#allocation8]   ;;  %s5546_s14 = smov 64  }
  0x23   : > { %s487_s23 = sshll.u32 %s5567_s2, 4  ;;  %p4302_p4 = pneg %p5058_p3  ;;  %s488_s23 = int_to_ptr.hbm [resolvable:$true] %s487_s23 }
  0x24   : > { %s515_s16 = sshll.u32 %s4912_s18, 4  ;;  %s5548_s12 = smov 4   ;;  %s516_s16 = int_to_ptr.vmem [resolvable:$true] %s515_s16 }
  0x25   : > { %p5070_p6 = pnand %p4302_p4, %p62_p1  ;;  %s5572_s7 = sld [smem:[#allocation39_spill]] }
  0x26   : > { %s513_s1 = sshll.u32 %s5569_s29, 4  ;;  %s4915_s18 = smov [#allocation11]   ;;  %s514_s1 = int_to_ptr.hbm [resolvable:$true] %s513_s1 }
  0x27   : > { %s539_s3 = sshll.u32 %s5571_s5, 4  ;;  %s541_s29 = sshll.u32 %s4915_s18, 4  ;;  %s540_s3 = int_to_ptr.hbm [resolvable:$true] %s539_s3  ;;  %s542_s29 = int_to_ptr.vmem [resolvable:$true] %s541_s29 }
  0x28   : > { %4305 = dma.hbm_to_vmem [thread:$0]  (!%p5070_p6), %s488_s23, 2048, %s490_s26, [#allocation6], %s5546_s14, %s5546_s14, %s5548_s12  }
  0x29   : > { %4311 = dma.hbm_to_vmem [thread:$0]  (!%p5070_p6), %s514_s1, 2048, %s516_s16, [#allocation9], %s5546_s14, %s5546_s14, %s5548_s12  }
  0x2a   : > { %4317 = dma.hbm_to_vmem [thread:$0]  (!%p5070_p6), %s540_s3, 1024, %s542_s29, [#allocation12], %s5546_s14, %s5546_s14, %s5548_s12  }
  0x2b   : > { %s565_s28 = sshll.u32 %s5572_s7, 4  ;;  %s4916_s23 = smov [#allocation14]   ;;  %s566_s28 = int_to_ptr.hbm [resolvable:$true] %s565_s28 }
  0x2c   : > { %s567_s26 = sshll.u32 %s4916_s23, 4  ;;  %s5573_s11 = sld [smem:[#allocation41_spill]]  ;;  %s568_s26 = int_to_ptr.vmem [resolvable:$true] %s567_s26 }
  0x2d   : > { %4323 = dma.hbm_to_vmem [thread:$0]  (!%p5070_p6), %s566_s28, 2048, %s568_s26, [#allocation15], %s5546_s14, %s5546_s14, %s5548_s12  }
  0x2e   : > { %s4917_s1 = smov [#allocation17]   ;;  %s5574_s15 = sld [smem:[#allocation45_spill]] }
  0x2f   : > { %s601_s27 = sshll.u32 %s4917_s1, 4  ;;  %s4918_s5 = smov [#allocation20]   ;;  %s602_s27 = int_to_ptr.vmem [resolvable:$true] %s601_s27 }
  0x30   : > { %s635_s29 = sshll.u32 %s4918_s5, 4  ;;  %s5575_s7 = sld [smem:[#allocation34_spill]]  ;;  %s636_s29 = int_to_ptr.vmem [resolvable:$true] %s635_s29 }
  0x31   : > { %s4919_s26 = smov 128   ;;  %s4920_s1 = smov 8  }
  0x32   : > { %s599_s16 = sshll.u32 %s5573_s11, 4  ;;  %s5576_s4 = sld [smem:[#allocation36_spill]]  ;;  %s600_s16 = int_to_ptr.hbm [resolvable:$true] %s599_s16 }
  0x33   : > { %4329 = dma.hbm_to_vmem [thread:$0]  (!%p5070_p6), %s600_s16, 1024, %s602_s27, [#allocation18], %s5546_s14, %s5546_s14, %s5548_s12  }
  0x34   : > { %s633_s3 = sshll.u32 %s5574_s15, 4  ;;  %s4921_s27 = smov [#allocation7]   ;;  %s634_s3 = int_to_ptr.hbm [resolvable:$true] %s633_s3 }
  0x35   : > { %4335 = dma.hbm_to_vmem [thread:$0]  (!%p5070_p6), %s634_s3, 8192, %s636_s29, [#allocation21], %s4919_s26, %s4919_s26, %s4920_s1  }
  0x36   : > { %s502_s28 = sshll.u32 %s5575_s7, 4  ;;  %s504_s5 = sshll.u32 %s4921_s27, 4  ;;  %s503_s28 = int_to_ptr.hbm [resolvable:$true] %s502_s28  ;;  %s505_s5 = int_to_ptr.vmem [resolvable:$true] %s504_s5 }
  0x37   : > { %4308 = dma.hbm_to_vmem [thread:$0]  (!%p5070_p6), %s503_s28, 16, %s505_s5, [#allocation6]  }
  0x38   : > { %s528_s16 = sshll.u32 %s5576_s4, 4  ;;  %s4922_s7 = smov [#allocation10]   ;;  %s529_s16 = int_to_ptr.hbm [resolvable:$true] %s528_s16 }
  0x39   : > { %s530_s23 = sshll.u32 %s4922_s7, 4  ;;  %s5577_s6 = sld [smem:[#allocation38_spill]]  ;;  %s531_s23 = int_to_ptr.vmem [resolvable:$true] %s530_s23 }
  0x3a   : > { %4314 = dma.hbm_to_vmem [thread:$0]  (!%p5070_p6), %s529_s16, 16, %s531_s23, [#allocation9]  }
  0x3b   : > { %s5578_s9 = sld [smem:[#allocation40_spill]]  ;;  %s4923_s18 = smov [#allocation13]  }
  0x3c   : > { %s556_s27 = sshll.u32 %s4923_s18, 4  ;;  %s4924_s28 = smov [#allocation16]   ;;  %s557_s27 = int_to_ptr.vmem [resolvable:$true] %s556_s27 }
  0x3d   : > { %s584_s14 = sshll.u32 %s4924_s28, 4  ;;  %s5579_s13 = sld [smem:[#allocation43_spill]]  ;;  %s585_s14 = int_to_ptr.vmem [resolvable:$true] %s584_s14 }
  0x3e   : > { %s5580_s23 = smov 4   ;;  %s5581_s2 = smov 64  }
  0x3f   : > { %s554_s12 = sshll.u32 %s5577_s6, 4  ;;  %s650_s29 = sshll.u32 %s5541_s17, 4  ;;  %s555_s12 = int_to_ptr.hbm [resolvable:$true] %s554_s12  ;;  %s651_s29 = int_to_ptr.hbm [resolvable:$true] %s650_s29 }
  0x40   : > { %4320 = dma.hbm_to_vmem [thread:$0]  (!%p5070_p6), %s555_s12, 16, %s557_s27, [#allocation12]  }
  0x41   : > { %s582_s19 = sshll.u32 %s5578_s9, 4  ;;  %s4925_s18 = smov [#allocation19]   ;;  %s583_s19 = int_to_ptr.hbm [resolvable:$true] %s582_s19 }
  0x42   : > { %4326 = dma.hbm_to_vmem [thread:$0]  (!%p5070_p6), %s583_s19, 2048, %s585_s14, [#allocation15], %s5581_s2, %s5581_s2, %s5580_s23  }
  0x43   : > { %s616_s16 = sshll.u32 %s5579_s13, 4  ;;  %s618_s27 = sshll.u32 %s4925_s18, 4  ;;  %s617_s16 = int_to_ptr.hbm [resolvable:$true] %s616_s16  ;;  %s619_s27 = int_to_ptr.vmem [resolvable:$true] %s618_s27 }
  0x44   : > { %4332 = dma.hbm_to_vmem [thread:$0]  (!%p5070_p6), %s617_s16, 4096, %s619_s27, [#allocation18], %s4919_s26, %s4919_s26, %s4920_s1  }
  0x45   : > { %s4926_s19 = smov [#allocation22]   ;;  %s3240_s14 = sadd.s32 4294967294, %s4909_s21  }
  0x46   : > { %s652_s28 = sshll.u32 %s4926_s19, 4  ;;  %s5157_s5 = sadd.s32 1, %s4909_s21   ;;  %s653_s28 = int_to_ptr.vmem [resolvable:$true] %s652_s28 }
  0x47   : > { %4338 = dma.hbm_to_vmem [thread:$0]  (!%p5070_p6), %s651_s29, 2048, %s653_s28, [#allocation21], %s4919_s26, %s4919_s26, %s4920_s1  }
  0x48   : > { %s45_s7 = ssub.s32 %s4909_s21, %s5157_s5  ;;  %s48_s3 = sadd.s32 1, %s4905_s20 }
  0x49   : > { %p46_p7 = scmp.eq.s32.totalorder %s45_s7, 0  ;;  %p55_p8 = scmp.ne.s32.totalorder %s4905_s20, %s4901_s30 }
  0x4a   : > { %p56_p9 = scmp.eq.s32.totalorder %s4909_s21, 0  ;;  %p61_p10 = scmp.ne.s32.totalorder %s4901_s30, %s4897_s0 }
  0x4b   : > { %s5168_s16 = scalar_select %p46_p7, %s4905_s20, %s48_s3  }
  0x4c   : > { %p5170_p11 = por %p56_p9, %p55_p8  ;;  %p5176_p12 = por %p62_p1, %p61_p10 }
  0x4d   : > { %p463_p13 = scmp.eq.s32.totalorder %s5053_s24, 1  ;;  %p469_p0 = scmp.eq.s32.totalorder %s3240_s14, 1 }
  0x4e   : > { %p4359_p2 = scmp.lt.s32.totalorder %s4909_s21, 2  ;;  %s669_s1 = sand.u32 1, %s4905_s20  }
  0x4f   : > { %p5183_p4 = por %p463_p13, %p55_p8  ;;  %p5187_p6 = por %p469_p0, %p61_p10 }
  0x50   : > { %s3255_s18 = sshll.u32 %s669_s1, 4  ;;  %s4054_s27 = sshll.u32 %s4909_s21, 4 }
  0x51   : > { %s5586_s7 = sld [smem:[#allocation32_spill]]  ;;  %s673_s4 = scalar_lea.vmem [#allocation2], %s3255_s18 }
  0x52   : > { %s681_s6 = sshll.u32 %s673_s4, 4  ;;  %p5197_p7 = pnand %p4359_p2, %p5170_p11  ;;  %s682_s6 = int_to_ptr.vmem [resolvable:$true] %s681_s6 }
  0x53   : > { %s670_s11 = scalar_lea.sflag [#allocation3], %s669_s1 }
  0x54   : > { %p4793_p9 = pneg %p5197_p7 }
  0x57   : > { %s678_s3 = scalar_lea.hbm %s5586_s7, %s4054_s27  ;;  %s4796_s27 = scalar_lea.hbm %s5586_s7, 32 }
  0x58   : > { %s679_s9 = sshll.u32 %s678_s3, 4  ;;  %s680_s9 = int_to_ptr.hbm [resolvable:$true] %s679_s9 }
  0x59   : > { %s4789_s13 = sshra.s32 %s680_s9, 4  ;;  %s4790_s13 = int_to_ptr.hbm [resolvable:$true] %s4789_s13 }
  0x5a   : > { %s4791_s15 = scalar_lea.hbm %s4790_s13, 16  ;;  %p4797_p11 = scmp.lt.s32.totalorder %s4790_s13, %s5586_s7 }
  0x5b   : > { %p4792_p8 = scmp.ne.s32.totalorder %s4790_s13, %s4791_s15  ;;  %p4798_p0 = scmp.lt.s32.totalorder %s4796_s27, %s4791_s15 }
  0x5d   : > { %p4794_p10 = pnand %p4793_p9, %p4792_p8  ;;  %p4799_p2 = por %p4798_p0, %p4797_p11 }
  0x5f   : > { %p4795_p13 = pneg %p4794_p10 }
  0x61   : > { %p4800_p5 = pnand %p4799_p2, %p4795_p13 }
  0x63   : > { %4803 = shalt.err (!%p4800_p5)
}
  0x64   : > { %4342 = dma.hbm_to_vmem [thread:$0]  (!%p5197_p7), %s680_s9, 256, %s682_s6, %s670_s11, %s5581_s2, %s5581_s2, %s5580_s23  }
  0x65   : > { %693 = sbr.rel (%p5058_p3) target bundleno = 1239 (0x4d7), region = 96  ;;  %s5217_s1 = sand.u32 (!%p5058_p3), 1, %s4901_s30  }
  0x66   : > { %s3259_s13 = sshll.u32 (!%p5058_p3), %s5217_s1, 4  ;;  %s696_s15 = scalar_lea.sflag (!%p5058_p3), [#allocation3], %s5217_s1 }
  0x67   : > { %s5221_s28 = scalar_lea.vmem (!%p5058_p3), [#allocation2], %s3259_s13 }
  0x6a   : > { %4864 = dma.done.wait (%p5176_p12), %s696_s15, 256  }
  0x6b   : > { %4866 = vsyncadd (%p5176_p12), %s696_s15, 4294967040 }
  0x6c   : > { %4868 = dma.done.wait (%p62_p1), [#allocation6], 2064  }
  0x6d   : > { %4870 = vsyncadd (%p62_p1), [#allocation6], 4294965232 }
  0x6e   : > { %4872 = dma.done.wait (%p62_p1), [#allocation9], 2064  }
  0x6f   : > { %4874 = vsyncadd (%p62_p1), [#allocation9], 4294965232 }
  0x70   : > { %4876 = dma.done.wait (%p62_p1), [#allocation12], 1040  }
  0x71   : > { %4878 = vsyncadd (%p62_p1), [#allocation12], 4294966256 }
  0x72   : > { %4880 = dma.done.wait (%p62_p1), [#allocation15], 4096  }
  0x73   : > { %4882 = vsyncadd (%p62_p1), [#allocation15], 4294963200 }
  0x74   : > { %4884 = dma.done.wait (%p62_p1), [#allocation18], 5120  }
  0x75   : > { %4886 = vsyncadd (%p62_p1), [#allocation18], 4294962176 }
  0x76   : > { %4888 = dma.done.wait (%p62_p1), [#allocation21], 10240  }
  0x77   : > { %4890 = vsyncadd (%p62_p1), [#allocation21], 4294957056  ;;  %v4064_v0 = vld [vmem:[#allocation5 + $0x38] sm:$0xff]  ;;  %v4063_v2 = vld [vmem:[#allocation5 + $0x30] sm:$0xff]  ;;  %v823_v4 = vlaneseq  ;;  %s5588_s26 = sld [smem:[#allocation42_spill]]  ;;  %s4249_s9 = sshll.u32 %s5053_s24, 5 }
  0x78   : > { %v4072_v1 = vld [vmem:[#allocation5 + $0x78] sm:$0xff]  ;;  %1063 = vmatpush.bf16.msra.mxu0 %v4064_v0  ;;  %v4071_v3 = vld [vmem:[#allocation5 + $0x70] sm:$0xff]  ;;  %v4062_v5 = vld [vmem:[#allocation5 + $0x28] sm:$0xff]  ;;  %s5589_s18 = sld [smem:[#allocation44_spill]]  ;;  %s3038_s3 = scalar_lea.sflag [#allocation4], %s5217_s1 }
  0x79   : > { %1082 = vmatpush.bf16.msra.mxu1 %v4072_v1  ;;  %v815_v6 = vld [vmem:[%s5221_s28] sm:$0xff]   ;;  %v818_v7 = vld [vmem:[%s5221_s28 + $0x8] sm:$0xff]   ;;  %v5253_v11 = vshrl.u32 %v823_v4, 7  ;;  %s5590_s19 = sld [smem:[#allocation46_spill]] }
  0x7a   : > { %v4070_v8 = vld [vmem:[#allocation5 + $0x68] sm:$0xff]  ;;  %v819_v9 = vunpack.c.l.bf16 %v815_v6  ;;  %v822_v10 = vunpack.c.h.bf16 %v818_v7  ;;  %v4061_v12 = vld [vmem:[#allocation5 + $0x20] sm:$0xff]  ;;  %v820_v14 = vunpack.c.h.bf16 %v815_v6  ;;  %v4060_v17 = vld [vmem:[#allocation5 + $0x18] sm:$0xff]  ;;  %v821_v36 = vunpack.c.l.bf16 %v818_v7  ;;  %s5591_s15 = sld [smem:[#allocation47_spill]] }
  0x7b   : > { %v4069_v13 = vld [vmem:[#allocation5 + $0x60] sm:$0xff]  ;;  %vm919_vm0 = vcmp.lt.s32.totalorder %v5253_v11, 1  ;;  %v4068_v18 = vld [vmem:[#allocation5 + $0x58] sm:$0xff]  ;;  %vm911_vm1 = vcmp.ge.s32.totalorder %v5253_v11, 1  ;;  %v4059_v22 = vld [vmem:[#allocation5 + $0x10] sm:$0xff]  ;;  %vm1459_vm2 = vcmp.lt.s32.totalorder %v5253_v11, 2 }
  0x7c   : > { %1064 = vmatpush.bf16.msra.mxu0 %v4063_v2  ;;  %v915_v15 = vrot.slane %v819_v9, 7  ;;  %v918_v16 = vrot.slane %v822_v10, 7  ;;  %v916_v19 = vrot.slane %v820_v14, 7  ;;  %v4088_v21 = vld [vmem:[#allocation8 + $0x78] sm:$0xff]  ;;  %v4067_v23 = vld [vmem:[#allocation5 + $0x50] sm:$0xff]  ;;  %v4058_v29 = vld [vmem:[#allocation5 + $0x8] sm:$0xff] }
  0x7d   : > { %1083 = vmatpush.bf16.msra.mxu1 %v4071_v3  ;;  %1267 = vmatpush.bf16.msra.mxu3 %v4088_v21  ;;  %v4087_v26 = vld [vmem:[#allocation8 + $0x70] sm:$0xff]  ;;  %v4066_v30 = vld [vmem:[#allocation5 + $0x48] sm:$0xff]  ;;  %v4057_v34 = vld [vmem:[#allocation5] sm:$0xff]  ;;  %v917_v39 = vrot.slane %v821_v36, 7  ;;  %vm1451_vm3 = vcmp.ge.s32.totalorder %v5253_v11, 2  ;;  %vm2035_vm4 = vcmp.lt.s32.totalorder %v5253_v11, 4 }
  0x7e   : > { %v923_v20 = vsel %vm919_vm0, %v918_v16, %v915_v15  ;;  %v922_v24 = vsel %vm919_vm0, %v915_v15, %v916_v19  ;;  %v4086_v31 = vld [vmem:[#allocation8 + $0x68] sm:$0xff]  ;;  %v4065_v35 = vld [vmem:[#allocation5 + $0x40] sm:$0xff]  ;;  %v4083_v51 = vld [vmem:[#allocation8 + $0x50] sm:$0xff]  ;;  %vm2027_vm5 = vcmp.ge.s32.totalorder %v5253_v11, 4  ;;  %s5592_s23 = sld [smem:[#allocation48_spill]] }
  0x7f   : > { %v932_v25 = vsel %vm911_vm1, %v923_v20, 0.0  ;;  %v937_v28 = vpack.c.bf16 %v922_v24, %v922_v24  ;;  %v5264_v38 = vld [vmem:[%s5221_s28] sm:$0xff]  ;;  %v920_v40 = vsel %vm919_vm0, %v917_v39, %v918_v16  ;;  %v921_v41 = vsel %vm919_vm0, %v916_v19, %v917_v39  ;;  %v5272_v47 = vld [vmem:[%s5221_s28 + $0x8] sm:$0xff]  ;;  %s3272_s28 = sshll.u32 %s5217_s1, 5 }
  0x80   : > { %1065 = vmatpush.bf16.msra.mxu0 %v4062_v5  ;;  %v936_v27 = vpack.c.bf16 %v932_v25, %v932_v25  ;;  %v938_v42 = vpack.c.bf16 %v921_v41, %v921_v41  ;;  %v939_v43 = vpack.c.bf16 %v920_v40, %v920_v40  ;;  %v4085_v48 = vld [vmem:[#allocation8 + $0x60] sm:$0xff]  ;;  %v4084_v49 = vld [vmem:[#allocation8 + $0x58] sm:$0xff]  ;;  %v4079_v53 = vld [vmem:[#allocation8 + $0x30] sm:$0xff]  ;;  %s5474_s6 = scalar_lea.vmem [#allocation23], %s3272_s28 }
  0x81   : > { %1084 = vmatpush.bf16.msra.mxu1 %v4070_v8  ;;  %1268 = vmatpush.bf16.msra.mxu3 %v4087_v26  ;;  %v945_v33 = vunpack.c.l.b16 %v937_v28  ;;  %v4080_v50 = vld [vmem:[#allocation8 + $0x38] sm:$0xff]  ;;  %v4082_v54 = vld [vmem:[#allocation8 + $0x48] sm:$0xff]  ;;  %v4081_v57 = vld [vmem:[#allocation8 + $0x40] sm:$0xff] }
  0x82   : > { %v944_v32 = vunpack.c.l.b16 %v936_v27  ;;  %v946_v44 = vunpack.c.l.b16 %v938_v42  ;;  %v947_v45 = vunpack.c.l.b16 %v939_v43  ;;  %1248 = vmatpush.bf16.msra.mxu2 %v4080_v50  ;;  %v4096_v52 = vld [vmem:[#allocation11 + $0x38] sm:$0xff]  ;;  %v4095_v55 = vld [vmem:[#allocation11 + $0x30] sm:$0xff]  ;;  %v4078_v56 = vld [vmem:[#allocation8 + $0x28] sm:$0xff] }
  0x83   : > { %v4094_v58 = vld [vmem:[#allocation11 + $0x28] sm:$0xff]  ;;  %v4077_v59 = vld [vmem:[#allocation8 + $0x20] sm:$0xff]  ;;  %v4076_v61 = vld [vmem:[#allocation8 + $0x18] sm:$0xff] }
  0x84   : > { %1066 = vmatpush.bf16.msra.mxu0 %v4061_v12  ;;  %v948_v37 = vpack.c.b16 %v945_v33, %v944_v32  ;;  %v949_v46 = vpack.c.b16 %v947_v45, %v946_v44  ;;  %v4093_v60 = vld [vmem:[#allocation11 + $0x20] sm:$0xff]  ;;  %v4092_v62 = vld [vmem:[#allocation11 + $0x18] sm:$0xff]  ;;  %v4075_v63 = vld [vmem:[#allocation8 + $0x10] sm:$0xff]  ;;  %s3049_s2 = scalar_lea.hbm %s5592_s23, %s4249_s9 }
  0x85   : > { %1085 = vmatpush.bf16.msra.mxu1 %v4069_v13  ;;  %1269 = vmatpush.bf16.msra.mxu3 %v4086_v31  ;;  %v4423_v0 = vld [vmem:[#allocation7] ss:$0 sm:$0xff]  ;;  %v4091_v1 = vld [vmem:[#allocation11 + $0x10] sm:$0xff]  ;;  %v4074_v2 = vld [vmem:[#allocation8 + $0x8] sm:$0xff]  ;;  %s3052_s24 = sshll.u32 %s3049_s2, 4  ;;  %s3053_s24 = int_to_ptr.hbm [resolvable:$true] %s3052_s24 }
  0x86   : > { %1249 = vmatpush.bf16.msra.mxu2 %v4079_v53  ;;  %v4090_v5 = vld [vmem:[#allocation11 + $0x8] sm:$0xff]  ;;  %v4073_v7 = vld [vmem:[#allocation8] sm:$0xff]  ;;  %s4833_s14 = sshra.s32 %s3053_s24, 4  ;;  %s4834_s14 = int_to_ptr.hbm [resolvable:$true] %s4833_s14 }
  0x87   : > { %v4089_v9 = vld [vmem:[#allocation11] sm:$0xff]  ;;  %p4840_p12 = scmp.lt.s32.totalorder %s4834_s14, %s5592_s23 }
  0x88   : > { %1067 = vmatpush.bf16.msra.mxu0 %v4060_v17 }
  0x89   : > { %1086 = vmatpush.bf16.msra.mxu1 %v4068_v18  ;;  %1270 = vmatpush.bf16.msra.mxu3 %v4085_v48 }
  0x8a   : > { %1250 = vmatpush.bf16.msra.mxu2 %v4078_v56  ;;  %v4112_v56 = vld [vmem:[#allocation14 + $0x78] sm:$0xff] }
  0x8c   : > { %1068 = vmatpush.bf16.msra.mxu0 %v4059_v22 }
  0x8d   : > { %1087 = vmatpush.bf16.msra.mxu1 %v4067_v23  ;;  %1271 = vmatpush.bf16.msra.mxu3 %v4084_v49 }
  0x8e   : > { %1251 = vmatpush.bf16.msra.mxu2 %v4077_v59  ;;  %v4109_v59 = vld [vmem:[#allocation14 + $0x60] sm:$0xff] }
  0x90   : > { %1069 = vmatpush.bf16.msra.mxu0 %v4058_v29 }
  0x91   : > { %1088 = vmatpush.bf16.msra.mxu1 %v4066_v30  ;;  %1272 = vmatpush.bf16.msra.mxu3 %v4083_v51 }
  0x92   : > { %1252 = vmatpush.bf16.msra.mxu2 %v4076_v61  ;;  %v4104_v61 = vld [vmem:[#allocation14 + $0x38] sm:$0xff] }
  0x94   : > { %1070 = vmatpush.bf16.msra.mxu0 %v4057_v34 }
  0x95   : > { %1089 = vmatpush.bf16.msra.mxu1 %v4065_v35  ;;  %1273 = vmatpush.bf16.msra.mxu3 %v4082_v54 }
  0x96   : > { %1253 = vmatpush.bf16.msra.mxu2 %v4075_v63  ;;  %v4103_v63 = vld [vmem:[#allocation14 + $0x30] sm:$0xff] }
  0x97   : > { %1071 = vmatmul.bf16.vlgmr.msra.gmra.mxu0 %v948_v37 }
  0x98   : > { %1090 = vmatmul.bf16.vlgmr.msra.gmra.mxu1 %v5264_v38  ;;  %1341 = vmatpush.bf16.msrb.mxu0 %v4096_v52 }
  0x99   : > { %1274 = vmatpush.bf16.msra.mxu3 %v4081_v57  ;;  %v4111_v57 = vld [vmem:[#allocation14 + $0x70] sm:$0xff]  ;;  %1607 = vmatpush.bf16.msrb.mxu1 %v4104_v61 }
  0x9a   : > { %1254 = vmatpush.bf16.msra.mxu2 %v4074_v2  ;;  %v4105_v2 = vld [vmem:[#allocation14 + $0x40] sm:$0xff] }
  0x9c   : > { %1342 = vmatpush.bf16.msrb.mxu0 %v4095_v55 }
  0x9d   : > { %1608 = vmatpush.bf16.msrb.mxu1 %v4103_v63 }
  0x9e   : > { %1255 = vmatpush.bf16.msra.mxu2 %v4073_v7  ;;  %v4425_v7 = vld [vmem:[#allocation10] ss:$0 sm:$0xff] }
  0xa0   : > { %1343 = vmatpush.bf16.msrb.mxu0 %v4094_v58  ;;  %v4110_v58 = vld [vmem:[#allocation14 + $0x68] sm:$0xff] }
  0xa2   : > { %1626 = vmatpush.bf16.msrb.mxu2 %v4112_v56  ;;  %v4131_v56 = vld [vmem:[#allocation17 + $0x10] sm:$0xff] }
  0xa4   : > { %1344 = vmatpush.bf16.msrb.mxu0 %v4093_v60  ;;  %v4108_v60 = vld [vmem:[#allocation14 + $0x58] sm:$0xff] }
  0xa6   : > { %1627 = vmatpush.bf16.msrb.mxu2 %v4111_v57 }
  0xa7   : > { %1076 = vmatmul.bf16.gmra.mxu0 %v949_v46 }
  0xa8   : > { %1095 = vmatmul.bf16.gmra.mxu1 %v5272_v47  ;;  %1345 = vmatpush.bf16.msrb.mxu0 %v4092_v62  ;;  %v4107_v62 = vld [vmem:[#allocation14 + $0x50] sm:$0xff] }
  0xaa   : > { %1628 = vmatpush.bf16.msrb.mxu2 %v4110_v58 }
  0xac   : > { %1346 = vmatpush.bf16.msrb.mxu0 %v4091_v1  ;;  %v4102_v1 = vld [vmem:[#allocation14 + $0x28] sm:$0xff] }
  0xad   : > { %1609 = vmatpush.bf16.msrb.mxu1 %v4102_v1 }
  0xae   : > { %1629 = vmatpush.bf16.msrb.mxu2 %v4109_v59 }
  0xb0   : > { %1347 = vmatpush.bf16.msrb.mxu0 %v4090_v5 }
  0xb2   : > { %1630 = vmatpush.bf16.msrb.mxu2 %v4108_v60 }
  0xb4   : > { %1348 = vmatpush.bf16.msrb.mxu0 %v4089_v9  ;;  %v4099_v9 = vld [vmem:[#allocation14 + $0x10] sm:$0xff] }
  0xb6   : > { %1631 = vmatpush.bf16.msrb.mxu2 %v4107_v62  ;;  %v4130_v62 = vld [vmem:[#allocation17 + $0x8] sm:$0xff] }
  0xb7   : > { %1349 = vmatmul.bf16.vlgmr.msrb.gmra.mxu0 %v5264_v38 }
  0xc7   : > { %1354 = vmatmul.bf16.gmra.mxu0 %v5272_v47 }
 0x114   : > { %v1072_v3 = vpop.f32.mrf.mxu0 }
 0x115   : > { %v1091_v4 = vpop.f32.mrf.mxu1  ;;  %v1073_v6 = vadd.f32 %v4423_v0, %v1072_v3  ;;  %v4101_v3 = vld [vmem:[#allocation14 + $0x20] sm:$0xff] }
 0x116   : > { %1610 = vmatpush.bf16.msrb.mxu1 %v4101_v3 }
 0x117   : > { %v1092_v8 = vadd.f32 %v1091_v4, %v1073_v6  ;;  %v4100_v6 = vld [vmem:[#allocation14 + $0x18] sm:$0xff] }
 0x119   : > { %v1101_v13 = vmax.f32 %v1092_v8, 0.0 }
 0x11a   : > { %1611 = vmatpush.bf16.msrb.mxu1 %v4100_v6  ;;  %v4129_v6 = vld [vmem:[#allocation17] sm:$0xff] }
 0x11b   : > { %v1121_v16 = vpack.c.bf16 %v1101_v13, %v1101_v13  ;;  %v1105_v32 = vrot.slane %v1101_v13, 7 }
 0x11c   : > { %v1074_v10 = vpop.f32.mrf.mxu0 }
 0x11d   : > { %v1093_v12 = vpop.f32.mrf.mxu1  ;;  %v1075_v14 = vadd.f32 %v4423_v0, %v1074_v10  ;;  %v1141_v22 = vunpack.c.l.b16 %v1121_v16  ;;  %v4424_v10 = vld [vmem:[#allocation13] ss:$0 sm:$0xff] }
 0x11e   : > { %1612 = vmatpush.bf16.msrb.mxu1 %v4099_v9 }
 0x11f   : > { %v1094_v15 = vadd.f32 %v1093_v12, %v1075_v14  ;;  %v4098_v14 = vld [vmem:[#allocation14 + $0x8] sm:$0xff] }
 0x121   : > { %v1102_v17 = vmax.f32 %v1094_v15, 0.0 }
 0x122   : > { %1613 = vmatpush.bf16.msrb.mxu1 %v4098_v14 }
 0x123   : > { %v1122_v18 = vpack.c.bf16 %v1102_v17, %v1102_v17  ;;  %v1106_v29 = vrot.slane %v1102_v17, 7 }
 0x124   : > { %v1077_v19 = vpop.f32.mrf.mxu0 }
 0x125   : > { %v1096_v20 = vpop.f32.mrf.mxu1  ;;  %v1078_v21 = vadd.f32 %v4423_v0, %v1077_v19  ;;  %v1142_v23 = vunpack.c.l.b16 %v1122_v18  ;;  %v1111_v35 = vsel %vm919_vm0, %v1105_v32, %v1106_v29  ;;  %v4097_v19 = vld [vmem:[#allocation14] sm:$0xff] }
 0x126   : > { %v1118_v41 = vpack.c.bf16 %v1111_v35, %v1111_v35  ;;  %1614 = vmatpush.bf16.msrb.mxu1 %v4097_v19 }
 0x127   : > { %v1145_v24 = vpack.c.b16 %v1142_v23, %v1141_v22  ;;  %v1097_v25 = vadd.f32 %v1096_v20, %v1078_v21 }
 0x128   : > { %v1130_v46 = vunpack.c.l.b16 %v1118_v41 }
 0x129   : > { %1275 = vmatmul.bf16.vlgmr.msra.gmra.mxu3 %v1145_v24  ;;  %v1103_v27 = vmax.f32 %v1097_v25, 0.0  ;;  %v4136_v24 = vld [vmem:[#allocation17 + $0x38] sm:$0xff] }
 0x12a   : > { %1885 = vmatpush.bf16.msra.mxu1 %v4136_v24  ;;  %v4125_v24 = vld [vmem:[#allocation16 + $0x60] sm:$0xff] }
 0x12b   : > { %v1123_v33 = vpack.c.bf16 %v1103_v27, %v1103_v27  ;;  %v1107_v48 = vrot.slane %v1103_v27, 7 }
 0x12c   : > { %v1079_v26 = vpop.f32.mrf.mxu0 }
 0x12d   : > { %v1080_v28 = vadd.f32 %v4423_v0, %v1079_v26  ;;  %v1098_v30 = vpop.f32.mrf.mxu1  ;;  %v1143_v38 = vunpack.c.l.b16 %v1123_v33  ;;  %v1110_v50 = vsel %vm919_vm0, %v1106_v29, %v1107_v48  ;;  %v4106_v0 = vld [vmem:[#allocation14 + $0x48] sm:$0xff] }
 0x12e   : > { %v1119_v52 = vpack.c.bf16 %v1110_v50, %v1110_v50  ;;  %1632 = vmatpush.bf16.msrb.mxu2 %v4106_v0 }
 0x12f   : > { %v1099_v31 = vadd.f32 %v1098_v30, %v1080_v28  ;;  %v4135_v28 = vld [vmem:[#allocation17 + $0x30] sm:$0xff] }
 0x130   : > { %v1131_v54 = vunpack.c.l.b16 %v1119_v52  ;;  %1886 = vmatpush.bf16.msra.mxu1 %v4135_v28  ;;  %v4119_v28 = vld [vmem:[#allocation16 + $0x30] sm:$0xff] }
 0x131   : > { %v1104_v34 = vmax.f32 %v1099_v31, 0.0 }
 0x132   : > { %1633 = vmatpush.bf16.msrb.mxu2 %v4105_v2 }
 0x133   : > { %v1108_v36 = vrot.slane %v1104_v34, 7  ;;  %v1124_v37 = vpack.c.bf16 %v1104_v34, %v1104_v34 }
 0x134   : > { %v1350_v4 = vpop.f32.mrf.mxu0 }
 0x135   : > { %v1144_v39 = vunpack.c.l.b16 %v1124_v37  ;;  %v1112_v40 = vsel %vm919_vm0, %v1108_v36, %v1105_v32  ;;  %v1109_v49 = vsel %vm919_vm0, %v1107_v48, %v1108_v36  ;;  %v1351_v15 = vadd.f32 %v4424_v10, %v1350_v4  ;;  %v4134_v36 = vld [vmem:[#allocation17 + $0x28] sm:$0xff] }
 0x136   : > { %v1113_v42 = vsel %vm911_vm1, %v1112_v40, 0.0  ;;  %v1120_v51 = vpack.c.bf16 %v1109_v49, %v1109_v49  ;;  %1887 = vmatpush.bf16.msra.mxu1 %v4134_v36  ;;  %v4426_v36 = vld [vmem:[%s5532_s8] ss:$0 sm:$0xff] }
 0x137   : > { %v1146_v43 = vpack.c.b16 %v1144_v39, %v1143_v38  ;;  %v1117_v44 = vpack.c.bf16 %v1113_v42, %v1113_v42 }
 0x138   : > { %v1132_v53 = vunpack.c.l.b16 %v1120_v51  ;;  %v4132_v51 = vld [vmem:[#allocation17 + $0x18] sm:$0xff] }
 0x139   : > { %1280 = vmatmul.bf16.gmra.mxu3 %v1146_v43  ;;  %v1129_v45 = vunpack.c.l.b16 %v1117_v44  ;;  %v4133_v43 = vld [vmem:[#allocation17 + $0x20] sm:$0xff] }
 0x13a   : > { %v1134_v55 = vpack.c.b16 %v1132_v53, %v1131_v54  ;;  %1888 = vmatpush.bf16.msra.mxu1 %v4133_v43 }
 0x13b   : > { %v1133_v47 = vpack.c.b16 %v1130_v46, %v1129_v45 }
 0x13c   : > { %v1352_v17 = vpop.f32.mrf.mxu0 }
 0x13d   : > { %1256 = vmatmul.bf16.vlgmr.msra.gmra.mxu2 %v1133_v47  ;;  %v1353_v26 = vadd.f32 %v4424_v10, %v1352_v17 }
 0x13e   : > { %1889 = vmatpush.bf16.msra.mxu1 %v4132_v51 }
 0x142   : > { %1890 = vmatpush.bf16.msra.mxu1 %v4131_v56 }
 0x144   : > { %v1355_v30 = vpop.f32.mrf.mxu0 }
 0x145   : > { %v1356_v39 = vadd.f32 %v4424_v10, %v1355_v30  ;;  %v4118_v30 = vld [vmem:[#allocation16 + $0x28] sm:$0xff] }
 0x146   : > { %1891 = vmatpush.bf16.msra.mxu1 %v4130_v62 }
 0x14a   : > { %1892 = vmatpush.bf16.msra.mxu1 %v4129_v6 }
 0x14c   : > { %v1357_v49 = vpop.f32.mrf.mxu0 }
 0x14d   : > { %1261 = vmatmul.bf16.gmra.mxu2 %v1134_v55  ;;  %v1358_v53 = vadd.f32 %v4424_v10, %v1357_v49 }
 0x1ac   : > { %v1276_v5 = vpop.f32.mrf.mxu3 }
 0x1b4   : > { %v1278_v18 = vpop.f32.mrf.mxu3 }
 0x1bc   : > { %v1281_v31 = vpop.f32.mrf.mxu3 }
 0x1c0   : > { %v1257_v8 = vpop.f32.mrf.mxu2 }
 0x1c1   : > { %v1258_v12 = vadd.f32 %v4425_v7, %v1257_v8 }
 0x1c3   : > { %v1277_v13 = vadd.f32 %v1276_v5, %v1258_v12 }
 0x1c4   : > { %v1283_v48 = vpop.f32.mrf.mxu3 }
 0x1c5   : > { %v1286_v16 = vmax.f32 %v1277_v13, 0.0 }
 0x1c7   : > { %v1360_v21 = vadd.f32 %v1351_v15, %v1286_v16 }
 0x1c8   : > { %v1259_v20 = vpop.f32.mrf.mxu2 }
 0x1c9   : > { %v1260_v22 = vadd.f32 %v4425_v7, %v1259_v20  ;;  %v1364_v25 = vmax.f32 %v1360_v21, 0.0  ;;  %v4128_v21 = vld [vmem:[#allocation16 + $0x78] sm:$0xff] }
 0x1ca   : > { %1811 = vmatpush.bf16.msra.mxu0 %v4128_v21 }
 0x1cb   : > { %v1279_v23 = vadd.f32 %v1278_v18, %v1260_v22  ;;  %v1480_v35 = vpack.c.bf16 %v1364_v25, %v1364_v25  ;;  %v1455_v58 = vrot.slane %v1364_v25, 6  ;;  %v4127_v22 = vld [vmem:[#allocation16 + $0x70] sm:$0xff]  ;;  %v4124_v25 = vld [vmem:[#allocation16 + $0x58] sm:$0xff] }
 0x1cd   : > { %v1287_v27 = vmax.f32 %v1279_v23, 0.0  ;;  %v1500_v41 = vunpack.c.l.b16 %v1480_v35  ;;  %v4126_v23 = vld [vmem:[#allocation16 + $0x68] sm:$0xff]  ;;  %v4115_v35 = vld [vmem:[#allocation16 + $0x10] sm:$0xff] }
 0x1ce   : > { %1812 = vmatpush.bf16.msra.mxu0 %v4127_v22 }
 0x1cf   : > { %v1361_v29 = vadd.f32 %v1353_v26, %v1287_v27  ;;  %v4120_v26 = vld [vmem:[#allocation16 + $0x38] sm:$0xff]  ;;  %v4123_v27 = vld [vmem:[#allocation16 + $0x50] sm:$0xff] }
 0x1d0   : > { %v1262_v32 = vpop.f32.mrf.mxu2  ;;  %1792 = vmatpush.bf16.msrb.mxu3 %v4120_v26  ;;  %v4167_v26 = vld [vmem:[#allocation19 + $0xf4] sm:$0xf] }
 0x1d1   : > { %v1365_v33 = vmax.f32 %v1361_v29, 0.0  ;;  %v1263_v34 = vadd.f32 %v4425_v7, %v1262_v32  ;;  %v4122_v29 = vld [vmem:[#allocation16 + $0x48] sm:$0xff]  ;;  %v4117_v32 = vld [vmem:[#allocation16 + $0x20] sm:$0xff] }
 0x1d2   : > { %1813 = vmatpush.bf16.msra.mxu0 %v4126_v23 }
 0x1d3   : > { %v1282_v37 = vadd.f32 %v1281_v31, %v1263_v34  ;;  %v1481_v38 = vpack.c.bf16 %v1365_v33, %v1365_v33  ;;  %v1456_v55 = vrot.slane %v1365_v33, 6  ;;  %v4121_v31 = vld [vmem:[#allocation16 + $0x40] sm:$0xff]  ;;  %v4116_v33 = vld [vmem:[#allocation16 + $0x18] sm:$0xff] }
 0x1d4   : > { %1793 = vmatpush.bf16.msrb.mxu3 %v4119_v28  ;;  %v3725_v28 = vld [vmem:[#allocation19 + $0xf8] sm:$0xf0] }
 0x1d5   : > { %v1288_v40 = vmax.f32 %v1282_v37, 0.0  ;;  %v1501_v42 = vunpack.c.l.b16 %v1481_v38  ;;  %v1462_v61 = vsel %vm1459_vm2, %v1455_v58, %v1456_v55  ;;  %v4114_v38 = vld [vmem:[#allocation16 + $0x8] sm:$0xff] }
 0x1d6   : > { %v1477_v4 = vpack.c.bf16 %v1462_v61, %v1462_v61  ;;  %1814 = vmatpush.bf16.msra.mxu0 %v4125_v24  ;;  %v3723_v24 = vld [vmem:[#allocation19 + $0xf0] sm:$0xf] }
 0x1d7   : > { %v1504_v44 = vpack.c.b16 %v1501_v42, %v1500_v41  ;;  %v1362_v46 = vadd.f32 %v1356_v39, %v1288_v40  ;;  %v4113_v40 = vld [vmem:[#allocation16] sm:$0xff] }
 0x1d8   : > { %v1264_v45 = vpop.f32.mrf.mxu2  ;;  %v1489_v10 = vunpack.c.l.b16 %v1477_v4  ;;  %1794 = vmatpush.bf16.msrb.mxu3 %v4118_v30  ;;  %v3715_v30 = vld [vmem:[#allocation19 + $0xe0] sm:$0xf] }
 0x1d9   : > { %v1265_v47 = vadd.f32 %v4425_v7, %v1264_v45  ;;  %1634 = vmatmul.bf16.vlgmr.msrb.gmra.mxu2 %v1504_v44  ;;  %v1366_v52 = vmax.f32 %v1362_v46, 0.0 }
 0x1da   : > { %1815 = vmatpush.bf16.msra.mxu0 %v4124_v25  ;;  %v4168_v25 = vld [vmem:[#allocation19 + $0xf4] sm:$0xf0] }
 0x1db   : > { %v1284_v50 = vadd.f32 %v1283_v48, %v1265_v47  ;;  %v1482_v60 = vpack.c.bf16 %v1366_v52, %v1366_v52  ;;  %v1457_v13 = vrot.slane %v1366_v52, 6 }
 0x1dc   : > { %1795 = vmatpush.bf16.msrb.mxu3 %v4117_v32  ;;  %v4165_v32 = vld [vmem:[#allocation19 + $0xe4] sm:$0xf] }
 0x1dd   : > { %v1289_v54 = vmax.f32 %v1284_v50, 0.0  ;;  %v1502_v1 = vunpack.c.l.b16 %v1482_v60  ;;  %v1461_v15 = vsel %vm1459_vm2, %v1456_v55, %v1457_v13 }
 0x1de   : > { %v1478_v17 = vpack.c.bf16 %v1461_v15, %v1461_v15  ;;  %1816 = vmatpush.bf16.msra.mxu0 %v4123_v27  ;;  %v3724_v27 = vor.u32 %v4168_v25, %v3723_v24  ;;  %v4153_v24 = vld [vmem:[#allocation19 + $0x84] sm:$0xf]  ;;  %v3669_v25 = vld [vmem:[#allocation19 + $0x88] sm:$0xf0] }
 0x1df   : > { %v1363_v57 = vadd.f32 %v1358_v53, %v1289_v54 }
 0x1e0   : > { %v1490_v19 = vunpack.c.l.b16 %v1478_v17  ;;  %1796 = vmatpush.bf16.msrb.mxu3 %v4116_v33 }
 0x1e1   : > { %v1367_v59 = vmax.f32 %v1363_v57, 0.0 }
 0x1e2   : > { %1817 = vmatpush.bf16.msra.mxu0 %v4122_v29  ;;  %v3728_v29 = vor.u32 %v4167_v26, %v3725_v28  ;;  %v3672_v26 = vor.u32 %v4153_v24, %v3669_v25  ;;  %v4146_v28 = vld [vmem:[#allocation19 + $0x44] sm:$0xf0] }
 0x1e3   : > { %v1458_v63 = vrot.slane %v1367_v59, 6  ;;  %v1483_v0 = vpack.c.bf16 %v1367_v59, %v1367_v59 }
 0x1e4   : > { %1797 = vmatpush.bf16.msrb.mxu3 %v4115_v35 }
 0x1e5   : > { %v1503_v2 = vunpack.c.l.b16 %v1483_v0  ;;  %v1463_v3 = vsel %vm1459_vm2, %v1458_v63, %v1455_v58  ;;  %v1460_v14 = vsel %vm1459_vm2, %v1457_v13, %v1458_v63 }
 0x1e6   : > { %v1472_v5 = vsel %vm1451_vm3, %v1463_v3, 0.0  ;;  %v1479_v16 = vpack.c.bf16 %v1460_v14, %v1460_v14  ;;  %1818 = vmatpush.bf16.msra.mxu0 %v4121_v31  ;;  %v4166_v31 = vld [vmem:[#allocation19 + $0xe4] sm:$0xf0] }
 0x1e7   : > { %v1505_v7 = vpack.c.b16 %v1503_v2, %v1502_v1  ;;  %v1476_v8 = vpack.c.bf16 %v1472_v5, %v1472_v5  ;;  %v3716_v33 = vor.u32 %v4166_v31, %v3715_v30  ;;  %v3637_v31 = vld [vmem:[#allocation19 + $0x48] sm:$0xf0] }
 0x1e8   : > { %v1491_v18 = vunpack.c.l.b16 %v1479_v16  ;;  %1798 = vmatpush.bf16.msrb.mxu3 %v4114_v38  ;;  %v4163_v38 = vld [vmem:[#allocation19 + $0xd4] sm:$0xf] }
 0x1e9   : > { %1639 = vmatmul.bf16.gmra.mxu2 %v1505_v7  ;;  %v1488_v9 = vunpack.c.l.b16 %v1476_v8 }
 0x1ea   : > { %v1493_v20 = vpack.c.b16 %v1491_v18, %v1490_v19 }
 0x1eb   : > { %v1492_v12 = vpack.c.b16 %v1489_v10, %v1488_v9 }
 0x1ec   : > { %1799 = vmatpush.bf16.msrb.mxu3 %v4113_v40  ;;  %v3709_v40 = vld [vmem:[#allocation19 + $0xd8] sm:$0xf0] }
 0x1ed   : > { %1615 = vmatmul.bf16.vlgmr.msrb.gmra.mxu1 %v1492_v12 }
 0x1ee   : > { %2306 = vmatpush.bf16.msrb.mxu1 %v3728_v29  ;;  %v4145_v29 = vld [vmem:[#allocation19 + $0x44] sm:$0xf] }
 0x1f0   : > { %2268 = vmatpush.bf16.msra.mxu3 %v3724_v27  ;;  %v3635_v27 = vld [vmem:[#allocation19 + $0x40] sm:$0xf] }
 0x1f1   : > { %v3636_v30 = vor.u32 %v4146_v28, %v3635_v27 }
 0x1f4   : > { %2269 = vmatpush.bf16.msra.mxu3 %v3716_v33 }
 0x1fd   : > { %1620 = vmatmul.bf16.gmra.mxu1 %v1493_v20 }
 0x20d   : > { %1893 = vmatmul.bf16.vlgmr.msra.gmra.mxu1 %v1504_v44 }
 0x21d   : > { %1898 = vmatmul.bf16.gmra.mxu1 %v1505_v7 }
 0x25c   : > { %v1635_v34 = vpop.f32.mrf.mxu2 }
 0x264   : > { %v1637_v42 = vpop.f32.mrf.mxu2 }
 0x26a   : > { %v1616_v37 = vpop.f32.mrf.mxu1 }
 0x26b   : > { %v1617_v39 = vadd.f32 %v4426_v36, %v1616_v37  ;;  %v4164_v37 = vld [vmem:[#allocation19 + $0xd4] sm:$0xf0] }
 0x26c   : > { %v1640_v50 = vpop.f32.mrf.mxu2 }
 0x26d   : > { %v1636_v41 = vadd.f32 %v1635_v34, %v1617_v39  ;;  %v3717_v34 = vld [vmem:[#allocation19 + $0xe8] sm:$0xf0] }
 0x26e   : > { %v3720_v35 = vor.u32 %v4165_v32, %v3717_v34  ;;  %v3640_v32 = vor.u32 %v4145_v29, %v3637_v31  ;;  %v3627_v34 = vld [vmem:[#allocation19 + $0x30] sm:$0xf] }
 0x26f   : > { %v1645_v44 = vmax.f32 %v1636_v41, 0.0  ;;  %v3712_v41 = vor.u32 %v4163_v38, %v3709_v40  ;;  %v4428_v40 = vld [vmem:[%s5534_s10] ss:$0 sm:$0xff] }
 0x270   : > { %2307 = vmatpush.bf16.msrb.mxu1 %v3720_v35  ;;  %v4144_v35 = vld [vmem:[#allocation19 + $0x34] sm:$0xf0] }
 0x271   : > { %v1665_v47 = vpack.c.bf16 %v1645_v44, %v1645_v44  ;;  %v1649_v63 = vrot.slane %v1645_v44, 6  ;;  %v4161_v44 = vld [vmem:[#allocation19 + $0xc4] sm:$0xf]  ;;  %v3628_v38 = vor.u32 %v4144_v35, %v3627_v34 }
 0x272   : > { %v1618_v43 = vpop.f32.mrf.mxu1 }
 0x273   : > { %v1619_v45 = vadd.f32 %v4426_v36, %v1618_v43  ;;  %v1685_v52 = vunpack.c.l.b16 %v1665_v47  ;;  %v4162_v43 = vld [vmem:[#allocation19 + $0xc4] sm:$0xf0] }
 0x274   : > { %v1642_v61 = vpop.f32.mrf.mxu2  ;;  %2308 = vmatpush.bf16.msrb.mxu1 %v3712_v41 }
 0x275   : > { %v1638_v46 = vadd.f32 %v1637_v42, %v1619_v45  ;;  %v3699_v42 = vld [vmem:[#allocation19 + $0xc0] sm:$0xf] }
 0x276   : > { %v3700_v45 = vor.u32 %v4162_v43, %v3699_v42  ;;  %v3619_v42 = vld [vmem:[#allocation19 + $0x20] sm:$0xf]  ;;  %v4142_v43 = vld [vmem:[#allocation19 + $0x24] sm:$0xf0] }
 0x277   : > { %v1646_v48 = vmax.f32 %v1638_v46, 0.0  ;;  %v3701_v46 = vld [vmem:[#allocation19 + $0xc8] sm:$0xf0] }
 0x278   : > { %v3704_v47 = vor.u32 %v4161_v44, %v3701_v46  ;;  %v4141_v44 = vld [vmem:[#allocation19 + $0x24] sm:$0xf]  ;;  %v3620_v46 = vor.u32 %v4142_v43, %v3619_v42 }
 0x279   : > { %v1666_v49 = vpack.c.bf16 %v1646_v48, %v1646_v48  ;;  %v1650_v60 = vrot.slane %v1646_v48, 6  ;;  %v3691_v48 = vld [vmem:[#allocation19 + $0xb0] sm:$0xf] }
 0x27a   : > { %v1621_v51 = vpop.f32.mrf.mxu1  ;;  %2309 = vmatpush.bf16.msrb.mxu1 %v3704_v47  ;;  %v3621_v47 = vld [vmem:[#allocation19 + $0x28] sm:$0xf0] }
 0x27b   : > { %v1686_v53 = vunpack.c.l.b16 %v1666_v49  ;;  %v1622_v54 = vadd.f32 %v4426_v36, %v1621_v51  ;;  %v1655_v2 = vsel %vm1459_vm2, %v1649_v63, %v1650_v60  ;;  %v4160_v49 = vld [vmem:[#allocation19 + $0xb4] sm:$0xf0] }
 0x27c   : > { %v1662_v8 = vpack.c.bf16 %v1655_v2, %v1655_v2  ;;  %v3692_v51 = vor.u32 %v4160_v49, %v3691_v48  ;;  %v3651_v2 = vld [vmem:[#allocation19 + $0x60] sm:$0xf]  ;;  %v3624_v49 = vor.u32 %v4141_v44, %v3621_v47 }
 0x27d   : > { %v1689_v55 = vpack.c.b16 %v1686_v53, %v1685_v52  ;;  %v1641_v56 = vadd.f32 %v1640_v50, %v1622_v54  ;;  %v4159_v50 = vld [vmem:[#allocation19 + $0xb4] sm:$0xf]  ;;  %v3693_v52 = vld [vmem:[#allocation19 + $0xb8] sm:$0xf0]  ;;  %v3659_v54 = vld [vmem:[#allocation19 + $0x70] sm:$0xf] }
 0x27e   : > { %v1674_v14 = vunpack.c.l.b16 %v1662_v8  ;;  %v3696_v53 = vor.u32 %v4159_v50, %v3693_v52  ;;  %v3653_v8 = vld [vmem:[#allocation19 + $0x68] sm:$0xf0]  ;;  %v4427_v50 = vld [vmem:[%s5588_s26] ss:$0 sm:$0xff]  ;;  %v3611_v52 = vld [vmem:[#allocation19 + $0x10] sm:$0xf] }
 0x27f   : > { %1819 = vmatmul.bf16.vlgmr.msra.gmra.mxu0 %v1689_v55  ;;  %v1647_v58 = vmax.f32 %v1641_v56, 0.0  ;;  %v4152_v55 = vld [vmem:[#allocation19 + $0x74] sm:$0xf0]  ;;  %v3683_v56 = vld [vmem:[#allocation19 + $0xa0] sm:$0xf]  ;;  %s3050_s26 = sshll.u32 %s5474_s6, 4  ;;  %s3051_s26 = int_to_ptr.vmem [resolvable:$true] %s3050_s26 }
 0x280   : > { %2310 = vmatpush.bf16.msrb.mxu1 %v3696_v53  ;;  %v4140_v53 = vld [vmem:[#allocation19 + $0x14] sm:$0xf0] }
 0x281   : > { %v1667_v1 = vpack.c.bf16 %v1647_v58, %v1647_v58  ;;  %v1651_v16 = vrot.slane %v1647_v58, 6  ;;  %v4158_v58 = vld [vmem:[#allocation19 + $0xa4] sm:$0xf0] }
 0x282   : > { %v1623_v57 = vpop.f32.mrf.mxu1 }
 0x283   : > { %v1624_v59 = vadd.f32 %v4426_v36, %v1623_v57  ;;  %v1687_v5 = vunpack.c.l.b16 %v1667_v1  ;;  %v1654_v18 = vsel %vm1459_vm2, %v1650_v60, %v1651_v16  ;;  %v3707_v36 = vld [vmem:[#allocation19 + $0xd0] sm:$0xf]  ;;  %v3660_v57 = vor.u32 %v4152_v55, %v3659_v54  ;;  %v3661_v60 = vld [vmem:[#allocation19 + $0x78] sm:$0xf0]  ;;  %v4139_v54 = vld [vmem:[#allocation19 + $0x14] sm:$0xf] }
 0x284   : > { %v1663_v20 = vpack.c.bf16 %v1654_v18, %v1654_v18  ;;  %v3708_v39 = vor.u32 %v4164_v37, %v3707_v36  ;;  %v4143_v36 = vld [vmem:[#allocation19 + $0x34] sm:$0xf]  ;;  %v3612_v55 = vor.u32 %v4140_v53, %v3611_v52 }
 0x285   : > { %v1643_v62 = vadd.f32 %v1642_v61, %v1624_v59  ;;  %v4151_v59 = vld [vmem:[#allocation19 + $0x74] sm:$0xf]  ;;  %v3684_v61 = vor.u32 %v4158_v58, %v3683_v56  ;;  %2249 = vmatpush.bf16.msra.mxu2 %v3660_v57  ;;  %v3613_v56 = vld [vmem:[#allocation19 + $0x18] sm:$0xf0] }
 0x286   : > { %v1675_v22 = vunpack.c.l.b16 %v1663_v20  ;;  %2270 = vmatpush.bf16.msra.mxu3 %v3708_v39  ;;  %v4147_v20 = vld [vmem:[#allocation19 + $0x54] sm:$0xf]  ;;  %v3629_v39 = vld [vmem:[#allocation19 + $0x38] sm:$0xf0] }
 0x287   : > { %v1648_v0 = vmax.f32 %v1643_v62, 0.0  ;;  %v3664_v62 = vor.u32 %v4151_v59, %v3661_v60  ;;  %v3632_v41 = vor.u32 %v4143_v36, %v3629_v39  ;;  %v3616_v59 = vor.u32 %v4139_v54, %v3613_v56  ;;  %v3603_v60 = vld [vmem:[#allocation19] sm:$0xf] }
 0x289   : > { %v1652_v3 = vrot.slane %v1648_v0, 6  ;;  %v1668_v4 = vpack.c.bf16 %v1648_v0, %v1648_v0  ;;  %v3685_v0 = vld [vmem:[#allocation19 + $0xa8] sm:$0xf0]  ;;  %2287 = vmatpush.bf16.msrb.mxu0 %v3664_v62 }
 0x28a   : > { %2271 = vmatpush.bf16.msra.mxu3 %v3700_v45  ;;  %v1894_v33 = vpop.f32.mrf.mxu1 }
 0x28b   : > { %v1688_v6 = vunpack.c.l.b16 %v1668_v4  ;;  %v1656_v7 = vsel %vm1459_vm2, %v1652_v3, %v1649_v63  ;;  %v1653_v17 = vsel %vm1459_vm2, %v1651_v16, %v1652_v3  ;;  %v4157_v63 = vld [vmem:[#allocation19 + $0xa4] sm:$0xf]  ;;  %v4150_v3 = vld [vmem:[#allocation19 + $0x64] sm:$0xf0]  ;;  %v3675_v4 = vld [vmem:[#allocation19 + $0x90] sm:$0xf] }
 0x28c   : > { %v1657_v9 = vsel %vm1451_vm3, %v1656_v7, 0.0  ;;  %v1664_v19 = vpack.c.bf16 %v1653_v17, %v1653_v17  ;;  %v3688_v1 = vor.u32 %v4157_v63, %v3685_v0  ;;  %v4149_v7 = vld [vmem:[#allocation19 + $0x64] sm:$0xf]  ;;  %v4148_v16 = vld [vmem:[#allocation19 + $0x54] sm:$0xf0]  ;;  %v1895_v0 = vadd.f32 %v4427_v50, %v1894_v33 }
 0x28d   : > { %v1690_v10 = vpack.c.b16 %v1688_v6, %v1687_v5  ;;  %v1661_v12 = vpack.c.bf16 %v1657_v9, %v1657_v9  ;;  %v3652_v5 = vor.u32 %v4150_v3, %v3651_v2  ;;  %v4156_v6 = vld [vmem:[#allocation19 + $0x94] sm:$0xf0]  ;;  %v3667_v17 = vld [vmem:[#allocation19 + $0x80] sm:$0xf]  ;;  %v3605_v2 = vld [vmem:[#allocation19 + $0x8] sm:$0xf0] }
 0x28e   : > { %v1676_v21 = vunpack.c.l.b16 %v1664_v19  ;;  %2272 = vmatpush.bf16.msra.mxu3 %v3692_v51  ;;  %2311 = vmatpush.bf16.msrb.mxu1 %v3688_v1  ;;  %v3676_v9 = vor.u32 %v4156_v6, %v3675_v4  ;;  %v4154_v19 = vld [vmem:[#allocation19 + $0x84] sm:$0xf0]  ;;  %v4137_v1 = vld [vmem:[#allocation19 + $0x4] sm:$0xf] }
 0x28f   : > { %1824 = vmatmul.bf16.gmra.mxu0 %v1690_v10  ;;  %v1673_v13 = vunpack.c.l.b16 %v1661_v12  ;;  %v3656_v10 = vor.u32 %v4149_v7, %v3653_v8  ;;  %v4155_v12 = vld [vmem:[#allocation19 + $0x94] sm:$0xf]  ;;  %2250 = vmatpush.bf16.msra.mxu2 %v3652_v5  ;;  %v3608_v4 = vor.u32 %v4137_v1, %v3605_v2  ;;  %v4232_v1 = vld [vmem:[#allocation20 + $0x1f4] sm:$0xf0] }
 0x290   : > { %v1678_v23 = vpack.c.b16 %v1676_v21, %v1675_v22  ;;  %v3645_v21 = vld [vmem:[#allocation19 + $0x58] sm:$0xf0]  ;;  %v3668_v22 = vor.u32 %v4154_v19, %v3667_v17 }
 0x291   : > { %v1677_v15 = vpack.c.b16 %v1674_v14, %v1673_v13  ;;  %v3677_v13 = vld [vmem:[#allocation19 + $0x98] sm:$0xf0]  ;;  %2288 = vmatpush.bf16.msrb.mxu0 %v3656_v10 }
 0x292   : > { %2273 = vmatpush.bf16.msra.mxu3 %v3684_v61  ;;  %v3680_v14 = vor.u32 %v4155_v12, %v3677_v13  ;;  %v1896_v57 = vpop.f32.mrf.mxu1  ;;  %v4138_v61 = vld [vmem:[#allocation19 + $0x4] sm:$0xf0] }
 0x293   : > { %1800 = vmatmul.bf16.vlgmr.msrb.gmra.mxu3 %v1677_v15  ;;  %v3643_v15 = vld [vmem:[#allocation19 + $0x50] sm:$0xf]  ;;  %v3604_v63 = vor.u32 %v4138_v61, %v3603_v60  ;;  %v1897_v8 = vadd.f32 %v4427_v50, %v1896_v57 }
 0x294   : > { %2312 = vmatpush.bf16.msrb.mxu1 %v3680_v14  ;;  %v3644_v18 = vor.u32 %v4148_v16, %v3643_v15  ;;  %v3915_v61 = vld [vmem:[#allocation20 + $0x170] sm:$0xf] }
 0x296   : > { %2274 = vmatpush.bf16.msra.mxu3 %v3676_v9  ;;  %2251 = vmatpush.bf16.msra.mxu2 %v3644_v18 }
 0x298   : > { %2313 = vmatpush.bf16.msrb.mxu1 %v3672_v26 }
 0x29a   : > { %2275 = vmatpush.bf16.msra.mxu3 %v3668_v22  ;;  %2252 = vmatpush.bf16.msra.mxu2 %v3636_v30  ;;  %v1899_v12 = vpop.f32.mrf.mxu1 }
 0x29b   : > { %v1900_v24 = vadd.f32 %v4427_v50, %v1899_v12  ;;  %v3963_v12 = vld [vmem:[#allocation20 + $0x1d0] sm:$0xf] }
 0x29e   : > { %2253 = vmatpush.bf16.msra.mxu2 %v3628_v38 }
 0x2a2   : > { %2254 = vmatpush.bf16.msra.mxu2 %v3620_v46  ;;  %v1901_v29 = vpop.f32.mrf.mxu1 }
 0x2a3   : > { %1805 = vmatmul.bf16.gmra.mxu3 %v1678_v23  ;;  %v3648_v23 = vor.u32 %v4147_v20, %v3645_v21 }
 0x2a5   : > { %2289 = vmatpush.bf16.msrb.mxu0 %v3648_v23 }
 0x2a6   : > { %2255 = vmatpush.bf16.msra.mxu2 %v3612_v55 }
 0x2a9   : > { %2290 = vmatpush.bf16.msrb.mxu0 %v3640_v32  ;;  %v1902_v32 = vadd.f32 %v4427_v50, %v1901_v29  ;;  %v3787_v29 = vld [vmem:[#allocation20 + $0x70] sm:$0xf] }
 0x2aa   : > { %2256 = vmatpush.bf16.msra.mxu2 %v3604_v63  ;;  %v3979_v63 = vld [vmem:[#allocation20 + $0x1f0] sm:$0xf] }
 0x2ab   : > { %v3980_v2 = vor.u32 %v4232_v1, %v3979_v63  ;;  %v3923_v63 = vld [vmem:[#allocation20 + $0x180] sm:$0xf] }
 0x2ad   : > { %2291 = vmatpush.bf16.msrb.mxu0 %v3632_v41  ;;  %2787 = vmatpush.bf16.msra.mxu1 %v3980_v2  ;;  %v3763_v2 = vld [vmem:[#allocation20 + $0x40] sm:$0xf] }
 0x2b1   : > { %2292 = vmatpush.bf16.msrb.mxu0 %v3624_v49 }
 0x2b5   : > { %2293 = vmatpush.bf16.msrb.mxu0 %v3616_v59 }
 0x2b9   : > { %2294 = vmatpush.bf16.msrb.mxu0 %v3608_v4  ;;  %v4214_v4 = vld [vmem:[#allocation20 + $0x164] sm:$0xf0] }
 0x2fc   : > { %v1820_v37 = vpop.f32.mrf.mxu0 }
 0x304   : > { %v1822_v62 = vpop.f32.mrf.mxu0 }
 0x30c   : > { %v1825_v14 = vpop.f32.mrf.mxu0 }
 0x314   : > { %v1827_v30 = vpop.f32.mrf.mxu0 }
 0x316   : > { %v1801_v45 = vpop.f32.mrf.mxu3 }
 0x317   : > { %v1802_v48 = vadd.f32 %v4428_v40, %v1801_v45 }
 0x319   : > { %v1821_v51 = vadd.f32 %v1820_v37, %v1802_v48 }
 0x31b   : > { %v1830_v58 = vmax.f32 %v1821_v51, 0.0 }
 0x31d   : > { %v1904_v5 = vadd.f32 %v1895_v0, %v1830_v58 }
 0x31e   : > { %v1803_v3 = vpop.f32.mrf.mxu3 }
 0x31f   : > { %v1804_v6 = vadd.f32 %v4428_v40, %v1803_v3  ;;  %v1908_v9 = vmax.f32 %v1904_v5, 0.0  ;;  %v3907_v3 = vld [vmem:[#allocation20 + $0x160] sm:$0xf] }
 0x320   : > { %v3908_v5 = vor.u32 %v4214_v4, %v3907_v3  ;;  %v4178_v3 = vld [vmem:[#allocation20 + $0x44] sm:$0xf0]  ;;  %v3827_v4 = vld [vmem:[#allocation20 + $0xc0] sm:$0xf] }
 0x321   : > { %v1823_v7 = vadd.f32 %v1822_v62, %v1804_v6  ;;  %v2056_v16 = vpack.c.bf16 %v1908_v9, %v1908_v9  ;;  %v2031_v37 = vrot.slane %v1908_v9, 4  ;;  %v4216_v62 = vld [vmem:[#allocation20 + $0x174] sm:$0xf0]  ;;  %v3971_v6 = vld [vmem:[#allocation20 + $0x1e0] sm:$0xf] }
 0x322   : > { %v3916_v0 = vor.u32 %v4216_v62, %v3915_v61  ;;  %v3899_v9 = vld [vmem:[#allocation20 + $0x150] sm:$0xf] }
 0x323   : > { %v1831_v10 = vmax.f32 %v1823_v7, 0.0  ;;  %v2076_v21 = vunpack.c.l.b16 %v2056_v16  ;;  %v4230_v7 = vld [vmem:[#allocation20 + $0x1e4] sm:$0xf0]  ;;  %v3891_v16 = vld [vmem:[#allocation20 + $0x140] sm:$0xf] }
 0x324   : > { %2768 = vmatpush.bf16.msra.mxu0 %v3916_v0  ;;  %v4218_v0 = vld [vmem:[#allocation20 + $0x184] sm:$0xf0] }
 0x325   : > { %v1905_v13 = vadd.f32 %v1897_v8, %v1831_v10  ;;  %v3972_v8 = vor.u32 %v4230_v7, %v3971_v6  ;;  %v4212_v10 = vld [vmem:[#allocation20 + $0x154] sm:$0xf0]  ;;  %v3924_v1 = vor.u32 %v4218_v0, %v3923_v63  ;;  %v4194_v6 = vld [vmem:[#allocation20 + $0xc4] sm:$0xf0]  ;;  %v4215_v7 = vld [vmem:[#allocation20 + $0x174] sm:$0xf] }
 0x326   : > { %v1806_v15 = vpop.f32.mrf.mxu3 }
 0x327   : > { %v1909_v17 = vmax.f32 %v1905_v13, 0.0  ;;  %v1807_v18 = vadd.f32 %v4428_v40, %v1806_v15  ;;  %2788 = vmatpush.bf16.msra.mxu1 %v3972_v8  ;;  %v3900_v13 = vor.u32 %v4212_v10, %v3899_v9  ;;  %v3917_v8 = vld [vmem:[#allocation20 + $0x178] sm:$0xf0]  ;;  %v3828_v10 = vor.u32 %v4194_v6, %v3827_v4  ;;  %v4186_v6 = vld [vmem:[#allocation20 + $0x84] sm:$0xf0] }
 0x328   : > { %2769 = vmatpush.bf16.msra.mxu0 %v3908_v5  ;;  %v3764_v5 = vor.u32 %v4178_v3, %v3763_v2  ;;  %v4170_v2 = vld [vmem:[#allocation20 + $0x4] sm:$0xf0]  ;;  %v3795_v3 = vld [vmem:[#allocation20 + $0x80] sm:$0xf] }
 0x329   : > { %v2057_v19 = vpack.c.bf16 %v1909_v17, %v1909_v17  ;;  %v1826_v20 = vadd.f32 %v1825_v14, %v1807_v18  ;;  %v2032_v35 = vrot.slane %v1909_v17, 4  ;;  %v4228_v14 = vld [vmem:[#allocation20 + $0x1d4] sm:$0xf0]  ;;  %v4210_v17 = vld [vmem:[#allocation20 + $0x144] sm:$0xf0] }
 0x32a   : > { %v3964_v15 = vor.u32 %v4228_v14, %v3963_v12  ;;  %v3892_v18 = vor.u32 %v4210_v17, %v3891_v16  ;;  %v3920_v12 = vor.u32 %v4215_v7, %v3917_v8  ;;  %v3981_v14 = vld [vmem:[#allocation20 + $0x1f8] sm:$0xf0]  ;;  %v3755_v17 = vld [vmem:[#allocation20 + $0x30] sm:$0xf]  ;;  %v4207_v7 = vld [vmem:[#allocation20 + $0x134] sm:$0xf] }
 0x32b   : > { %v2077_v22 = vunpack.c.l.b16 %v2057_v19  ;;  %v1832_v23 = vmax.f32 %v1826_v20, 0.0  ;;  %v3955_v19 = vld [vmem:[#allocation20 + $0x1c0] sm:$0xf]  ;;  %v4226_v20 = vld [vmem:[#allocation20 + $0x1c4] sm:$0xf0] }
 0x32c   : > { %2770 = vmatpush.bf16.msra.mxu0 %v3900_v13  ;;  %2789 = vmatpush.bf16.msra.mxu1 %v3964_v15  ;;  %v4231_v13 = vld [vmem:[#allocation20 + $0x1f4] sm:$0xf]  ;;  %v1944_v15 = vld [vmem:[%s5589_s18] sm:$0x3]  ;;  %v3885_v8 = vld [vmem:[#allocation20 + $0x138] sm:$0xf0] }
 0x32d   : > { %v5318_v25 = vpack.c.b16 %v2077_v22, %v2076_v21  ;;  %v1906_v27 = vadd.f32 %v1900_v24, %v1832_v23  ;;  %v3956_v21 = vor.u32 %v4226_v20, %v3955_v19  ;;  %v3883_v22 = vld [vmem:[#allocation20 + $0x130] sm:$0xf]  ;;  %v4208_v23 = vld [vmem:[#allocation20 + $0x134] sm:$0xf0]  ;;  %v3984_v16 = vor.u32 %v4231_v13, %v3981_v14  ;;  %v4223_v14 = vld [vmem:[#allocation20 + $0x1b4] sm:$0xf] }
 0x32e   : > { %v1808_v26 = vpop.f32.mrf.mxu3  ;;  %v3947_v24 = vld [vmem:[#allocation20 + $0x1b0] sm:$0xf]  ;;  %v3888_v13 = vor.u32 %v4207_v7, %v3885_v8  ;;  %v3925_v7 = vld [vmem:[#allocation20 + $0x188] sm:$0xf0]  ;;  %s4835_s18 = scalar_lea.hbm %s4834_s14, 32 }
 0x32f   : > { %v1809_v28 = vadd.f32 %v4428_v40, %v1808_v26  ;;  %2276 = vmatmul.bf16.vlgmr.msra.gmra.mxu3 %v5318_v25  ;;  %2314 = vmatmul.bf16.vlgmr.msrb.gmra.mxu1 %v5318_v25  ;;  %v1910_v33 = vmax.f32 %v1906_v27, 0.0  ;;  %v2038_v40 = vsel %vm2035_vm4, %v2031_v37, %v2032_v35  ;;  %v3884_v26 = vor.u32 %v4208_v23, %v3883_v22  ;;  %v4224_v27 = vld [vmem:[#allocation20 + $0x1b4] sm:$0xf0]  ;;  %v3819_v19 = vld [vmem:[#allocation20 + $0xb0] sm:$0xf]  ;;  %p4836_p1 = scmp.ne.s32.totalorder %s4834_s14, %s4835_s18 }
 0x330   : > { %v2053_v46 = vpack.c.bf16 %v2038_v40, %v2038_v40  ;;  %2771 = vmatpush.bf16.msra.mxu0 %v3892_v18  ;;  %2790 = vmatpush.bf16.msra.mxu1 %v3956_v21  ;;  %v4176_v18 = vld [vmem:[#allocation20 + $0x34] sm:$0xf0]  ;;  %v4213_v22 = vld [vmem:[#allocation20 + $0x164] sm:$0xf]  ;;  %v3909_v23 = vld [vmem:[#allocation20 + $0x168] sm:$0xf0] }
 0x331   : > { %v1828_v31 = vadd.f32 %v1827_v30, %v1809_v28  ;;  %v2058_v38 = vpack.c.bf16 %v1910_v33, %v1910_v33  ;;  %v2033_v53 = vrot.slane %v1910_v33, 4  ;;  %v3948_v28 = vor.u32 %v4224_v27, %v3947_v24  ;;  %v4184_v30 = vld [vmem:[#allocation20 + $0x74] sm:$0xf0]  ;;  %p4837_p3 = pnand %p4836_p1, %p5183_p4 }
 0x332   : > { %v2065_v51 = vunpack.c.l.b16 %v2053_v46  ;;  %v4200_v33 = vld [vmem:[#allocation20 + $0xf4] sm:$0xf0]  ;;  %v3867_v46 = vld [vmem:[#allocation20 + $0x110] sm:$0xf]  ;;  %v3756_v20 = vor.u32 %v4176_v18, %v3755_v17  ;;  %v3912_v27 = vor.u32 %v4213_v22, %v3909_v23 }
 0x333   : > { %v1833_v34 = vmax.f32 %v1828_v31, 0.0  ;;  %v2078_v43 = vunpack.c.l.b16 %v2058_v38  ;;  %v2037_v55 = vsel %vm2035_vm4, %v2032_v35, %v2033_v53  ;;  %v3851_v31 = vld [vmem:[#allocation20 + $0xf0] sm:$0xf]  ;;  %v4206_v35 = vld [vmem:[#allocation20 + $0x124] sm:$0xf0]  ;;  %p4838_p5 = pneg %p4837_p3 }
 0x334   : > { %v2054_v57 = vpack.c.bf16 %v2037_v55, %v2037_v55  ;;  %2772 = vmatpush.bf16.msra.mxu0 %v3884_v26  ;;  %2791 = vmatpush.bf16.msra.mxu1 %v3948_v28  ;;  %v3939_v38 = vld [vmem:[#allocation20 + $0x1a0] sm:$0xf]  ;;  %v4180_v55 = vld [vmem:[#allocation20 + $0x54] sm:$0xf0]  ;;  %v4229_v28 = vld [vmem:[#allocation20 + $0x1e4] sm:$0xf] }
 0x335   : > { %v1907_v36 = vadd.f32 %v1902_v32, %v1833_v34  ;;  %v3788_v32 = vor.u32 %v4184_v30, %v3787_v29  ;;  %v3875_v34 = vld [vmem:[#allocation20 + $0x120] sm:$0xf]  ;;  %v4192_v21 = vld [vmem:[#allocation20 + $0xb4] sm:$0xf0]  ;;  %v3973_v29 = vld [vmem:[#allocation20 + $0x1e8] sm:$0xf0] }
 0x336   : > { %v2066_v59 = vunpack.c.l.b16 %v2054_v57  ;;  %v3820_v26 = vor.u32 %v4192_v21, %v3819_v19  ;;  %v5343_v30 = vperm.slane %v1944_v15, 1  ;;  %v4183_v19 = vld [vmem:[#allocation20 + $0x74] sm:$0xf] }
 0x337   : > { %v1911_v39 = vmax.f32 %v1907_v36, 0.0  ;;  %v3852_v36 = vor.u32 %v4200_v33, %v3851_v31  ;;  %2730 = vmatpush.bf16.msrb.mxu2 %v3788_v32  ;;  %v5345_v31 = vperm.slane %v1944_v15, 0  ;;  %v3976_v32 = vor.u32 %v4229_v28, %v3973_v29  ;;  %v3949_v15 = vld [vmem:[#allocation20 + $0x1b8] sm:$0xf0]  ;;  %v4199_v21 = vld [vmem:[#allocation20 + $0xf4] sm:$0xf] }
 0x338   : > { %v3952_v17 = vor.u32 %v4223_v14, %v3949_v15  ;;  %v4177_v14 = vld [vmem:[#allocation20 + $0x44] sm:$0xf]  ;;  %v3765_v15 = vld [vmem:[#allocation20 + $0x48] sm:$0xf0] }
 0x339   : > { %v2034_v41 = vrot.slane %v1911_v39, 4  ;;  %v2059_v42 = vpack.c.bf16 %v1911_v39, %v1911_v39  ;;  %v4222_v39 = vld [vmem:[#allocation20 + $0x1a4] sm:$0xf0]  ;;  %2749 = vmatpush.bf16.msrb.mxu3 %v3852_v36  ;;  %v3811_v36 = vld [vmem:[#allocation20 + $0xa0] sm:$0xf] }
 0x33a   : > { %v3940_v40 = vor.u32 %v4222_v39, %v3939_v38  ;;  %v4190_v38 = vld [vmem:[#allocation20 + $0xa4] sm:$0xf0]  ;;  %v4211_v39 = vld [vmem:[#allocation20 + $0x154] sm:$0xf] }
 0x33b   : > { %v2079_v44 = vunpack.c.l.b16 %v2059_v42  ;;  %v2039_v45 = vsel %vm2035_vm4, %v2034_v41, %v2031_v37  ;;  %v2036_v54 = vsel %vm2035_vm4, %v2033_v53, %v2034_v41  ;;  %v3876_v37 = vor.u32 %v4206_v35, %v3875_v34  ;;  %v3779_v41 = vld [vmem:[#allocation20 + $0x60] sm:$0xf]  ;;  %v4182_v42 = vld [vmem:[#allocation20 + $0x64] sm:$0xf0] }
 0x33c   : > { %v2048_v47 = vsel %vm2027_vm5, %v2039_v45, 0.0  ;;  %v2055_v56 = vpack.c.bf16 %v2036_v54, %v2036_v54  ;;  %2792 = vmatpush.bf16.msra.mxu1 %v3940_v40  ;;  %v4198_v45 = vld [vmem:[#allocation20 + $0xe4] sm:$0xf0]  ;;  %v3771_v54 = vld [vmem:[#allocation20 + $0x50] sm:$0xf] }
 0x33d   : > { %v5330_v48 = vpack.c.b16 %v2079_v44, %v2078_v43  ;;  %v2052_v49 = vpack.c.bf16 %v2048_v47, %v2048_v47  ;;  %2773 = vmatpush.bf16.msra.mxu0 %v3876_v37  ;;  %v3843_v43 = vld [vmem:[#allocation20 + $0xe0] sm:$0xf]  ;;  %v3780_v44 = vor.u32 %v4182_v42, %v3779_v41  ;;  %v4204_v47 = vld [vmem:[#allocation20 + $0x114] sm:$0xf0]  ;;  %v3772_v57 = vor.u32 %v4180_v55, %v3771_v54  ;;  %v4174_v35 = vld [vmem:[#allocation20 + $0x24] sm:$0xf0] }
 0x33e   : > { %v2067_v58 = vunpack.c.l.b16 %v2055_v56  ;;  %v3835_v56 = vld [vmem:[#allocation20 + $0xd0] sm:$0xf]  ;;  %v3747_v34 = vld [vmem:[#allocation20 + $0x20] sm:$0xf]  ;;  %v3901_v40 = vld [vmem:[#allocation20 + $0x158] sm:$0xf0]  ;;  %v3812_v41 = vor.u32 %v4190_v38, %v3811_v36 }
 0x33f   : > { %2281 = vmatmul.bf16.gmra.mxu3 %v5330_v48  ;;  %2319 = vmatmul.bf16.gmra.mxu1 %v5330_v48  ;;  %v2064_v50 = vunpack.c.l.b16 %v2052_v49  ;;  %v3844_v49 = vor.u32 %v4198_v45, %v3843_v43  ;;  %v3748_v37 = vor.u32 %v4174_v35, %v3747_v34  ;;  %v3904_v42 = vor.u32 %v4211_v39, %v3901_v40  ;;  %v4227_v43 = vld [vmem:[#allocation20 + $0x1d4] sm:$0xf]  ;;  %v4188_v55 = vld [vmem:[#allocation20 + $0x94] sm:$0xf0]  ;;  %v3877_v34 = vld [vmem:[#allocation20 + $0x128] sm:$0xf0] }
 0x340   : > { %v2069_v60 = vpack.c.b16 %v2067_v58, %v2066_v59  ;;  %2731 = vmatpush.bf16.msrb.mxu2 %v3780_v44  ;;  %v4196_v58 = vld [vmem:[#allocation20 + $0xd4] sm:$0xf0]  ;;  %v3859_v59 = vld [vmem:[#allocation20 + $0x100] sm:$0xf]  ;;  %v3965_v44 = vld [vmem:[#allocation20 + $0x1d8] sm:$0xf0] }
 0x341   : > { %v2068_v52 = vpack.c.b16 %v2065_v51, %v2064_v50  ;;  %v3868_v50 = vor.u32 %v4204_v47, %v3867_v46  ;;  %v3931_v51 = vld [vmem:[#allocation20 + $0x190] sm:$0xf]  ;;  %2750 = vmatpush.bf16.msrb.mxu3 %v3844_v49  ;;  %v3836_v61 = vor.u32 %v4196_v58, %v3835_v56  ;;  %v3968_v45 = vor.u32 %v4227_v43, %v3965_v44  ;;  %v4209_v56 = vld [vmem:[#allocation20 + $0x144] sm:$0xf]  ;;  %v3941_v36 = vld [vmem:[#allocation20 + $0x1a8] sm:$0xf0] }
 0x342   : > { %v4221_v35 = vld [vmem:[#allocation20 + $0x1a4] sm:$0xf]  ;;  %v3781_v40 = vld [vmem:[#allocation20 + $0x68] sm:$0xf0] }
 0x343   : > { %2257 = vmatmul.bf16.vlgmr.msra.gmra.mxu2 %v2068_v52  ;;  %2295 = vmatmul.bf16.vlgmr.msrb.gmra.mxu0 %v2068_v52  ;;  %v4220_v52 = vld [vmem:[#allocation20 + $0x194] sm:$0xf0]  ;;  %v4181_v39 = vld [vmem:[#allocation20 + $0x64] sm:$0xf]  ;;  %v3944_v43 = vor.u32 %v4221_v35, %v3941_v36 }
 0x344   : > { %v3932_v53 = vor.u32 %v4220_v52, %v3931_v51  ;;  %2774 = vmatpush.bf16.msra.mxu0 %v3868_v50  ;;  %2732 = vmatpush.bf16.msrb.mxu2 %v3772_v57  ;;  %v3739_v50 = vld [vmem:[#allocation20 + $0x10] sm:$0xf]  ;;  %v4172_v51 = vld [vmem:[#allocation20 + $0x14] sm:$0xf0]  ;;  %v3784_v44 = vor.u32 %v4181_v39, %v3781_v40 }
 0x345   : > { %2751 = vmatpush.bf16.msrb.mxu3 %v3836_v61  ;;  %v3803_v52 = vld [vmem:[#allocation20 + $0x90] sm:$0xf]  ;;  %v3740_v54 = vor.u32 %v4172_v51, %v3739_v50  ;;  %v3957_v61 = vld [vmem:[#allocation20 + $0x1c8] sm:$0xf0] }
 0x346   : > { %2793 = vmatpush.bf16.msra.mxu1 %v3932_v53  ;;  %v3804_v58 = vor.u32 %v4188_v55, %v3803_v52 }
 0x348   : > { %2733 = vmatpush.bf16.msrb.mxu2 %v3764_v5 }
 0x349   : > { %2752 = vmatpush.bf16.msrb.mxu3 %v3828_v10 }
 0x34a   : > { %2794 = vmatpush.bf16.msra.mxu1 %v3924_v1  ;;  %v3731_v1 = vld [vmem:[#allocation20] sm:$0xf] }
 0x34b   : > { %v3732_v5 = vor.u32 %v4170_v2, %v3731_v1 }
 0x34c   : > { %2734 = vmatpush.bf16.msrb.mxu2 %v3756_v20  ;;  %v3789_v20 = vld [vmem:[#allocation20 + $0x78] sm:$0xf0] }
 0x34d   : > { %2753 = vmatpush.bf16.msrb.mxu3 %v3820_v26  ;;  %v3853_v26 = vld [vmem:[#allocation20 + $0xf8] sm:$0xf0] }
 0x34e   : > { %2863 = vmatpush.bf16.msrb.mxu1 %v3984_v16 }
 0x350   : > { %2735 = vmatpush.bf16.msrb.mxu2 %v3748_v37 }
 0x351   : > { %2754 = vmatpush.bf16.msrb.mxu3 %v3812_v41  ;;  %v4197_v41 = vld [vmem:[#allocation20 + $0xe4] sm:$0xf] }
 0x352   : > { %2864 = vmatpush.bf16.msrb.mxu1 %v3976_v32  ;;  %v3792_v32 = vor.u32 %v4183_v19, %v3789_v20  ;;  %v4193_v20 = vld [vmem:[#allocation20 + $0xc4] sm:$0xf] }
 0x353   : > { %2262 = vmatmul.bf16.gmra.mxu2 %v2069_v60  ;;  %2300 = vmatmul.bf16.gmra.mxu0 %v2069_v60  ;;  %v4202_v60 = vld [vmem:[#allocation20 + $0x104] sm:$0xf0] }
 0x354   : > { %v3860_v62 = vor.u32 %v4202_v60, %v3859_v59  ;;  %v3893_v59 = vld [vmem:[#allocation20 + $0x148] sm:$0xf0]  ;;  %v4225_v60 = vld [vmem:[#allocation20 + $0x1c4] sm:$0xf]  ;;  %2736 = vmatpush.bf16.msrb.mxu2 %v3740_v54  ;;  %v3933_v54 = vld [vmem:[#allocation20 + $0x198] sm:$0xf0] }
 0x355   : > { %v3896_v63 = vor.u32 %v4209_v56, %v3893_v59  ;;  %v3960_v0 = vor.u32 %v4225_v60, %v3957_v61  ;;  %2755 = vmatpush.bf16.msrb.mxu3 %v3804_v58  ;;  %v4179_v56 = vld [vmem:[#allocation20 + $0x54] sm:$0xf]  ;;  %v3837_v60 = vld [vmem:[#allocation20 + $0xd8] sm:$0xf0]  ;;  %v4201_v61 = vld [vmem:[#allocation20 + $0x104] sm:$0xf] }
 0x356   : > { %2775 = vmatpush.bf16.msra.mxu0 %v3860_v62  ;;  %2865 = vmatpush.bf16.msrb.mxu1 %v3968_v45  ;;  %v3845_v45 = vld [vmem:[#allocation20 + $0xe8] sm:$0xf0]  ;;  %v4195_v58 = vld [vmem:[#allocation20 + $0xd4] sm:$0xf] }
 0x357   : > { %v3848_v51 = vor.u32 %v4197_v41, %v3845_v45 }
 0x358   : > { %2737 = vmatpush.bf16.msrb.mxu2 %v3732_v5  ;;  %v3861_v5 = vld [vmem:[#allocation20 + $0x108] sm:$0xf0] }
 0x35a   : > { %2844 = vmatpush.bf16.msrb.mxu0 %v3920_v12  ;;  %2866 = vmatpush.bf16.msrb.mxu1 %v3960_v0  ;;  %v3796_v12 = vor.u32 %v4186_v6, %v3795_v3  ;;  %v3840_v3 = vor.u32 %v4195_v58, %v3837_v60  ;;  %v4217_v6 = vld [vmem:[#allocation20 + $0x184] sm:$0xf]  ;;  %v4171_v58 = vld [vmem:[#allocation20 + $0x14] sm:$0xf] }
 0x35b   : > { %v3928_v19 = vor.u32 %v4217_v6, %v3925_v7 }
 0x35c   : > { %2756 = vmatpush.bf16.msrb.mxu3 %v3796_v12  ;;  %2806 = vmatpush.bf16.msra.mxu2 %v3792_v32 }
 0x35e   : > { %2845 = vmatpush.bf16.msrb.mxu0 %v3912_v27  ;;  %2867 = vmatpush.bf16.msrb.mxu1 %v3952_v17  ;;  %v4205_v27 = vld [vmem:[#allocation20 + $0x124] sm:$0xf] }
 0x35f   : > { %v3880_v38 = vor.u32 %v4205_v27, %v3877_v34 }
 0x360   : > { %2807 = vmatpush.bf16.msra.mxu2 %v3784_v44  ;;  %v3757_v44 = vld [vmem:[#allocation20 + $0x38] sm:$0xf0] }
 0x362   : > { %2846 = vmatpush.bf16.msrb.mxu0 %v3904_v42  ;;  %2868 = vmatpush.bf16.msrb.mxu1 %v3944_v43  ;;  %v4175_v43 = vld [vmem:[#allocation20 + $0x34] sm:$0xf] }
 0x366   : > { %2847 = vmatpush.bf16.msrb.mxu0 %v3896_v63 }
 0x36a   : > { %2848 = vmatpush.bf16.msrb.mxu0 %v3888_v13 }
 0x36e   : > { %2849 = vmatpush.bf16.msrb.mxu0 %v3880_v38 }
 0x3ac   : > { %v5338_v9 = vpop.f32.mrf.mxu1 }
 0x3b2   : > { %v2277_v33 = vpop.f32.mrf.mxu3 }
 0x3b4   : > { %v2317_v46 = vpop.f32.mrf.mxu1 }
 0x3ba   : > { %v2279_v16 = vpop.f32.mrf.mxu3 }
 0x3bc   : > { %v5360_v28 = vpop.f32.mrf.mxu1 }
 0x3c0   : > { %v2296_v24 = vpop.f32.mrf.mxu0 }
 0x3c1   : > { %v2297_v47 = vadd.f32 %v2296_v24, %v5343_v30 }
 0x3c2   : > { %v2282_v63 = vpop.f32.mrf.mxu3 }
 0x3c3   : > { %v5352_v4 = vadd.f32 %v5338_v9, %v2297_v47  ;;  %v3869_v47 = vld [vmem:[#allocation20 + $0x118] sm:$0xf0] }
 0x3c4   : > { %v2322_v27 = vpop.f32.mrf.mxu1 }
 0x3c5   : > { %v2326_v22 = vmax.f32 %v5352_v4, 0.0 }
 0x3c6   : > { %v2258_v49 = vpop.f32.mrf.mxu2 }
 0x3c7   : > { %v2259_v53 = vadd.f32 %v2258_v49, %v5345_v31 }
 0x3c8   : > { %v2298_v57 = vpop.f32.mrf.mxu0 }
 0x3c9   : > { %v5349_v62 = vadd.f32 %v2277_v33, %v2259_v53  ;;  %v2299_v10 = vadd.f32 %v2298_v57, %v5343_v30  ;;  %v3856_v33 = vor.u32 %v4199_v21, %v3853_v26  ;;  %v4219_v53 = vld [vmem:[#allocation20 + $0x194] sm:$0xf]  ;;  %v3773_v57 = vld [vmem:[#allocation20 + $0x58] sm:$0xf0]  ;;  %v3829_v21 = vld [vmem:[#allocation20 + $0xc8] sm:$0xf0] }
 0x3ca   : > { %v3936_v55 = vor.u32 %v4219_v53, %v3933_v54  ;;  %v3776_v2 = vor.u32 %v4179_v56, %v3773_v57  ;;  %v2284_v45 = vpop.f32.mrf.mxu3 }
 0x3cb   : > { %v2325_v18 = vmax.f32 %v5349_v62, 0.0  ;;  %v5357_v23 = vadd.f32 %v2317_v46, %v2299_v10  ;;  %2825 = vmatpush.bf16.msra.mxu3 %v3856_v33  ;;  %v4203_v46 = vld [vmem:[#allocation20 + $0x114] sm:$0xf]  ;;  %v3832_v33 = vor.u32 %v4193_v20, %v3829_v21  ;;  %v3760_v62 = vor.u32 %v4175_v43, %v3757_v44  ;;  %v4185_v20 = vld [vmem:[#allocation20 + $0x84] sm:$0xf] }
 0x3cc   : > { %v3872_v52 = vor.u32 %v4203_v46, %v3869_v47  ;;  %2869 = vmatpush.bf16.msrb.mxu1 %v3936_v55  ;;  %2808 = vmatpush.bf16.msra.mxu2 %v3776_v2  ;;  %v3821_v46 = vld [vmem:[#allocation20 + $0xb8] sm:$0xf0]  ;;  %v4173_v47 = vld [vmem:[#allocation20 + $0x24] sm:$0xf]  ;;  %v3797_v21 = vld [vmem:[#allocation20 + $0x88] sm:$0xf0] }
 0x3cd   : > { %v2361_v42 = vpack.c.bf16 %v2326_v22, %v2325_v18  ;;  %v2328_v49 = vmax.f32 %v5357_v23, 0.0  ;;  %v2333_v36 = vrot.slane %v2325_v18, 4  ;;  %v4191_v18 = vld [vmem:[#allocation20 + $0xb4] sm:$0xf]  ;;  %v4043_v43 = vld [vmem:[#allocation22 + $0x70] sm:$0xf] }
 0x3ce   : > { %v2260_v9 = vpop.f32.mrf.mxu2  ;;  %2850 = vmatpush.bf16.msrb.mxu0 %v3872_v52  ;;  %v3813_v52 = vld [vmem:[#allocation20 + $0xa8] sm:$0xf0]  ;;  %v3824_v54 = vor.u32 %v4191_v18, %v3821_v46  ;;  %v4248_v44 = vld [vmem:[#allocation22 + $0x74] sm:$0xf0]  ;;  %v4045_v18 = vld [vmem:[#allocation22 + $0x78] sm:$0xf0] }
 0x3cf   : > { %v2261_v24 = vadd.f32 %v2260_v9, %v5345_v31  ;;  %v2389_v0 = vunpack.c.l.b16 %v2361_v42  ;;  %2826 = vmatpush.bf16.msra.mxu3 %v3848_v51  ;;  %v2390_v8 = vunpack.c.h.b16 %v2361_v42  ;;  %v3864_v9 = vor.u32 %v4201_v61, %v3861_v5  ;;  %v4189_v51 = vld [vmem:[#allocation20 + $0xa4] sm:$0xf]  ;;  %v4035_v46 = vld [vmem:[#allocation22 + $0x60] sm:$0xf] }
 0x3d0   : > { %v2301_v29 = vpop.f32.mrf.mxu0  ;;  %2870 = vmatpush.bf16.msrb.mxu1 %v3928_v19  ;;  %v3816_v60 = vor.u32 %v4189_v51, %v3813_v52  ;;  %v4037_v51 = vld [vmem:[#allocation22 + $0x68] sm:$0xf0] }
 0x3d1   : > { %v5362_v37 = vadd.f32 %v2279_v16, %v2261_v24  ;;  %v2302_v13 = vadd.f32 %v2301_v29, %v5343_v30  ;;  %v3768_v29 = vor.u32 %v4177_v14, %v3765_v15 }
 0x3d2   : > { %2851 = vmatpush.bf16.msrb.mxu0 %v3864_v9 }
 0x3d3   : > { %v2327_v50 = vmax.f32 %v5362_v37, 0.0  ;;  %2827 = vmatpush.bf16.msra.mxu3 %v3840_v3  ;;  %v5380_v34 = vadd.f32 %v5360_v28, %v2302_v13  ;;  %v5386_v37 = vrot.slane %v2328_v49, 4  ;;  %2809 = vmatpush.bf16.msra.mxu2 %v3768_v29  ;;  %v3733_v13 = vld [vmem:[#allocation20 + $0x8] sm:$0xf0] }
 0x3d5   : > { %v2362_v59 = vpack.c.bf16 %v2328_v49, %v2327_v50  ;;  %v5388_v38 = vrot.slane %v2327_v50, 4  ;;  %v2330_v28 = vmax.f32 %v5380_v34, 0.0  ;;  %v3749_v50 = vld [vmem:[#allocation20 + $0x28] sm:$0xf0]  ;;  %v4243_v34 = vld [vmem:[#allocation22 + $0x54] sm:$0xf] }
 0x3d6   : > { %v2263_v1 = vpop.f32.mrf.mxu2  ;;  %v3752_v55 = vor.u32 %v4173_v47, %v3749_v50  ;;  %v4246_v47 = vld [vmem:[#allocation22 + $0x64] sm:$0xf0]  ;;  %v4245_v50 = vld [vmem:[#allocation22 + $0x64] sm:$0xf] }
 0x3d7   : > { %v2391_v10 = vunpack.c.l.b16 %v2362_v59  ;;  %v2392_v12 = vunpack.c.h.b16 %v2362_v59  ;;  %v2264_v16 = vadd.f32 %v2263_v1, %v5345_v31  ;;  %2828 = vmatpush.bf16.msra.mxu3 %v3832_v33  ;;  %2810 = vmatpush.bf16.msra.mxu2 %v3760_v62  ;;  %v2345_v56 = vsel %vm2035_vm4, %v2333_v36, %v5388_v38  ;;  %v3741_v59 = vld [vmem:[#allocation20 + $0x18] sm:$0xf0] }
 0x3d8   : > { %v2303_v17 = vpop.f32.mrf.mxu0  ;;  %v3805_v1 = vld [vmem:[#allocation20 + $0x98] sm:$0xf0]  ;;  %v3744_v5 = vor.u32 %v4171_v58, %v3741_v59  ;;  %v4044_v62 = vor.u32 %v4248_v44, %v4043_v43  ;;  %v4036_v52 = vor.u32 %v4246_v47, %v4035_v46  ;;  %v3989_v43 = vld [vmem:[#allocation22 + $0x8] sm:$0xf0] }
 0x3d9   : > { %v2304_v23 = vadd.f32 %v2303_v17, %v5343_v30  ;;  %v5373_v24 = vpack.c.b16 %v2391_v10, %v2389_v0  ;;  %v5375_v26 = vpack.c.b16 %v2392_v12, %v2390_v8  ;;  %v5377_v32 = vadd.f32 %v2282_v63, %v2264_v16  ;;  %v4169_v12 = vld [vmem:[#allocation20 + $0x4] sm:$0xf] }
 0x3db   : > { %v2323_v35 = vadd.f32 %v2322_v27, %v2304_v23  ;;  %2776 = vmatmul.bf16.vlgmr.msra.gmra.mxu0 %v5373_v24  ;;  %2795 = vmatmul.bf16.vlgmr.msra.gmra.mxu1 %v5375_v26  ;;  %v2329_v39 = vmax.f32 %v5377_v32, 0.0  ;;  %v3736_v23 = vor.u32 %v4169_v12, %v3733_v13  ;;  %v2338_v32 = vrot.slane %v2330_v28, 4  ;;  %v4013_v12 = vld [vmem:[#allocation22 + $0x38] sm:$0xf0]  ;;  %v4003_v13 = vld [vmem:[#allocation22 + $0x20] sm:$0xf] }
 0x3dc   : > { %2829 = vmatpush.bf16.msra.mxu3 %v3824_v54  ;;  %2811 = vmatpush.bf16.msra.mxu2 %v3752_v55  ;;  %v4027_v54 = vld [vmem:[#allocation22 + $0x50] sm:$0xf]  ;;  %v4244_v55 = vld [vmem:[#allocation22 + $0x54] sm:$0xf0] }
 0x3dd   : > { %v2332_v30 = vmax.f32 %v2323_v35, 0.0  ;;  %v2363_v53 = vpack.c.bf16 %v2330_v28, %v2329_v39  ;;  %v4029_v28 = vld [vmem:[#allocation22 + $0x58] sm:$0xf0]  ;;  %v2344_v58 = vsel %vm2035_vm4, %v5386_v37, %v2338_v32  ;;  %v4028_v59 = vor.u32 %v4244_v55, %v4027_v54 }
 0x3de   : > { %v2265_v40 = vpop.f32.mrf.mxu2 }
 0x3df   : > { %v5392_v41 = vrot.slane %v2332_v30, 4  ;;  %v2266_v42 = vadd.f32 %v2265_v40, %v5345_v31  ;;  %v2334_v31 = vrot.slane %v2326_v22, 4  ;;  %v4187_v22 = vld [vmem:[#allocation20 + $0x94] sm:$0xf]  ;;  %v2393_v3 = vunpack.c.l.b16 %v2363_v53 }
 0x3e0   : > { %v2394_v8 = vunpack.c.h.b16 %v2363_v53  ;;  %2830 = vmatpush.bf16.msra.mxu3 %v3816_v60  ;;  %v3808_v16 = vor.u32 %v4187_v22, %v3805_v1  ;;  %2812 = vmatpush.bf16.msra.mxu2 %v3744_v5  ;;  %v4040_v53 = vor.u32 %v4245_v50, %v4037_v51  ;;  %v4241_v22 = vld [vmem:[#allocation22 + $0x44] sm:$0xf]  ;;  %v4021_v1 = vld [vmem:[#allocation22 + $0x48] sm:$0xf0] }
 0x3e1   : > { %v2285_v49 = vadd.f32 %v2284_v45, %v2266_v42  ;;  %v2346_v61 = vsel %vm2035_vm4, %v2334_v31, %v5386_v37  ;;  %v2348_v63 = vsel %vm2035_vm4, %v5392_v41, %v2334_v31  ;;  %v2337_v42 = vrot.slane %v2329_v39, 4  ;;  %v4247_v45 = vld [vmem:[#allocation22 + $0x74] sm:$0xf] }
 0x3e2   : > { %v2358_v2 = vpack.c.bf16 %v2346_v61, %v2345_v56  ;;  %v2350_v14 = vsel %vm2027_vm5, %v2348_v63, 0.0  ;;  %v2342_v31 = vsel %vm2035_vm4, %v2338_v32, %v5392_v41  ;;  %v4019_v61 = vld [vmem:[#allocation22 + $0x40] sm:$0xf]  ;;  %v4242_v63 = vld [vmem:[#allocation22 + $0x44] sm:$0xf0]  ;;  %v4024_v37 = vor.u32 %v4241_v22, %v4021_v1 }
 0x3e3   : > { %v2331_v57 = vmax.f32 %v2285_v49, 0.0  ;;  %v4048_v49 = vor.u32 %v4247_v45, %v4045_v18  ;;  %v2343_v56 = vsel %vm2035_vm4, %v5388_v38, %v2337_v42  ;;  %v4020_v38 = vor.u32 %v4242_v63, %v4019_v61 }
 0x3e4   : > { %v2371_v29 = vunpack.c.l.b16 %v2358_v2  ;;  %v2372_v35 = vunpack.c.h.b16 %v2358_v2  ;;  %2831 = vmatpush.bf16.msra.mxu3 %v3808_v16  ;;  %2813 = vmatpush.bf16.msra.mxu2 %v3736_v23  ;;  %v2359_v60 = vpack.c.bf16 %v2344_v58, %v2343_v56  ;;  %v4235_v23 = vld [vmem:[#allocation22 + $0x14] sm:$0xf] }
 0x3e5   : > { %v2339_v0 = vrot.slane %v2331_v57, 4  ;;  %v2364_v4 = vpack.c.bf16 %v2332_v30, %v2331_v57  ;;  %v3800_v30 = vor.u32 %v4185_v20, %v3797_v21  ;;  %v4236_v20 = vld [vmem:[#allocation22 + $0x14] sm:$0xf0] }
 0x3e6   : > { %v2373_v2 = vunpack.c.l.b16 %v2359_v60  ;;  %v2374_v11 = vunpack.c.h.b16 %v2359_v60 }
 0x3e7   : > { %v2347_v6 = vsel %vm2035_vm4, %v2339_v0, %v2333_v36  ;;  %v2395_v7 = vunpack.c.l.b16 %v2364_v4  ;;  %v2396_v10 = vunpack.c.h.b16 %v2364_v4  ;;  %v2341_v39 = vsel %vm2035_vm4, %v2337_v42, %v2339_v0  ;;  %v4233_v42 = vld [vmem:[#allocation22 + $0x4] sm:$0xf] }
 0x3e8   : > { %v2349_v15 = vsel %vm2027_vm5, %v2347_v6, 0.0  ;;  %2832 = vmatpush.bf16.msra.mxu3 %v3800_v30  ;;  %v2360_v57 = vpack.c.bf16 %v2342_v31, %v2341_v39  ;;  %v4032_v0 = vor.u32 %v4243_v34, %v4029_v28  ;;  %v4011_v6 = vld [vmem:[#allocation22 + $0x30] sm:$0xf]  ;;  %v3992_v45 = vor.u32 %v4233_v42, %v3989_v43  ;;  %v2009_v31 = vld [vmem:[%s5590_s19] sm:$0x3]  ;;  %s4839_s19 = scalar_lea.hbm %s5592_s23, 64 }
 0x3e9   : > { %v5416_v17 = vpack.c.b16 %v2395_v7, %v2393_v3  ;;  %v5418_v9 = vpack.c.b16 %v2396_v10, %v2394_v8  ;;  %v2357_v19 = vpack.c.bf16 %v2350_v14, %v2349_v15  ;;  %v4240_v7 = vld [vmem:[#allocation22 + $0x34] sm:$0xf0]  ;;  %v4239_v8 = vld [vmem:[#allocation22 + $0x34] sm:$0xf]  ;;  %v4238_v14 = vld [vmem:[#allocation22 + $0x24] sm:$0xf0]  ;;  %p4841_p7 = scmp.lt.s32.totalorder %s4839_s19, %s4835_s18 }
 0x3ea   : > { %v2375_v4 = vunpack.c.l.b16 %v2360_v57  ;;  %v2376_v41 = vunpack.c.h.b16 %v2360_v57  ;;  %v4012_v10 = vor.u32 %v4240_v7, %v4011_v6  ;;  %v4237_v15 = vld [vmem:[#allocation22 + $0x24] sm:$0xf]  ;;  %v4004_v16 = vor.u32 %v4238_v14, %v4003_v13 }
 0x3eb   : > { %2781 = vmatmul.bf16.gmra.mxu0 %v5416_v17  ;;  %2800 = vmatmul.bf16.gmra.mxu1 %v5418_v9  ;;  %v2369_v27 = vunpack.c.l.b16 %v2357_v19  ;;  %v2370_v33 = vunpack.c.h.b16 %v2357_v19  ;;  %v3995_v19 = vld [vmem:[#allocation22 + $0x10] sm:$0xf]  ;;  %v2406_v57 = vperm.slane %v2009_v31, 0  ;;  %v2407_v34 = vperm.slane %v2009_v31, 1  ;;  %p4842_p8 = por %p4841_p7, %p4840_p12 }
 0x3ec   : > { %v2379_v3 = vpack.c.b16 %v2375_v4, %v2373_v2  ;;  %v2380_v5 = vpack.c.b16 %v2376_v41, %v2374_v11 }
 0x3ed   : > { %v5422_v36 = vpack.c.b16 %v2371_v29, %v2369_v27  ;;  %v5424_v40 = vpack.c.b16 %v2372_v35, %v2370_v33  ;;  %v3997_v27 = vld [vmem:[#allocation22 + $0x18] sm:$0xf0]  ;;  %v3996_v29 = vor.u32 %v4236_v20, %v3995_v19  ;;  %v3987_v33 = vld [vmem:[#allocation22] sm:$0xf]  ;;  %v4234_v35 = vld [vmem:[#allocation22 + $0x4] sm:$0xf0]  ;;  %p4843_p9 = pnand %p4842_p8, %p4838_p5 }
 0x3ee   : > { %v4000_v30 = vor.u32 %v4235_v23, %v3997_v27  ;;  %v3988_v44 = vor.u32 %v4234_v35, %v3987_v33 }
 0x3ef   : > { %2738 = vmatmul.bf16.vlgmr.msrb.gmra.mxu2 %v5422_v36  ;;  %2757 = vmatmul.bf16.vlgmr.msrb.gmra.mxu3 %v5424_v40 }
 0x3f0   : > { %2975 = vmatpush.bf16.msrb.mxu2 %v4044_v62  ;;  %2994 = vmatpush.bf16.msrb.mxu3 %v4048_v49 }
 0x3f4   : > { %2976 = vmatpush.bf16.msrb.mxu2 %v4036_v52  ;;  %2995 = vmatpush.bf16.msrb.mxu3 %v4040_v53 }
 0x3f8   : > { %2977 = vmatpush.bf16.msrb.mxu2 %v4028_v59  ;;  %2996 = vmatpush.bf16.msrb.mxu3 %v4032_v0 }
 0x3fb   : > { %2852 = vmatmul.bf16.vlgmr.msrb.gmra.mxu0 %v5373_v24  ;;  %2871 = vmatmul.bf16.vlgmr.msrb.gmra.mxu1 %v5375_v26  ;;  %v4016_v24 = vor.u32 %v4239_v8, %v4013_v12  ;;  %v4005_v26 = vld [vmem:[#allocation22 + $0x28] sm:$0xf0] }
 0x3fc   : > { %2978 = vmatpush.bf16.msrb.mxu2 %v4020_v38  ;;  %2997 = vmatpush.bf16.msrb.mxu3 %v4024_v37  ;;  %v4008_v21 = vor.u32 %v4237_v15, %v4005_v26  ;;  %v2026_v37 = vld [vmem:[%s5591_s15] sm:$0x3] }
 0x3fd   : > { %v5469_v12 = vperm.slane %v2026_v37, 1 }
 0x3ff   : > { %2743 = vmatmul.bf16.gmra.mxu2 %v2379_v3  ;;  %2762 = vmatmul.bf16.gmra.mxu3 %v2380_v5 }
 0x400   : > { %2979 = vmatpush.bf16.msrb.mxu2 %v4012_v10  ;;  %2998 = vmatpush.bf16.msrb.mxu3 %v4016_v24  ;;  %v5467_v10 = vperm.slane %v2026_v37, 0 }
 0x404   : > { %2980 = vmatpush.bf16.msrb.mxu2 %v4004_v16  ;;  %2999 = vmatpush.bf16.msrb.mxu3 %v4008_v21 }
 0x408   : > { %2981 = vmatpush.bf16.msrb.mxu2 %v3996_v29  ;;  %3000 = vmatpush.bf16.msrb.mxu3 %v4000_v30 }
 0x40b   : > { %2857 = vmatmul.bf16.gmra.mxu0 %v5416_v17  ;;  %2876 = vmatmul.bf16.gmra.mxu1 %v5418_v9 }
 0x40c   : > { %2982 = vmatpush.bf16.msrb.mxu2 %v3988_v44  ;;  %3001 = vmatpush.bf16.msrb.mxu3 %v3992_v45 }
 0x40f   : > { %2814 = vmatmul.bf16.vlgmr.msra.gmra.mxu2 %v5422_v36  ;;  %2833 = vmatmul.bf16.vlgmr.msra.gmra.mxu3 %v5424_v40 }
 0x41f   : > { %2819 = vmatmul.bf16.gmra.mxu2 %v2379_v3  ;;  %2838 = vmatmul.bf16.gmra.mxu3 %v2380_v5 }
 0x42f   : > { %2983 = vmatmul.bf16.vlgmr.msrb.gmra.mxu2 %v5318_v25  ;;  %3002 = vmatmul.bf16.vlgmr.msrb.gmra.mxu3 %v5318_v25 }
 0x43f   : > { %2988 = vmatmul.bf16.gmra.mxu2 %v5330_v48  ;;  %3007 = vmatmul.bf16.gmra.mxu3 %v5330_v48 }
 0x458   : > { %v2777_v46 = vpop.f32.mrf.mxu0  ;;  %v2796_v47 = vpop.f32.mrf.mxu1 }
 0x460   : > { %v2779_v40 = vpop.f32.mrf.mxu0  ;;  %v2798_v50 = vpop.f32.mrf.mxu1 }
 0x468   : > { %v2782_v39 = vpop.f32.mrf.mxu0  ;;  %v5455_v53 = vpop.f32.mrf.mxu1 }
 0x470   : > { %v5457_v54 = vpop.f32.mrf.mxu0  ;;  %v5462_v56 = vpop.f32.mrf.mxu1 }
 0x472   : > { %v2739_v17 = vpop.f32.mrf.mxu2  ;;  %v2758_v9 = vpop.f32.mrf.mxu3 }
 0x473   : > { %v2740_v28 = vadd.f32 %v2739_v17, %v2406_v57 }
 0x475   : > { %v2759_v63 = vadd.f32 %v2758_v9, %v2740_v28 }
 0x477   : > { %v2778_v41 = vadd.f32 %v2777_v46, %v2759_v63 }
 0x478   : > { %v2853_v60 = vpop.f32.mrf.mxu0  ;;  %v2872_v0 = vpop.f32.mrf.mxu1 }
 0x479   : > { %v2797_v5 = vadd.f32 %v2796_v47, %v2778_v41 }
 0x47a   : > { %v2741_v62 = vpop.f32.mrf.mxu2  ;;  %v2760_v18 = vpop.f32.mrf.mxu3 }
 0x47b   : > { %v2742_v22 = vadd.f32 %v2741_v62, %v2406_v57  ;;  %v2882_v26 = vmax.f32 %v2797_v5, 0.0 }
 0x47d   : > { %v2761_v6 = vadd.f32 %v2760_v18, %v2742_v22 }
 0x47f   : > { %v2780_v14 = vadd.f32 %v2779_v40, %v2761_v6 }
 0x480   : > { %v2855_v3 = vpop.f32.mrf.mxu0  ;;  %v2874_v13 = vpop.f32.mrf.mxu1 }
 0x481   : > { %v2799_v35 = vadd.f32 %v2798_v50, %v2780_v14 }
 0x482   : > { %v2744_v36 = vpop.f32.mrf.mxu2  ;;  %v2763_v49 = vpop.f32.mrf.mxu3 }
 0x483   : > { %v2745_v24 = vadd.f32 %v2744_v36, %v2406_v57  ;;  %v2884_v46 = vmax.f32 %v2799_v35, 0.0 }
 0x485   : > { %v2764_v30 = vadd.f32 %v2763_v49, %v2745_v24 }
 0x487   : > { %v2783_v62 = vadd.f32 %v2782_v39, %v2764_v30 }
 0x488   : > { %v2858_v43 = vpop.f32.mrf.mxu0 }
 0x48a   : > { %v2746_v51 = vpop.f32.mrf.mxu2  ;;  %v5453_v32 = vpop.f32.mrf.mxu3 }
 0x48b   : > { %v2747_v18 = vadd.f32 %v2746_v51, %v2406_v57  ;;  %v2802_v51 = vadd.f32 %v5455_v53, %v2783_v62 }
 0x48d   : > { %v2766_v39 = vadd.f32 %v5453_v32, %v2747_v18  ;;  %v2886_v63 = vmax.f32 %v2802_v51, 0.0 }
 0x492   : > { %v2815_v52 = vpop.f32.mrf.mxu2  ;;  %v2834_v25 = vpop.f32.mrf.mxu3 }
 0x493   : > { %v2816_v61 = vadd.f32 %v2815_v52, %v2407_v34 }
 0x495   : > { %v2835_v4 = vadd.f32 %v2834_v25, %v2816_v61  ;;  %v2785_v61 = vadd.f32 %v5457_v54, %v2766_v39 }
 0x497   : > { %v2854_v11 = vadd.f32 %v2853_v60, %v2835_v4 }
 0x499   : > { %v2873_v8 = vadd.f32 %v2872_v0, %v2854_v11  ;;  %v2804_v11 = vadd.f32 %v5462_v56, %v2785_v61 }
 0x49a   : > { %v2817_v48 = vpop.f32.mrf.mxu2  ;;  %v2836_v55 = vpop.f32.mrf.mxu3 }
 0x49b   : > { %v2818_v1 = vadd.f32 %v2817_v48, %v2407_v34  ;;  %v2883_v23 = vmax.f32 %v2873_v8, 0.0  ;;  %v2877_v48 = vpop.f32.mrf.mxu1  ;;  %v2888_v8 = vmax.f32 %v2804_v11, 0.0 }
 0x49d   : > { %v2837_v7 = vadd.f32 %v2836_v55, %v2818_v1 }
 0x49f   : > { %v2856_v15 = vadd.f32 %v2855_v3, %v2837_v7 }
 0x4a1   : > { %v2875_v42 = vadd.f32 %v2874_v13, %v2856_v15 }
 0x4a2   : > { %v2820_v58 = vpop.f32.mrf.mxu2  ;;  %v2839_v59 = vpop.f32.mrf.mxu3 }
 0x4a3   : > { %v2821_v20 = vadd.f32 %v2820_v58, %v2407_v34  ;;  %v2885_v36 = vmax.f32 %v2875_v42, 0.0 }
 0x4a5   : > { %v2840_v44 = vadd.f32 %v2839_v59, %v2821_v20  ;;  %v2860_v59 = vpop.f32.mrf.mxu0 }
 0x4a7   : > { %v2859_v52 = vadd.f32 %v2858_v43, %v2840_v44 }
 0x4a9   : > { %v2878_v57 = vadd.f32 %v2877_v48, %v2859_v52 }
 0x4aa   : > { %v2822_v38 = vpop.f32.mrf.mxu2  ;;  %v2841_v2 = vpop.f32.mrf.mxu3 }
 0x4ab   : > { %v2823_v25 = vadd.f32 %v2822_v38, %v2407_v34  ;;  %v2887_v53 = vmax.f32 %v2878_v57, 0.0 }
 0x4ad   : > { %v2842_v28 = vadd.f32 %v2841_v2, %v2823_v25  ;;  %v2879_v2 = vpop.f32.mrf.mxu1 }
 0x4af   : > { %v2861_v41 = vadd.f32 %v2860_v59, %v2842_v28 }
 0x4b1   : > { %v2880_v37 = vadd.f32 %v2879_v2, %v2861_v41 }
 0x4b2   : > { %v2984_v16 = vpop.f32.mrf.mxu2  ;;  %v3003_v19 = vpop.f32.mrf.mxu3 }
 0x4b3   : > { %v2985_v21 = vadd.f32 %v2984_v16, %v5467_v10  ;;  %v3004_v27 = vadd.f32 %v3003_v19, %v5469_v12  ;;  %v2889_v14 = vmax.f32 %v2880_v37, 0.0 }
 0x4b5   : > { %v3013_v29 = vadd.f32 %v2985_v21, %v2882_v26  ;;  %v3014_v33 = vadd.f32 %v3004_v27, %v2883_v23 }
 0x4b7   : > { %v3021_v45 = vmax.f32 %v3013_v29, 0.0  ;;  %v3022_v17 = vmax.f32 %v3014_v33, 0.0 }
 0x4b9   : > { %v3029_v9 = vpack.c.bf16 %v3022_v17, %v3021_v45 }
 0x4ba   : > { %v2986_v47 = vpop.f32.mrf.mxu2  ;;  %v3005_v40 = vpop.f32.mrf.mxu3 }
 0x4bb   : > { %3033 = vst [vmem:[%s5474_s6] sm:$0xff] %v3029_v9  ;;  %v2987_v49 = vadd.f32 %v2986_v47, %v5467_v10  ;;  %v3006_v50 = vadd.f32 %v3005_v40, %v5469_v12 }
 0x4bd   : > { %v3015_v55 = vadd.f32 %v2987_v49, %v2884_v46  ;;  %v3016_v31 = vadd.f32 %v3006_v50, %v2885_v36 }
 0x4bf   : > { %v3023_v58 = vmax.f32 %v3015_v55, 0.0  ;;  %v3024_v34 = vmax.f32 %v3016_v31, 0.0 }
 0x4c1   : > { %v3030_v60 = vpack.c.bf16 %v3024_v34, %v3023_v58 }
 0x4c2   : > { %v2989_v0 = vpop.f32.mrf.mxu2  ;;  %v3008_v4 = vpop.f32.mrf.mxu3 }
 0x4c3   : > { %3034 = vst [vmem:[%s5474_s6 + $0x8] sm:$0xff] %v3030_v60  ;;  %v2990_v22 = vadd.f32 %v2989_v0, %v5467_v10  ;;  %v3009_v32 = vadd.f32 %v3008_v4, %v5469_v12 }
 0x4c5   : > { %v3017_v1 = vadd.f32 %v2990_v22, %v2886_v63  ;;  %v3018_v38 = vadd.f32 %v3009_v32, %v2887_v53 }
 0x4c7   : > { %v3025_v54 = vmax.f32 %v3017_v1, 0.0  ;;  %v3026_v3 = vmax.f32 %v3018_v38, 0.0 }
 0x4c9   : > { %v3031_v5 = vpack.c.bf16 %v3026_v3, %v3025_v54 }
 0x4ca   : > { %v2991_v6 = vpop.f32.mrf.mxu2  ;;  %v3010_v7 = vpop.f32.mrf.mxu3 }
 0x4cb   : > { %3035 = vst [vmem:[%s5474_s6 + $0x10] sm:$0xff] %v3031_v5  ;;  %v2992_v13 = vadd.f32 %v2991_v6, %v5467_v10  ;;  %v3011_v24 = vadd.f32 %v3010_v7, %v5469_v12 }
 0x4cd   : > { %v3019_v56 = vadd.f32 %v2992_v13, %v2888_v8  ;;  %v3020_v15 = vadd.f32 %v3011_v24, %v2889_v14 }
 0x4cf   : > { %v3027_v26 = vmax.f32 %v3019_v56, 0.0  ;;  %v3028_v16 = vmax.f32 %v3020_v15, 0.0 }
 0x4d1   : > { %v3032_v19 = vpack.c.bf16 %v3028_v16, %v3027_v26 }
 0x4d3   : > { %3036 = vst [vmem:[%s5474_s6 + $0x18] sm:$0xff] %v3032_v19 }
 0x4d4   : > { %4846 = shalt.err (!%p4843_p9)
}
 0x4d5   : > { %s4927_s1 = smov 128   ;;  %s4928_s15 = smov 8  }
 0x4d6   : > { %4300 = dma.vmem_to_hbm [thread:$0]  (%p5183_p4), %s3051_s26, 512, %s3053_s24, %s3038_s3, %s4927_s1, %s4927_s1, %s4928_s15  }
 0x4d7 PF: > { %s3067_s28 = sand.u32 1, %s4897_s0   ;;  %p5593_p10 = scmp.ge.s32.totalorder %s4909_s21, 2 }
 0x4d8   : > { %s3068_s6 = scalar_lea.sflag [#allocation4], %s3067_s28 }
 0x4d9   : > { %p4344_p13 = pnand %p5593_p10, %p5187_p6 }
 0x4db   : > { %p4345_p11 = pneg %p4344_p13 }
 0x4dd   : > { %4892 = dma.done.wait (%p4345_p11), %s3068_s6, 512  }
 0x4de   : > { %4894 = vsyncadd (%p4345_p11), %s3068_s6, 4294966784  ;;  %p38_p0 = scmp.ge.s32.totalorder %s5157_s5, 4   ;;  %s5594_s0 = smov %s4901_s30 }
 0x4df   : > { %s5595_s30 = smov %s4905_s20  ;;  %s5596_s20 = smov %s5168_s16 }
 0x4e0   : > { %s5597_s21 = smov %s5157_s5  ;;  %40 = sbr.rel (!%p38_p0) target bundleno = 29 (0x1d), region = 189 }
 0x4e5   :  { %3074 = vsyncpa [#allocation3], 1 }
 0x4e6   :  { %3076 = vsyncpa [#allocation3 + $0x1], 1 }
 0x4e7   :  { %3077 = vsyncpa [#allocation6], 1 }
 0x4e8   :  { %3078 = vsyncpa [#allocation9], 1 }
 0x4e9   :  { %3079 = vsyncpa [#allocation12], 1 }
 0x4ea   :  { %3080 = vsyncpa [#allocation15], 1 }
 0x4eb   :  { %3081 = vsyncpa [#allocation18], 1 }
 0x4ec   :  { %3082 = vsyncpa [#allocation21], 1 }
 0x4ed   :  { %3083 = vsyncpa [#allocation4], 1 }
 0x4ee   :  { %3085 = vsyncpa [#allocation4 + $0x1], 1 }

// kernel: tpu_custom_call.1
= control target key start
LH: loop header
LB: loop body
LE: loop exit
PB: predicated region body
PF: predicated region fallthrough
CT: control target
= control target key end

     0   :  { %s5524_s0 = inlined_call_operand.hbm [shape: bf16[2,32,128], index: 0, kind: input, shape index: {}]   ;;  %s5525_s1 = inlined_call_operand.hbm [shape: bf16[256,128], index: 1, kind: input, shape index: {}]   ;;  %s5526_s2 = inlined_call_operand.hbm [shape: f32[1,128], index: 2, kind: input, shape index: {}]   ;;  %s5527_s3 = inlined_call_operand.hbm [shape: bf16[256,128], index: 3, kind: input, shape index: {}]   ;;  %s5528_s4 = inlined_call_operand.hbm [shape: f32[1,128], index: 4, kind: input, shape index: {}]   ;;  %s5529_s5 = inlined_call_operand.hbm [shape: bf16[128,128], index: 5, kind: input, shape index: {}]   ;;  %s5530_s6 = inlined_call_operand.hbm [shape: f32[1,128], index: 6, kind: input, shape index: {}]   ;;  %s5531_s7 = inlined_call_operand.hbm [shape: bf16[256,128], index: 7, kind: input, shape index: {}]   ;;  %s5532_s8 = inlined_call_operand.vmem [shape: f32[1,128], index: 8, kind: input, shape index: {}]   ;;  %s5533_s9 = inlined_call_operand.hbm [shape: bf16[256,128], index: 9, kind: input, shape index: {}]   ;;  %s5534_s10 = inlined_call_operand.vmem [shape: f32[1,128], index: 10, kind: input, shape index: {}]   ;;  %s5535_s11 = inlined_call_operand.hbm [shape: bf16[128,128], index: 11, kind: input, shape index: {}]   ;;  %s5536_s12 = inlined_call_operand.vmem [shape: f32[1,128], index: 12, kind: input, shape index: {}]   ;;  %s5537_s13 = inlined_call_operand.hbm [shape: bf16[256,256], index: 13, kind: input, shape index: {}]   ;;  %s5538_s14 = inlined_call_operand.vmem [shape: f32[1,256], index: 14, kind: input, shape index: {}]   ;;  %s5539_s15 = inlined_call_operand.hbm [shape: bf16[512,256], index: 15, kind: input, shape index: {}]   ;;  %s5540_s16 = inlined_call_operand.vmem [shape: f32[1,256], index: 16, kind: input, shape index: {}]   ;;  %s5541_s17 = inlined_call_operand.hbm [shape: bf16[128,256], index: 17, kind: input, shape index: {}]   ;;  %s5542_s18 = inlined_call_operand.vmem [shape: f32[1,256], index: 18, kind: input, shape index: {}]   ;;  %s5543_s19 = inlined_call_operand.hbm [shape: bf16[2,32,256], index: 19, kind: output, shape index: {}]  }
   0x1   :  { %5550 = sst [smem:[#allocation32_spill]] %s5524_s0 }
   0x2   :  { %5551 = sst [smem:[#allocation33_spill]] %s5525_s1 }
   0x3   :  { %5552 = sst [smem:[#allocation34_spill]] %s5526_s2 }
   0x4   :  { %5553 = sst [smem:[#allocation35_spill]] %s5527_s3 }
   0x5   :  { %5554 = sst [smem:[#allocation36_spill]] %s5528_s4 }
   0x6   :  { %5555 = sst [smem:[#allocation37_spill]] %s5529_s5 }
   0x7   :  { %5556 = sst [smem:[#allocation38_spill]] %s5530_s6 }
   0x8   :  { %5557 = sst [smem:[#allocation39_spill]] %s5531_s7 }
   0x9   :  { %5558 = sst [smem:[#allocation40_spill]] %s5533_s9 }
   0xa   :  { %5559 = sst [smem:[#allocation41_spill]] %s5535_s11 }
   0xb   :  { %5560 = sst [smem:[#allocation42_spill]] %s5536_s12 }
   0xc   :  { %5561 = sst [smem:[#allocation43_spill]] %s5537_s13 }
   0xd   :  { %5562 = sst [smem:[#allocation44_spill]] %s5538_s14 }
   0xe   :  { %5563 = sst [smem:[#allocation45_spill]] %s5539_s15 }
   0xf   :  { %5564 = sst [smem:[#allocation46_spill]] %s5540_s16 }
  0x10   :  { %5565 = sst [smem:[#allocation47_spill]] %s5542_s18 }
  0x11   :  { %5566 = sst [smem:[#allocation48_spill]] %s5543_s19 }
  0x12   :  { %24 = vsyncpa [#allocation3], 0 }
  0x13   :  { %26 = vsyncpa [#allocation3 + $0x1], 0 }
  0x14   :  { %27 = vsyncpa [#allocation6], 0 }
  0x15   :  { %28 = vsyncpa [#allocation9], 0 }
  0x16   :  { %29 = vsyncpa [#allocation12], 0 }
  0x17   :  { %30 = vsyncpa [#allocation15], 0 }
  0x18   :  { %31 = vsyncpa [#allocation18], 0 }
  0x19   :  { %32 = vsyncpa [#allocation21], 0 }
  0x1a   :  { %33 = vsyncpa [#allocation4], 0 }
  0x1b   :  { %35 = vsyncpa [#allocation4 + $0x1], 0  ;;  %s5029_s0 = smov 0   ;;  %s5031_s30 = smov 0  }
  0x1c   :  { %s5033_s20 = smov 0   ;;  %s5035_s21 = smov 0  }
  0x1d LB: > { %s5567_s2 = sld [smem:[#allocation33_spill]]  ;;  %s5053_s24 = sadd.s32 4294967295, %s4909_s21   ;;  %s4909_s21 = sphi %s5035_s21, %s5597_s21   ;;  %s4905_s20 = sphi %s5033_s20, %s5596_s20   ;;  %s4901_s30 = sphi %s5031_s30, %s5595_s30   ;;  %s4897_s0 = sphi %s5029_s0, %s5594_s0  }
  0x1e   : > { %p3241_p0 = scmp.ge.s32.totalorder %s4909_s21, 1  ;;  %p62_p1 = scmp.eq.s32.totalorder %s5053_s24, 0 }
  0x1f   : > { %p476_p2 = scmp.lt.s32.totalorder %s4909_s21, 3  ;;  %s4911_s3 = smov [#allocation5]  }
  0x20   : > { %s489_s26 = sshll.u32 %s4911_s3, 4  ;;  %s5569_s29 = sld [smem:[#allocation35_spill]]  ;;  %s490_s26 = int_to_ptr.vmem [resolvable:$true] %s489_s26 }
  0x21   : > { %p5058_p3 = pnand %p3241_p0, %p476_p2  ;;  %s5571_s5 = sld [smem:[#allocation37_spill]] }
  0x22   : > { %s4912_s18 = smov [#allocation8]   ;;  %s5546_s14 = smov 64  }
  0x23   : > { %s487_s23 = sshll.u32 %s5567_s2, 4  ;;  %p4302_p4 = pneg %p5058_p3  ;;  %s488_s23 = int_to_ptr.hbm [resolvable:$true] %s487_s23 }
  0x24   : > { %s515_s16 = sshll.u32 %s4912_s18, 4  ;;  %s5548_s12 = smov 4   ;;  %s516_s16 = int_to_ptr.vmem [resolvable:$true] %s515_s16 }
  0x25   : > { %p5070_p6 = pnand %p4302_p4, %p62_p1  ;;  %s5572_s7 = sld [smem:[#allocation39_spill]] }
  0x26   : > { %s513_s1 = sshll.u32 %s5569_s29, 4  ;;  %s4915_s18 = smov [#allocation11]   ;;  %s514_s1 = int_to_ptr.hbm [resolvable:$true] %s513_s1 }
  0x27   : > { %s539_s3 = sshll.u32 %s5571_s5, 4  ;;  %s541_s29 = sshll.u32 %s4915_s18, 4  ;;  %s540_s3 = int_to_ptr.hbm [resolvable:$true] %s539_s3  ;;  %s542_s29 = int_to_ptr.vmem [resolvable:$true] %s541_s29 }
  0x28   : > { %4305 = dma.hbm_to_vmem [thread:$0]  (!%p5070_p6), %s488_s23, 2048, %s490_s26, [#allocation6], %s5546_s14, %s5546_s14, %s5548_s12  }
  0x29   : > { %4311 = dma.hbm_to_vmem [thread:$0]  (!%p5070_p6), %s514_s1, 2048, %s516_s16, [#allocation9], %s5546_s14, %s5546_s14, %s5548_s12  }
  0x2a   : > { %4317 = dma.hbm_to_vmem [thread:$0]  (!%p5070_p6), %s540_s3, 1024, %s542_s29, [#allocation12], %s5546_s14, %s5546_s14, %s5548_s12  }
  0x2b   : > { %s565_s28 = sshll.u32 %s5572_s7, 4  ;;  %s4916_s23 = smov [#allocation14]   ;;  %s566_s28 = int_to_ptr.hbm [resolvable:$true] %s565_s28 }
  0x2c   : > { %s567_s26 = sshll.u32 %s4916_s23, 4  ;;  %s5573_s11 = sld [smem:[#allocation41_spill]]  ;;  %s568_s26 = int_to_ptr.vmem [resolvable:$true] %s567_s26 }
  0x2d   : > { %4323 = dma.hbm_to_vmem [thread:$0]  (!%p5070_p6), %s566_s28, 2048, %s568_s26, [#allocation15], %s5546_s14, %s5546_s14, %s5548_s12  }
  0x2e   : > { %s4917_s1 = smov [#allocation17]   ;;  %s5574_s15 = sld [smem:[#allocation45_spill]] }
  0x2f   : > { %s601_s27 = sshll.u32 %s4917_s1, 4  ;;  %s4918_s5 = smov [#allocation20]   ;;  %s602_s27 = int_to_ptr.vmem [resolvable:$true] %s601_s27 }
  0x30   : > { %s635_s29 = sshll.u32 %s4918_s5, 4  ;;  %s5575_s7 = sld [smem:[#allocation34_spill]]  ;;  %s636_s29 = int_to_ptr.vmem [resolvable:$true] %s635_s29 }
  0x31   : > { %s4919_s26 = smov 128   ;;  %s4920_s1 = smov 8  }
  0x32   : > { %s599_s16 = sshll.u32 %s5573_s11, 4  ;;  %s5576_s4 = sld [smem:[#allocation36_spill]]  ;;  %s600_s16 = int_to_ptr.hbm [resolvable:$true] %s599_s16 }
  0x33   : > { %4329 = dma.hbm_to_vmem [thread:$0]  (!%p5070_p6), %s600_s16, 1024, %s602_s27, [#allocation18], %s5546_s14, %s5546_s14, %s5548_s12  }
  0x34   : > { %s633_s3 = sshll.u32 %s5574_s15, 4  ;;  %s4921_s27 = smov [#allocation7]   ;;  %s634_s3 = int_to_ptr.hbm [resolvable:$true] %s633_s3 }
  0x35   : > { %4335 = dma.hbm_to_vmem [thread:$0]  (!%p5070_p6), %s634_s3, 8192, %s636_s29, [#allocation21], %s4919_s26, %s4919_s26, %s4920_s1  }
  0x36   : > { %s502_s28 = sshll.u32 %s5575_s7, 4  ;;  %s504_s5 = sshll.u32 %s4921_s27, 4  ;;  %s503_s28 = int_to_ptr.hbm [resolvable:$true] %s502_s28  ;;  %s505_s5 = int_to_ptr.vmem [resolvable:$true] %s504_s5 }
  0x37   : > { %4308 = dma.hbm_to_vmem [thread:$0]  (!%p5070_p6), %s503_s28, 16, %s505_s5, [#allocation6]  }
  0x38   : > { %s528_s16 = sshll.u32 %s5576_s4, 4  ;;  %s4922_s7 = smov [#allocation10]   ;;  %s529_s16 = int_to_ptr.hbm [resolvable:$true] %s528_s16 }
  0x39   : > { %s530_s23 = sshll.u32 %s4922_s7, 4  ;;  %s5577_s6 = sld [smem:[#allocation38_spill]]  ;;  %s531_s23 = int_to_ptr.vmem [resolvable:$true] %s530_s23 }
  0x3a   : > { %4314 = dma.hbm_to_vmem [thread:$0]  (!%p5070_p6), %s529_s16, 16, %s531_s23, [#allocation9]  }
  0x3b   : > { %s5578_s9 = sld [smem:[#allocation40_spill]]  ;;  %s4923_s18 = smov [#allocation13]  }
  0x3c   : > { %s556_s27 = sshll.u32 %s4923_s18, 4  ;;  %s4924_s28 = smov [#allocation16]   ;;  %s557_s27 = int_to_ptr.vmem [resolvable:$true] %s556_s27 }
  0x3d   : > { %s584_s14 = sshll.u32 %s4924_s28, 4  ;;  %s5579_s13 = sld [smem:[#allocation43_spill]]  ;;  %s585_s14 = int_to_ptr.vmem [resolvable:$true] %s584_s14 }
  0x3e   : > { %s5580_s23 = smov 4   ;;  %s5581_s2 = smov 64  }
  0x3f   : > { %s554_s12 = sshll.u32 %s5577_s6, 4  ;;  %s650_s29 = sshll.u32 %s5541_s17, 4  ;;  %s555_s12 = int_to_ptr.hbm [resolvable:$true] %s554_s12  ;;  %s651_s29 = int_to_ptr.hbm [resolvable:$true] %s650_s29 }
  0x40   : > { %4320 = dma.hbm_to_vmem [thread:$0]  (!%p5070_p6), %s555_s12, 16, %s557_s27, [#allocation12]  }
  0x41   : > { %s582_s19 = sshll.u32 %s5578_s9, 4  ;;  %s4925_s18 = smov [#allocation19]   ;;  %s583_s19 = int_to_ptr.hbm [resolvable:$true] %s582_s19 }
  0x42   : > { %4326 = dma.hbm_to_vmem [thread:$0]  (!%p5070_p6), %s583_s19, 2048, %s585_s14, [#allocation15], %s5581_s2, %s5581_s2, %s5580_s23  }
  0x43   : > { %s616_s16 = sshll.u32 %s5579_s13, 4  ;;  %s618_s27 = sshll.u32 %s4925_s18, 4  ;;  %s617_s16 = int_to_ptr.hbm [resolvable:$true] %s616_s16  ;;  %s619_s27 = int_to_ptr.vmem [resolvable:$true] %s618_s27 }
  0x44   : > { %4332 = dma.hbm_to_vmem [thread:$0]  (!%p5070_p6), %s617_s16, 4096, %s619_s27, [#allocation18], %s4919_s26, %s4919_s26, %s4920_s1  }
  0x45   : > { %s4926_s19 = smov [#allocation22]   ;;  %s3240_s14 = sadd.s32 4294967294, %s4909_s21  }
  0x46   : > { %s652_s28 = sshll.u32 %s4926_s19, 4  ;;  %s5157_s5 = sadd.s32 1, %s4909_s21   ;;  %s653_s28 = int_to_ptr.vmem [resolvable:$true] %s652_s28 }
  0x47   : > { %4338 = dma.hbm_to_vmem [thread:$0]  (!%p5070_p6), %s651_s29, 2048, %s653_s28, [#allocation21], %s4919_s26, %s4919_s26, %s4920_s1  }
  0x48   : > { %s45_s7 = ssub.s32 %s4909_s21, %s5157_s5  ;;  %s48_s3 = sadd.s32 1, %s4905_s20 }
  0x49   : > { %p46_p7 = scmp.eq.s32.totalorder %s45_s7, 0  ;;  %p55_p8 = scmp.ne.s32.totalorder %s4905_s20, %s4901_s30 }
  0x4a   : > { %p56_p9 = scmp.eq.s32.totalorder %s4909_s21, 0  ;;  %p61_p10 = scmp.ne.s32.totalorder %s4901_s30, %s4897_s0 }
  0x4b   : > { %s5168_s16 = scalar_select %p46_p7, %s4905_s20, %s48_s3  }
  0x4c   : > { %p5170_p11 = por %p56_p9, %p55_p8  ;;  %p5176_p12 = por %p62_p1, %p61_p10 }
  0x4d   : > { %p463_p13 = scmp.eq.s32.totalorder %s5053_s24, 1  ;;  %p469_p0 = scmp.eq.s32.totalorder %s3240_s14, 1 }
  0x4e   : > { %p4359_p2 = scmp.lt.s32.totalorder %s4909_s21, 2  ;;  %s669_s1 = sand.u32 1, %s4905_s20  }
  0x4f   : > { %p5183_p4 = por %p463_p13, %p55_p8  ;;  %p5187_p6 = por %p469_p0, %p61_p10 }
  0x50   : > { %s3255_s18 = sshll.u32 %s669_s1, 4  ;;  %s4054_s27 = sshll.u32 %s4909_s21, 4 }
  0x51   : > { %s5586_s7 = sld [smem:[#allocation32_spill]]  ;;  %s673_s4 = scalar_lea.vmem [#allocation2], %s3255_s18 }
  0x52   : > { %s681_s6 = sshll.u32 %s673_s4, 4  ;;  %p5197_p7 = pnand %p4359_p2, %p5170_p11  ;;  %s682_s6 = int_to_ptr.vmem [resolvable:$true] %s681_s6 }
  0x53   : > { %s670_s11 = scalar_lea.sflag [#allocation3], %s669_s1 }
  0x54   : > { %p4793_p9 = pneg %p5197_p7 }
  0x57   : > { %s678_s3 = scalar_lea.hbm %s5586_s7, %s4054_s27  ;;  %s4796_s27 = scalar_lea.hbm %s5586_s7, 32 }
  0x58   : > { %s679_s9 = sshll.u32 %s678_s3, 4  ;;  %s680_s9 = int_to_ptr.hbm [resolvable:$true] %s679_s9 }
  0x59   : > { %s4789_s13 = sshra.s32 %s680_s9, 4  ;;  %s4790_s13 = int_to_ptr.hbm [resolvable:$true] %s4789_s13 }
  0x5a   : > { %s4791_s15 = scalar_lea.hbm %s4790_s13, 16  ;;  %p4797_p11 = scmp.lt.s32.totalorder %s4790_s13, %s5586_s7 }
  0x5b   : > { %p4792_p8 = scmp.ne.s32.totalorder %s4790_s13, %s4791_s15  ;;  %p4798_p0 = scmp.lt.s32.totalorder %s4796_s27, %s4791_s15 }
  0x5d   : > { %p4794_p10 = pnand %p4793_p9, %p4792_p8  ;;  %p4799_p2 = por %p4798_p0, %p4797_p11 }
  0x5f   : > { %p4795_p13 = pneg %p4794_p10 }
  0x61   : > { %p4800_p5 = pnand %p4799_p2, %p4795_p13 }
  0x63   : > { %4803 = shalt.err (!%p4800_p5)
}
  0x64   : > { %4342 = dma.hbm_to_vmem [thread:$0]  (!%p5197_p7), %s680_s9, 256, %s682_s6, %s670_s11, %s5581_s2, %s5581_s2, %s5580_s23  }
  0x65   : > { %693 = sbr.rel (%p5058_p3) target bundleno = 1239 (0x4d7), region = 96  ;;  %s5217_s1 = sand.u32 (!%p5058_p3), 1, %s4901_s30  }
  0x66   : > { %s3259_s13 = sshll.u32 (!%p5058_p3), %s5217_s1, 4  ;;  %s696_s15 = scalar_lea.sflag (!%p5058_p3), [#allocation3], %s5217_s1 }
  0x67   : > { %s5221_s28 = scalar_lea.vmem (!%p5058_p3), [#allocation2], %s3259_s13 }
  0x6a   : > { %4864 = dma.done.wait (%p5176_p12), %s696_s15, 256  }
  0x6b   : > { %4866 = vsyncadd (%p5176_p12), %s696_s15, 4294967040 }
  0x6c   : > { %4868 = dma.done.wait (%p62_p1), [#allocation6], 2064  }
  0x6d   : > { %4870 = vsyncadd (%p62_p1), [#allocation6], 4294965232 }
  0x6e   : > { %4872 = dma.done.wait (%p62_p1), [#allocation9], 2064  }
  0x6f   : > { %4874 = vsyncadd (%p62_p1), [#allocation9], 4294965232 }
  0x70   : > { %4876 = dma.done.wait (%p62_p1), [#allocation12], 1040  }
  0x71   : > { %4878 = vsyncadd (%p62_p1), [#allocation12], 4294966256 }
  0x72   : > { %4880 = dma.done.wait (%p62_p1), [#allocation15], 4096  }
  0x73   : > { %4882 = vsyncadd (%p62_p1), [#allocation15], 4294963200 }
  0x74   : > { %4884 = dma.done.wait (%p62_p1), [#allocation18], 5120  }
  0x75   : > { %4886 = vsyncadd (%p62_p1), [#allocation18], 4294962176 }
  0x76   : > { %4888 = dma.done.wait (%p62_p1), [#allocation21], 10240  }
  0x77   : > { %4890 = vsyncadd (%p62_p1), [#allocation21], 4294957056  ;;  %v4064_v0 = vld [vmem:[#allocation5 + $0x38] sm:$0xff]  ;;  %v4063_v2 = vld [vmem:[#allocation5 + $0x30] sm:$0xff]  ;;  %v823_v4 = vlaneseq  ;;  %s5588_s26 = sld [smem:[#allocation42_spill]]  ;;  %s4249_s9 = sshll.u32 %s5053_s24, 5 }
  0x78   : > { %v4072_v1 = vld [vmem:[#allocation5 + $0x78] sm:$0xff]  ;;  %1063 = vmatpush.bf16.msra.mxu0 %v4064_v0  ;;  %v4071_v3 = vld [vmem:[#allocation5 + $0x70] sm:$0xff]  ;;  %v4062_v5 = vld [vmem:[#allocation5 + $0x28] sm:$0xff]  ;;  %s5589_s18 = sld [smem:[#allocation44_spill]]  ;;  %s3038_s3 = scalar_lea.sflag [#allocation4], %s5217_s1 }
  0x79   : > { %1082 = vmatpush.bf16.msra.mxu1 %v4072_v1  ;;  %v815_v6 = vld [vmem:[%s5221_s28] sm:$0xff]   ;;  %v818_v7 = vld [vmem:[%s5221_s28 + $0x8] sm:$0xff]   ;;  %v5253_v11 = vshrl.u32 %v823_v4, 7  ;;  %s5590_s19 = sld [smem:[#allocation46_spill]] }
  0x7a   : > { %v4070_v8 = vld [vmem:[#allocation5 + $0x68] sm:$0xff]  ;;  %v819_v9 = vunpack.c.l.bf16 %v815_v6  ;;  %v822_v10 = vunpack.c.h.bf16 %v818_v7  ;;  %v4061_v12 = vld [vmem:[#allocation5 + $0x20] sm:$0xff]  ;;  %v820_v14 = vunpack.c.h.bf16 %v815_v6  ;;  %v4060_v17 = vld [vmem:[#allocation5 + $0x18] sm:$0xff]  ;;  %v821_v36 = vunpack.c.l.bf16 %v818_v7  ;;  %s5591_s15 = sld [smem:[#allocation47_spill]] }
  0x7b   : > { %v4069_v13 = vld [vmem:[#allocation5 + $0x60] sm:$0xff]  ;;  %vm919_vm0 = vcmp.lt.s32.totalorder %v5253_v11, 1  ;;  %v4068_v18 = vld [vmem:[#allocation5 + $0x58] sm:$0xff]  ;;  %vm911_vm1 = vcmp.ge.s32.totalorder %v5253_v11, 1  ;;  %v4059_v22 = vld [vmem:[#allocation5 + $0x10] sm:$0xff]  ;;  %vm1459_vm2 = vcmp.lt.s32.totalorder %v5253_v11, 2 }
  0x7c   : > { %1064 = vmatpush.bf16.msra.mxu0 %v4063_v2  ;;  %v915_v15 = vrot.slane %v819_v9, 7  ;;  %v918_v16 = vrot.slane %v822_v10, 7  ;;  %v916_v19 = vrot.slane %v820_v14, 7  ;;  %v4088_v21 = vld [vmem:[#allocation8 + $0x78] sm:$0xff]  ;;  %v4067_v23 = vld [vmem:[#allocation5 + $0x50] sm:$0xff]  ;;  %v4058_v29 = vld [vmem:[#allocation5 + $0x8] sm:$0xff] }
  0x7d   : > { %1083 = vmatpush.bf16.msra.mxu1 %v4071_v3  ;;  %1267 = vmatpush.bf16.msra.mxu3 %v4088_v21  ;;  %v4087_v26 = vld [vmem:[#allocation8 + $0x70] sm:$0xff]  ;;  %v4066_v30 = vld [vmem:[#allocation5 + $0x48] sm:$0xff]  ;;  %v4057_v34 = vld [vmem:[#allocation5] sm:$0xff]  ;;  %v917_v39 = vrot.slane %v821_v36, 7  ;;  %vm1451_vm3 = vcmp.ge.s32.totalorder %v5253_v11, 2  ;;  %vm2035_vm4 = vcmp.lt.s32.totalorder %v5253_v11, 4 }
  0x7e   : > { %v923_v20 = vsel %vm919_vm0, %v918_v16, %v915_v15  ;;  %v922_v24 = vsel %vm919_vm0, %v915_v15, %v916_v19  ;;  %v4086_v31 = vld [vmem:[#allocation8 + $0x68] sm:$0xff]  ;;  %v4065_v35 = vld [vmem:[#allocation5 + $0x40] sm:$0xff]  ;;  %v4083_v51 = vld [vmem:[#allocation8 + $0x50] sm:$0xff]  ;;  %vm2027_vm5 = vcmp.ge.s32.totalorder %v5253_v11, 4  ;;  %s5592_s23 = sld [smem:[#allocation48_spill]] }
  0x7f   : > { %v932_v25 = vsel %vm911_vm1, %v923_v20, 0.0  ;;  %v937_v28 = vpack.c.bf16 %v922_v24, %v922_v24  ;;  %v5264_v38 = vld [vmem:[%s5221_s28] sm:$0xff]  ;;  %v920_v40 = vsel %vm919_vm0, %v917_v39, %v918_v16  ;;  %v921_v41 = vsel %vm919_vm0, %v916_v19, %v917_v39  ;;  %v5272_v47 = vld [vmem:[%s5221_s28 + $0x8] sm:$0xff]  ;;  %s3272_s28 = sshll.u32 %s5217_s1, 5 }
  0x80   : > { %1065 = vmatpush.bf16.msra.mxu0 %v4062_v5  ;;  %v936_v27 = vpack.c.bf16 %v932_v25, %v932_v25  ;;  %v938_v42 = vpack.c.bf16 %v921_v41, %v921_v41  ;;  %v939_v43 = vpack.c.bf16 %v920_v40, %v920_v40  ;;  %v4085_v48 = vld [vmem:[#allocation8 + $0x60] sm:$0xff]  ;;  %v4084_v49 = vld [vmem:[#allocation8 + $0x58] sm:$0xff]  ;;  %v4079_v53 = vld [vmem:[#allocation8 + $0x30] sm:$0xff]  ;;  %s5474_s6 = scalar_lea.vmem [#allocation23], %s3272_s28 }
  0x81   : > { %1084 = vmatpush.bf16.msra.mxu1 %v4070_v8  ;;  %1268 = vmatpush.bf16.msra.mxu3 %v4087_v26  ;;  %v945_v33 = vunpack.c.l.b16 %v937_v28  ;;  %v4080_v50 = vld [vmem:[#allocation8 + $0x38] sm:$0xff]  ;;  %v4082_v54 = vld [vmem:[#allocation8 + $0x48] sm:$0xff]  ;;  %v4081_v57 = vld [vmem:[#allocation8 + $0x40] sm:$0xff] }
  0x82   : > { %v944_v32 = vunpack.c.l.b16 %v936_v27  ;;  %v946_v44 = vunpack.c.l.b16 %v938_v42  ;;  %v947_v45 = vunpack.c.l.b16 %v939_v43  ;;  %1248 = vmatpush.bf16.msra.mxu2 %v4080_v50  ;;  %v4096_v52 = vld [vmem:[#allocation11 + $0x38] sm:$0xff]  ;;  %v4095_v55 = vld [vmem:[#allocation11 + $0x30] sm:$0xff]  ;;  %v4078_v56 = vld [vmem:[#allocation8 + $0x28] sm:$0xff] }
  0x83   : > { %v4094_v58 = vld [vmem:[#allocation11 + $0x28] sm:$0xff]  ;;  %v4077_v59 = vld [vmem:[#allocation8 + $0x20] sm:$0xff]  ;;  %v4076_v61 = vld [vmem:[#allocation8 + $0x18] sm:$0xff] }
  0x84   : > { %1066 = vmatpush.bf16.msra.mxu0 %v4061_v12  ;;  %v948_v37 = vpack.c.b16 %v945_v33, %v944_v32  ;;  %v949_v46 = vpack.c.b16 %v947_v45, %v946_v44  ;;  %v4093_v60 = vld [vmem:[#allocation11 + $0x20] sm:$0xff]  ;;  %v4092_v62 = vld [vmem:[#allocation11 + $0x18] sm:$0xff]  ;;  %v4075_v63 = vld [vmem:[#allocation8 + $0x10] sm:$0xff]  ;;  %s3049_s2 = scalar_lea.hbm %s5592_s23, %s4249_s9 }
  0x85   : > { %1085 = vmatpush.bf16.msra.mxu1 %v4069_v13  ;;  %1269 = vmatpush.bf16.msra.mxu3 %v4086_v31  ;;  %v4423_v0 = vld [vmem:[#allocation7] ss:$0 sm:$0xff]  ;;  %v4091_v1 = vld [vmem:[#allocation11 + $0x10] sm:$0xff]  ;;  %v4074_v2 = vld [vmem:[#allocation8 + $0x8] sm:$0xff]  ;;  %s3052_s24 = sshll.u32 %s3049_s2, 4  ;;  %s3053_s24 = int_to_ptr.hbm [resolvable:$true] %s3052_s24 }
  0x86   : > { %1249 = vmatpush.bf16.msra.mxu2 %v4079_v53  ;;  %v4090_v5 = vld [vmem:[#allocation11 + $0x8] sm:$0xff]  ;;  %v4073_v7 = vld [vmem:[#allocation8] sm:$0xff]  ;;  %s4833_s14 = sshra.s32 %s3053_s24, 4  ;;  %s4834_s14 = int_to_ptr.hbm [resolvable:$true] %s4833_s14 }
  0x87   : > { %v4089_v9 = vld [vmem:[#allocation11] sm:$0xff]  ;;  %p4840_p12 = scmp.lt.s32.totalorder %s4834_s14, %s5592_s23 }
  0x88   : > { %1067 = vmatpush.bf16.msra.mxu0 %v4060_v17 }
  0x89   : > { %1086 = vmatpush.bf16.msra.mxu1 %v4068_v18  ;;  %1270 = vmatpush.bf16.msra.mxu3 %v4085_v48 }
  0x8a   : > { %1250 = vmatpush.bf16.msra.mxu2 %v4078_v56  ;;  %v4112_v56 = vld [vmem:[#allocation14 + $0x78] sm:$0xff] }
  0x8c   : > { %1068 = vmatpush.bf16.msra.mxu0 %v4059_v22 }
  0x8d   : > { %1087 = vmatpush.bf16.msra.mxu1 %v4067_v23  ;;  %1271 = vmatpush.bf16.msra.mxu3 %v4084_v49 }
  0x8e   : > { %1251 = vmatpush.bf16.msra.mxu2 %v4077_v59  ;;  %v4109_v59 = vld [vmem:[#allocation14 + $0x60] sm:$0xff] }
  0x90   : > { %1069 = vmatpush.bf16.msra.mxu0 %v4058_v29 }
  0x91   : > { %1088 = vmatpush.bf16.msra.mxu1 %v4066_v30  ;;  %1272 = vmatpush.bf16.msra.mxu3 %v4083_v51 }
  0x92   : > { %1252 = vmatpush.bf16.msra.mxu2 %v4076_v61  ;;  %v4104_v61 = vld [vmem:[#allocation14 + $0x38] sm:$0xff] }
  0x94   : > { %1070 = vmatpush.bf16.msra.mxu0 %v4057_v34 }
  0x95   : > { %1089 = vmatpush.bf16.msra.mxu1 %v4065_v35  ;;  %1273 = vmatpush.bf16.msra.mxu3 %v4082_v54 }
  0x96   : > { %1253 = vmatpush.bf16.msra.mxu2 %v4075_v63  ;;  %v4103_v63 = vld [vmem:[#allocation14 + $0x30] sm:$0xff] }
  0x97   : > { %1071 = vmatmul.bf16.vlgmr.msra.gmra.mxu0 %v948_v37 }
  0x98   : > { %1090 = vmatmul.bf16.vlgmr.msra.gmra.mxu1 %v5264_v38  ;;  %1341 = vmatpush.bf16.msrb.mxu0 %v4096_v52 }
  0x99   : > { %1274 = vmatpush.bf16.msra.mxu3 %v4081_v57  ;;  %v4111_v57 = vld [vmem:[#allocation14 + $0x70] sm:$0xff]  ;;  %1607 = vmatpush.bf16.msrb.mxu1 %v4104_v61 }
  0x9a   : > { %1254 = vmatpush.bf16.msra.mxu2 %v4074_v2  ;;  %v4105_v2 = vld [vmem:[#allocation14 + $0x40] sm:$0xff] }
  0x9c   : > { %1342 = vmatpush.bf16.msrb.mxu0 %v4095_v55 }
  0x9d   : > { %1608 = vmatpush.bf16.msrb.mxu1 %v4103_v63 }
  0x9e   : > { %1255 = vmatpush.bf16.msra.mxu2 %v4073_v7  ;;  %v4425_v7 = vld [vmem:[#allocation10] ss:$0 sm:$0xff] }
  0xa0   : > { %1343 = vmatpush.bf16.msrb.mxu0 %v4094_v58  ;;  %v4110_v58 = vld [vmem:[#allocation14 + $0x68] sm:$0xff] }
  0xa2   : > { %1626 = vmatpush.bf16.msrb.mxu2 %v4112_v56  ;;  %v4131_v56 = vld [vmem:[#allocation17 + $0x10] sm:$0xff] }
  0xa4   : > { %1344 = vmatpush.bf16.msrb.mxu0 %v4093_v60  ;;  %v4108_v60 = vld [vmem:[#allocation14 + $0x58] sm:$0xff] }
  0xa6   : > { %1627 = vmatpush.bf16.msrb.mxu2 %v4111_v57 }
  0xa7   : > { %1076 = vmatmul.bf16.gmra.mxu0 %v949_v46 }
  0xa8   : > { %1095 = vmatmul.bf16.gmra.mxu1 %v5272_v47  ;;  %1345 = vmatpush.bf16.msrb.mxu0 %v4092_v62  ;;  %v4107_v62 = vld [vmem:[#allocation14 + $0x50] sm:$0xff] }
  0xaa   : > { %1628 = vmatpush.bf16.msrb.mxu2 %v4110_v58 }
  0xac   : > { %1346 = vmatpush.bf16.msrb.mxu0 %v4091_v1  ;;  %v4102_v1 = vld [vmem:[#allocation14 + $0x28] sm:$0xff] }
  0xad   : > { %1609 = vmatpush.bf16.msrb.mxu1 %v4102_v1 }
  0xae   : > { %1629 = vmatpush.bf16.msrb.mxu2 %v4109_v59 }
  0xb0   : > { %1347 = vmatpush.bf16.msrb.mxu0 %v4090_v5 }
  0xb2   : > { %1630 = vmatpush.bf16.msrb.mxu2 %v4108_v60 }
  0xb4   : > { %1348 = vmatpush.bf16.msrb.mxu0 %v4089_v9  ;;  %v4099_v9 = vld [vmem:[#allocation14 + $0x10] sm:$0xff] }
  0xb6   : > { %1631 = vmatpush.bf16.msrb.mxu2 %v4107_v62  ;;  %v4130_v62 = vld [vmem:[#allocation17 + $0x8] sm:$0xff] }
  0xb7   : > { %1349 = vmatmul.bf16.vlgmr.msrb.gmra.mxu0 %v5264_v38 }
  0xc7   : > { %1354 = vmatmul.bf16.gmra.mxu0 %v5272_v47 }
 0x114   : > { %v1072_v3 = vpop.f32.mrf.mxu0 }
 0x115   : > { %v1091_v4 = vpop.f32.mrf.mxu1  ;;  %v1073_v6 = vadd.f32 %v4423_v0, %v1072_v3  ;;  %v4101_v3 = vld [vmem:[#allocation14 + $0x20] sm:$0xff] }
 0x116   : > { %1610 = vmatpush.bf16.msrb.mxu1 %v4101_v3 }
 0x117   : > { %v1092_v8 = vadd.f32 %v1091_v4, %v1073_v6  ;;  %v4100_v6 = vld [vmem:[#allocation14 + $0x18] sm:$0xff] }
 0x119   : > { %v1101_v13 = vmax.f32 %v1092_v8, 0.0 }
 0x11a   : > { %1611 = vmatpush.bf16.msrb.mxu1 %v4100_v6  ;;  %v4129_v6 = vld [vmem:[#allocation17] sm:$0xff] }
 0x11b   : > { %v1121_v16 = vpack.c.bf16 %v1101_v13, %v1101_v13  ;;  %v1105_v32 = vrot.slane %v1101_v13, 7 }
 0x11c   : > { %v1074_v10 = vpop.f32.mrf.mxu0 }
 0x11d   : > { %v1093_v12 = vpop.f32.mrf.mxu1  ;;  %v1075_v14 = vadd.f32 %v4423_v0, %v1074_v10  ;;  %v1141_v22 = vunpack.c.l.b16 %v1121_v16  ;;  %v4424_v10 = vld [vmem:[#allocation13] ss:$0 sm:$0xff] }
 0x11e   : > { %1612 = vmatpush.bf16.msrb.mxu1 %v4099_v9 }
 0x11f   : > { %v1094_v15 = vadd.f32 %v1093_v12, %v1075_v14  ;;  %v4098_v14 = vld [vmem:[#allocation14 + $0x8] sm:$0xff] }
 0x121   : > { %v1102_v17 = vmax.f32 %v1094_v15, 0.0 }
 0x122   : > { %1613 = vmatpush.bf16.msrb.mxu1 %v4098_v14 }
 0x123   : > { %v1122_v18 = vpack.c.bf16 %v1102_v17, %v1102_v17  ;;  %v1106_v29 = vrot.slane %v1102_v17, 7 }
 0x124   : > { %v1077_v19 = vpop.f32.mrf.mxu0 }
 0x125   : > { %v1096_v20 = vpop.f32.mrf.mxu1  ;;  %v1078_v21 = vadd.f32 %v4423_v0, %v1077_v19  ;;  %v1142_v23 = vunpack.c.l.b16 %v1122_v18  ;;  %v1111_v35 = vsel %vm919_vm0, %v1105_v32, %v1106_v29  ;;  %v4097_v19 = vld [vmem:[#allocation14] sm:$0xff] }
 0x126   : > { %v1118_v41 = vpack.c.bf16 %v1111_v35, %v1111_v35  ;;  %1614 = vmatpush.bf16.msrb.mxu1 %v4097_v19 }
 0x127   : > { %v1145_v24 = vpack.c.b16 %v1142_v23, %v1141_v22  ;;  %v1097_v25 = vadd.f32 %v1096_v20, %v1078_v21 }
 0x128   : > { %v1130_v46 = vunpack.c.l.b16 %v1118_v41 }
 0x129   : > { %1275 = vmatmul.bf16.vlgmr.msra.gmra.mxu3 %v1145_v24  ;;  %v1103_v27 = vmax.f32 %v1097_v25, 0.0  ;;  %v4136_v24 = vld [vmem:[#allocation17 + $0x38] sm:$0xff] }
 0x12a   : > { %1885 = vmatpush.bf16.msra.mxu1 %v4136_v24  ;;  %v4125_v24 = vld [vmem:[#allocation16 + $0x60] sm:$0xff] }
 0x12b   : > { %v1123_v33 = vpack.c.bf16 %v1103_v27, %v1103_v27  ;;  %v1107_v48 = vrot.slane %v1103_v27, 7 }
 0x12c   : > { %v1079_v26 = vpop.f32.mrf.mxu0 }
 0x12d   : > { %v1080_v28 = vadd.f32 %v4423_v0, %v1079_v26  ;;  %v1098_v30 = vpop.f32.mrf.mxu1  ;;  %v1143_v38 = vunpack.c.l.b16 %v1123_v33  ;;  %v1110_v50 = vsel %vm919_vm0, %v1106_v29, %v1107_v48  ;;  %v4106_v0 = vld [vmem:[#allocation14 + $0x48] sm:$0xff] }
 0x12e   : > { %v1119_v52 = vpack.c.bf16 %v1110_v50, %v1110_v50  ;;  %1632 = vmatpush.bf16.msrb.mxu2 %v4106_v0 }
 0x12f   : > { %v1099_v31 = vadd.f32 %v1098_v30, %v1080_v28  ;;  %v4135_v28 = vld [vmem:[#allocation17 + $0x30] sm:$0xff] }
 0x130   : > { %v1131_v54 = vunpack.c.l.b16 %v1119_v52  ;;  %1886 = vmatpush.bf16.msra.mxu1 %v4135_v28  ;;  %v4119_v28 = vld [vmem:[#allocation16 + $0x30] sm:$0xff] }
 0x131   : > { %v1104_v34 = vmax.f32 %v1099_v31, 0.0 }
 0x132   : > { %1633 = vmatpush.bf16.msrb.mxu2 %v4105_v2 }
 0x133   : > { %v1108_v36 = vrot.slane %v1104_v34, 7  ;;  %v1124_v37 = vpack.c.bf16 %v1104_v34, %v1104_v34 }
 0x134   : > { %v1350_v4 = vpop.f32.mrf.mxu0 }
 0x135   : > { %v1144_v39 = vunpack.c.l.b16 %v1124_v37  ;;  %v1112_v40 = vsel %vm919_vm0, %v1108_v36, %v1105_v32  ;;  %v1109_v49 = vsel %vm919_vm0, %v1107_v48, %v1108_v36  ;;  %v1351_v15 = vadd.f32 %v4424_v10, %v1350_v4  ;;  %v4134_v36 = vld [vmem:[#allocation17 + $0x28] sm:$0xff] }
 0x136   : > { %v1113_v42 = vsel %vm911_vm1, %v1112_v40, 0.0  ;;  %v1120_v51 = vpack.c.bf16 %v1109_v49, %v1109_v49  ;;  %1887 = vmatpush.bf16.msra.mxu1 %v4134_v36  ;;  %v4426_v36 = vld [vmem:[%s5532_s8] ss:$0 sm:$0xff] }
 0x137   : > { %v1146_v43 = vpack.c.b16 %v1144_v39, %v1143_v38  ;;  %v1117_v44 = vpack.c.bf16 %v1113_v42, %v1113_v42 }
 0x138   : > { %v1132_v53 = vunpack.c.l.b16 %v1120_v51  ;;  %v4132_v51 = vld [vmem:[#allocation17 + $0x18] sm:$0xff] }
 0x139   : > { %1280 = vmatmul.bf16.gmra.mxu3 %v1146_v43  ;;  %v1129_v45 = vunpack.c.l.b16 %v1117_v44  ;;  %v4133_v43 = vld [vmem:[#allocation17 + $0x20] sm:$0xff] }
 0x13a   : > { %v1134_v55 = vpack.c.b16 %v1132_v53, %v1131_v54  ;;  %1888 = vmatpush.bf16.msra.mxu1 %v4133_v43 }
 0x13b   : > { %v1133_v47 = vpack.c.b16 %v1130_v46, %v1129_v45 }
 0x13c   : > { %v1352_v17 = vpop.f32.mrf.mxu0 }
 0x13d   : > { %1256 = vmatmul.bf16.vlgmr.msra.gmra.mxu2 %v1133_v47  ;;  %v1353_v26 = vadd.f32 %v4424_v10, %v1352_v17 }
 0x13e   : > { %1889 = vmatpush.bf16.msra.mxu1 %v4132_v51 }
 0x142   : > { %1890 = vmatpush.bf16.msra.mxu1 %v4131_v56 }
 0x144   : > { %v1355_v30 = vpop.f32.mrf.mxu0 }
 0x145   : > { %v1356_v39 = vadd.f32 %v4424_v10, %v1355_v30  ;;  %v4118_v30 = vld [vmem:[#allocation16 + $0x28] sm:$0xff] }
 0x146   : > { %1891 = vmatpush.bf16.msra.mxu1 %v4130_v62 }
 0x14a   : > { %1892 = vmatpush.bf16.msra.mxu1 %v4129_v6 }
 0x14c   : > { %v1357_v49 = vpop.f32.mrf.mxu0 }
 0x14d   : > { %1261 = vmatmul.bf16.gmra.mxu2 %v1134_v55  ;;  %v1358_v53 = vadd.f32 %v4424_v10, %v1357_v49 }
 0x1ac   : > { %v1276_v5 = vpop.f32.mrf.mxu3 }
 0x1b4   : > { %v1278_v18 = vpop.f32.mrf.mxu3 }
 0x1bc   : > { %v1281_v31 = vpop.f32.mrf.mxu3 }
 0x1c0   : > { %v1257_v8 = vpop.f32.mrf.mxu2 }
 0x1c1   : > { %v1258_v12 = vadd.f32 %v4425_v7, %v1257_v8 }
 0x1c3   : > { %v1277_v13 = vadd.f32 %v1276_v5, %v1258_v12 }
 0x1c4   : > { %v1283_v48 = vpop.f32.mrf.mxu3 }
 0x1c5   : > { %v1286_v16 = vmax.f32 %v1277_v13, 0.0 }
 0x1c7   : > { %v1360_v21 = vadd.f32 %v1351_v15, %v1286_v16 }
 0x1c8   : > { %v1259_v20 = vpop.f32.mrf.mxu2 }
 0x1c9   : > { %v1260_v22 = vadd.f32 %v4425_v7, %v1259_v20  ;;  %v1364_v25 = vmax.f32 %v1360_v21, 0.0  ;;  %v4128_v21 = vld [vmem:[#allocation16 + $0x78] sm:$0xff] }
 0x1ca   : > { %1811 = vmatpush.bf16.msra.mxu0 %v4128_v21 }
 0x1cb   : > { %v1279_v23 = vadd.f32 %v1278_v18, %v1260_v22  ;;  %v1480_v35 = vpack.c.bf16 %v1364_v25, %v1364_v25  ;;  %v1455_v58 = vrot.slane %v1364_v25, 6  ;;  %v4127_v22 = vld [vmem:[#allocation16 + $0x70] sm:$0xff]  ;;  %v4124_v25 = vld [vmem:[#allocation16 + $0x58] sm:$0xff] }
 0x1cd   : > { %v1287_v27 = vmax.f32 %v1279_v23, 0.0  ;;  %v1500_v41 = vunpack.c.l.b16 %v1480_v35  ;;  %v4126_v23 = vld [vmem:[#allocation16 + $0x68] sm:$0xff]  ;;  %v4115_v35 = vld [vmem:[#allocation16 + $0x10] sm:$0xff] }
 0x1ce   : > { %1812 = vmatpush.bf16.msra.mxu0 %v4127_v22 }
 0x1cf   : > { %v1361_v29 = vadd.f32 %v1353_v26, %v1287_v27  ;;  %v4120_v26 = vld [vmem:[#allocation16 + $0x38] sm:$0xff]  ;;  %v4123_v27 = vld [vmem:[#allocation16 + $0x50] sm:$0xff] }
 0x1d0   : > { %v1262_v32 = vpop.f32.mrf.mxu2  ;;  %1792 = vmatpush.bf16.msrb.mxu3 %v4120_v26  ;;  %v4167_v26 = vld [vmem:[#allocation19 + $0xf4] sm:$0xf] }
 0x1d1   : > { %v1365_v33 = vmax.f32 %v1361_v29, 0.0  ;;  %v1263_v34 = vadd.f32 %v4425_v7, %v1262_v32  ;;  %v4122_v29 = vld [vmem:[#allocation16 + $0x48] sm:$0xff]  ;;  %v4117_v32 = vld [vmem:[#allocation16 + $0x20] sm:$0xff] }
 0x1d2   : > { %1813 = vmatpush.bf16.msra.mxu0 %v4126_v23 }
 0x1d3   : > { %v1282_v37 = vadd.f32 %v1281_v31, %v1263_v34  ;;  %v1481_v38 = vpack.c.bf16 %v1365_v33, %v1365_v33  ;;  %v1456_v55 = vrot.slane %v1365_v33, 6  ;;  %v4121_v31 = vld [vmem:[#allocation16 + $0x40] sm:$0xff]  ;;  %v4116_v33 = vld [vmem:[#allocation16 + $0x18] sm:$0xff] }
 0x1d4   : > { %1793 = vmatpush.bf16.msrb.mxu3 %v4119_v28  ;;  %v3725_v28 = vld [vmem:[#allocation19 + $0xf8] sm:$0xf0] }
 0x1d5   : > { %v1288_v40 = vmax.f32 %v1282_v37, 0.0  ;;  %v1501_v42 = vunpack.c.l.b16 %v1481_v38  ;;  %v1462_v61 = vsel %vm1459_vm2, %v1455_v58, %v1456_v55  ;;  %v4114_v38 = vld [vmem:[#allocation16 + $0x8] sm:$0xff] }
 0x1d6   : > { %v1477_v4 = vpack.c.bf16 %v1462_v61, %v1462_v61  ;;  %1814 = vmatpush.bf16.msra.mxu0 %v4125_v24  ;;  %v3723_v24 = vld [vmem:[#allocation19 + $0xf0] sm:$0xf] }
 0x1d7   : > { %v1504_v44 = vpack.c.b16 %v1501_v42, %v1500_v41  ;;  %v1362_v46 = vadd.f32 %v1356_v39, %v1288_v40  ;;  %v4113_v40 = vld [vmem:[#allocation16] sm:$0xff] }
 0x1d8   : > { %v1264_v45 = vpop.f32.mrf.mxu2  ;;  %v1489_v10 = vunpack.c.l.b16 %v1477_v4  ;;  %1794 = vmatpush.bf16.msrb.mxu3 %v4118_v30  ;;  %v3715_v30 = vld [vmem:[#allocation19 + $0xe0] sm:$0xf] }
 0x1d9   : > { %v1265_v47 = vadd.f32 %v4425_v7, %v1264_v45  ;;  %1634 = vmatmul.bf16.vlgmr.msrb.gmra.mxu2 %v1504_v44  ;;  %v1366_v52 = vmax.f32 %v1362_v46, 0.0 }
 0x1da   : > { %1815 = vmatpush.bf16.msra.mxu0 %v4124_v25  ;;  %v4168_v25 = vld [vmem:[#allocation19 + $0xf4] sm:$0xf0] }
 0x1db   : > { %v1284_v50 = vadd.f32 %v1283_v48, %v1265_v47  ;;  %v1482_v60 = vpack.c.bf16 %v1366_v52, %v1366_v52  ;;  %v1457_v13 = vrot.slane %v1366_v52, 6 }
 0x1dc   : > { %1795 = vmatpush.bf16.msrb.mxu3 %v4117_v32  ;;  %v4165_v32 = vld [vmem:[#allocation19 + $0xe4] sm:$0xf] }
 0x1dd   : > { %v1289_v54 = vmax.f32 %v1284_v50, 0.0  ;;  %v1502_v1 = vunpack.c.l.b16 %v1482_v60  ;;  %v1461_v15 = vsel %vm1459_vm2, %v1456_v55, %v1457_v13 }
 0x1de   : > { %v1478_v17 = vpack.c.bf16 %v1461_v15, %v1461_v15  ;;  %1816 = vmatpush.bf16.msra.mxu0 %v4123_v27  ;;  %v3724_v27 = vor.u32 %v4168_v25, %v3723_v24  ;;  %v4153_v24 = vld [vmem:[#allocation19 + $0x84] sm:$0xf]  ;;  %v3669_v25 = vld [vmem:[#allocation19 + $0x88] sm:$0xf0] }
 0x1df   : > { %v1363_v57 = vadd.f32 %v1358_v53, %v1289_v54 }
 0x1e0   : > { %v1490_v19 = vunpack.c.l.b16 %v1478_v17  ;;  %1796 = vmatpush.bf16.msrb.mxu3 %v4116_v33 }
 0x1e1   : > { %v1367_v59 = vmax.f32 %v1363_v57, 0.0 }
 0x1e2   : > { %1817 = vmatpush.bf16.msra.mxu0 %v4122_v29  ;;  %v3728_v29 = vor.u32 %v4167_v26, %v3725_v28  ;;  %v3672_v26 = vor.u32 %v4153_v24, %v3669_v25  ;;  %v4146_v28 = vld [vmem:[#allocation19 + $0x44] sm:$0xf0] }
 0x1e3   : > { %v1458_v63 = vrot.slane %v1367_v59, 6  ;;  %v1483_v0 = vpack.c.bf16 %v1367_v59, %v1367_v59 }
 0x1e4   : > { %1797 = vmatpush.bf16.msrb.mxu3 %v4115_v35 }
 0x1e5   : > { %v1503_v2 = vunpack.c.l.b16 %v1483_v0  ;;  %v1463_v3 = vsel %vm1459_vm2, %v1458_v63, %v1455_v58  ;;  %v1460_v14 = vsel %vm1459_vm2, %v1457_v13, %v1458_v63 }
 0x1e6   : > { %v1472_v5 = vsel %vm1451_vm3, %v1463_v3, 0.0  ;;  %v1479_v16 = vpack.c.bf16 %v1460_v14, %v1460_v14  ;;  %1818 = vmatpush.bf16.msra.mxu0 %v4121_v31  ;;  %v4166_v31 = vld [vmem:[#allocation19 + $0xe4] sm:$0xf0] }
 0x1e7   : > { %v1505_v7 = vpack.c.b16 %v1503_v2, %v1502_v1  ;;  %v1476_v8 = vpack.c.bf16 %v1472_v5, %v1472_v5  ;;  %v3716_v33 = vor.u32 %v4166_v31, %v3715_v30  ;;  %v3637_v31 = vld [vmem:[#allocation19 + $0x48] sm:$0xf0] }
 0x1e8   : > { %v1491_v18 = vunpack.c.l.b16 %v1479_v16  ;;  %1798 = vmatpush.bf16.msrb.mxu3 %v4114_v38  ;;  %v4163_v38 = vld [vmem:[#allocation19 + $0xd4] sm:$0xf] }
 0x1e9   : > { %1639 = vmatmul.bf16.gmra.mxu2 %v1505_v7  ;;  %v1488_v9 = vunpack.c.l.b16 %v1476_v8 }
 0x1ea   : > { %v1493_v20 = vpack.c.b16 %v1491_v18, %v1490_v19 }
 0x1eb   : > { %v1492_v12 = vpack.c.b16 %v1489_v10, %v1488_v9 }
 0x1ec   : > { %1799 = vmatpush.bf16.msrb.mxu3 %v4113_v40  ;;  %v3709_v40 = vld [vmem:[#allocation19 + $0xd8] sm:$0xf0] }
 0x1ed   : > { %1615 = vmatmul.bf16.vlgmr.msrb.gmra.mxu1 %v1492_v12 }
 0x1ee   : > { %2306 = vmatpush.bf16.msrb.mxu1 %v3728_v29  ;;  %v4145_v29 = vld [vmem:[#allocation19 + $0x44] sm:$0xf] }
 0x1f0   : > { %2268 = vmatpush.bf16.msra.mxu3 %v3724_v27  ;;  %v3635_v27 = vld [vmem:[#allocation19 + $0x40] sm:$0xf] }
 0x1f1   : > { %v3636_v30 = vor.u32 %v4146_v28, %v3635_v27 }
 0x1f4   : > { %2269 = vmatpush.bf16.msra.mxu3 %v3716_v33 }
 0x1fd   : > { %1620 = vmatmul.bf16.gmra.mxu1 %v1493_v20 }
 0x20d   : > { %1893 = vmatmul.bf16.vlgmr.msra.gmra.mxu1 %v1504_v44 }
 0x21d   : > { %1898 = vmatmul.bf16.gmra.mxu1 %v1505_v7 }
 0x25c   : > { %v1635_v34 = vpop.f32.mrf.mxu2 }
 0x264   : > { %v1637_v42 = vpop.f32.mrf.mxu2 }
 0x26a   : > { %v1616_v37 = vpop.f32.mrf.mxu1 }
 0x26b   : > { %v1617_v39 = vadd.f32 %v4426_v36, %v1616_v37  ;;  %v4164_v37 = vld [vmem:[#allocation19 + $0xd4] sm:$0xf0] }
 0x26c   : > { %v1640_v50 = vpop.f32.mrf.mxu2 }
 0x26d   : > { %v1636_v41 = vadd.f32 %v1635_v34, %v1617_v39  ;;  %v3717_v34 = vld [vmem:[#allocation19 + $0xe8] sm:$0xf0] }
 0x26e   : > { %v3720_v35 = vor.u32 %v4165_v32, %v3717_v34  ;;  %v3640_v32 = vor.u32 %v4145_v29, %v3637_v31  ;;  %v3627_v34 = vld [vmem:[#allocation19 + $0x30] sm:$0xf] }
 0x26f   : > { %v1645_v44 = vmax.f32 %v1636_v41, 0.0  ;;  %v3712_v41 = vor.u32 %v4163_v38, %v3709_v40  ;;  %v4428_v40 = vld [vmem:[%s5534_s10] ss:$0 sm:$0xff] }
 0x270   : > { %2307 = vmatpush.bf16.msrb.mxu1 %v3720_v35  ;;  %v4144_v35 = vld [vmem:[#allocation19 + $0x34] sm:$0xf0] }
 0x271   : > { %v1665_v47 = vpack.c.bf16 %v1645_v44, %v1645_v44  ;;  %v1649_v63 = vrot.slane %v1645_v44, 6  ;;  %v4161_v44 = vld [vmem:[#allocation19 + $0xc4] sm:$0xf]  ;;  %v3628_v38 = vor.u32 %v4144_v35, %v3627_v34 }
 0x272   : > { %v1618_v43 = vpop.f32.mrf.mxu1 }
 0x273   : > { %v1619_v45 = vadd.f32 %v4426_v36, %v1618_v43  ;;  %v1685_v52 = vunpack.c.l.b16 %v1665_v47  ;;  %v4162_v43 = vld [vmem:[#allocation19 + $0xc4] sm:$0xf0] }
 0x274   : > { %v1642_v61 = vpop.f32.mrf.mxu2  ;;  %2308 = vmatpush.bf16.msrb.mxu1 %v3712_v41 }
 0x275   : > { %v1638_v46 = vadd.f32 %v1637_v42, %v1619_v45  ;;  %v3699_v42 = vld [vmem:[#allocation19 + $0xc0] sm:$0xf] }
 0x276   : > { %v3700_v45 = vor.u32 %v4162_v43, %v3699_v42  ;;  %v3619_v42 = vld [vmem:[#allocation19 + $0x20] sm:$0xf]  ;;  %v4142_v43 = vld [vmem:[#allocation19 + $0x24] sm:$0xf0] }
 0x277   : > { %v1646_v48 = vmax.f32 %v1638_v46, 0.0  ;;  %v3701_v46 = vld [vmem:[#allocation19 + $0xc8] sm:$0xf0] }
 0x278   : > { %v3704_v47 = vor.u32 %v4161_v44, %v3701_v46  ;;  %v4141_v44 = vld [vmem:[#allocation19 + $0x24] sm:$0xf]  ;;  %v3620_v46 = vor.u32 %v4142_v43, %v3619_v42 }
 0x279   : > { %v1666_v49 = vpack.c.bf16 %v1646_v48, %v1646_v48  ;;  %v1650_v60 = vrot.slane %v1646_v48, 6  ;;  %v3691_v48 = vld [vmem:[#allocation19 + $0xb0] sm:$0xf] }
 0x27a   : > { %v1621_v51 = vpop.f32.mrf.mxu1  ;;  %2309 = vmatpush.bf16.msrb.mxu1 %v3704_v47  ;;  %v3621_v47 = vld [vmem:[#allocation19 + $0x28] sm:$0xf0] }
 0x27b   : > { %v1686_v53 = vunpack.c.l.b16 %v1666_v49  ;;  %v1622_v54 = vadd.f32 %v4426_v36, %v1621_v51  ;;  %v1655_v2 = vsel %vm1459_vm2, %v1649_v63, %v1650_v60  ;;  %v4160_v49 = vld [vmem:[#allocation19 + $0xb4] sm:$0xf0] }
 0x27c   : > { %v1662_v8 = vpack.c.bf16 %v1655_v2, %v1655_v2  ;;  %v3692_v51 = vor.u32 %v4160_v49, %v3691_v48  ;;  %v3651_v2 = vld [vmem:[#allocation19 + $0x60] sm:$0xf]  ;;  %v3624_v49 = vor.u32 %v4141_v44, %v3621_v47 }
 0x27d   : > { %v1689_v55 = vpack.c.b16 %v1686_v53, %v1685_v52  ;;  %v1641_v56 = vadd.f32 %v1640_v50, %v1622_v54  ;;  %v4159_v50 = vld [vmem:[#allocation19 + $0xb4] sm:$0xf]  ;;  %v3693_v52 = vld [vmem:[#allocation19 + $0xb8] sm:$0xf0]  ;;  %v3659_v54 = vld [vmem:[#allocation19 + $0x70] sm:$0xf] }
 0x27e   : > { %v1674_v14 = vunpack.c.l.b16 %v1662_v8  ;;  %v3696_v53 = vor.u32 %v4159_v50, %v3693_v52  ;;  %v3653_v8 = vld [vmem:[#allocation19 + $0x68] sm:$0xf0]  ;;  %v4427_v50 = vld [vmem:[%s5588_s26] ss:$0 sm:$0xff]  ;;  %v3611_v52 = vld [vmem:[#allocation19 + $0x10] sm:$0xf] }
 0x27f   : > { %1819 = vmatmul.bf16.vlgmr.msra.gmra.mxu0 %v1689_v55  ;;  %v1647_v58 = vmax.f32 %v1641_v56, 0.0  ;;  %v4152_v55 = vld [vmem:[#allocation19 + $0x74] sm:$0xf0]  ;;  %v3683_v56 = vld [vmem:[#allocation19 + $0xa0] sm:$0xf]  ;;  %s3050_s26 = sshll.u32 %s5474_s6, 4  ;;  %s3051_s26 = int_to_ptr.vmem [resolvable:$true] %s3050_s26 }
 0x280   : > { %2310 = vmatpush.bf16.msrb.mxu1 %v3696_v53  ;;  %v4140_v53 = vld [vmem:[#allocation19 + $0x14] sm:$0xf0] }
 0x281   : > { %v1667_v1 = vpack.c.bf16 %v1647_v58, %v1647_v58  ;;  %v1651_v16 = vrot.slane %v1647_v58, 6  ;;  %v4158_v58 = vld [vmem:[#allocation19 + $0xa4] sm:$0xf0] }
 0x282   : > { %v1623_v57 = vpop.f32.mrf.mxu1 }
 0x283   : > { %v1624_v59 = vadd.f32 %v4426_v36, %v1623_v57  ;;  %v1687_v5 = vunpack.c.l.b16 %v1667_v1  ;;  %v1654_v18 = vsel %vm1459_vm2, %v1650_v60, %v1651_v16  ;;  %v3707_v36 = vld [vmem:[#allocation19 + $0xd0] sm:$0xf]  ;;  %v3660_v57 = vor.u32 %v4152_v55, %v3659_v54  ;;  %v3661_v60 = vld [vmem:[#allocation19 + $0x78] sm:$0xf0]  ;;  %v4139_v54 = vld [vmem:[#allocation19 + $0x14] sm:$0xf] }
 0x284   : > { %v1663_v20 = vpack.c.bf16 %v1654_v18, %v1654_v18  ;;  %v3708_v39 = vor.u32 %v4164_v37, %v3707_v36  ;;  %v4143_v36 = vld [vmem:[#allocation19 + $0x34] sm:$0xf]  ;;  %v3612_v55 = vor.u32 %v4140_v53, %v3611_v52 }
 0x285   : > { %v1643_v62 = vadd.f32 %v1642_v61, %v1624_v59  ;;  %v4151_v59 = vld [vmem:[#allocation19 + $0x74] sm:$0xf]  ;;  %v3684_v61 = vor.u32 %v4158_v58, %v3683_v56  ;;  %2249 = vmatpush.bf16.msra.mxu2 %v3660_v57  ;;  %v3613_v56 = vld [vmem:[#allocation19 + $0x18] sm:$0xf0] }
 0x286   : > { %v1675_v22 = vunpack.c.l.b16 %v1663_v20  ;;  %2270 = vmatpush.bf16.msra.mxu3 %v3708_v39  ;;  %v4147_v20 = vld [vmem:[#allocation19 + $0x54] sm:$0xf]  ;;  %v3629_v39 = vld [vmem:[#allocation19 + $0x38] sm:$0xf0] }
 0x287   : > { %v1648_v0 = vmax.f32 %v1643_v62, 0.0  ;;  %v3664_v62 = vor.u32 %v4151_v59, %v3661_v60  ;;  %v3632_v41 = vor.u32 %v4143_v36, %v3629_v39  ;;  %v3616_v59 = vor.u32 %v4139_v54, %v3613_v56  ;;  %v3603_v60 = vld [vmem:[#allocation19] sm:$0xf] }
 0x289   : > { %v1652_v3 = vrot.slane %v1648_v0, 6  ;;  %v1668_v4 = vpack.c.bf16 %v1648_v0, %v1648_v0  ;;  %v3685_v0 = vld [vmem:[#allocation19 + $0xa8] sm:$0xf0]  ;;  %2287 = vmatpush.bf16.msrb.mxu0 %v3664_v62 }
 0x28a   : > { %2271 = vmatpush.bf16.msra.mxu3 %v3700_v45  ;;  %v1894_v33 = vpop.f32.mrf.mxu1 }
 0x28b   : > { %v1688_v6 = vunpack.c.l.b16 %v1668_v4  ;;  %v1656_v7 = vsel %vm1459_vm2, %v1652_v3, %v1649_v63  ;;  %v1653_v17 = vsel %vm1459_vm2, %v1651_v16, %v1652_v3  ;;  %v4157_v63 = vld [vmem:[#allocation19 + $0xa4] sm:$0xf]  ;;  %v4150_v3 = vld [vmem:[#allocation19 + $0x64] sm:$0xf0]  ;;  %v3675_v4 = vld [vmem:[#allocation19 + $0x90] sm:$0xf] }
 0x28c   : > { %v1657_v9 = vsel %vm1451_vm3, %v1656_v7, 0.0  ;;  %v1664_v19 = vpack.c.bf16 %v1653_v17, %v1653_v17  ;;  %v3688_v1 = vor.u32 %v4157_v63, %v3685_v0  ;;  %v4149_v7 = vld [vmem:[#allocation19 + $0x64] sm:$0xf]  ;;  %v4148_v16 = vld [vmem:[#allocation19 + $0x54] sm:$0xf0]  ;;  %v1895_v0 = vadd.f32 %v4427_v50, %v1894_v33 }
 0x28d   : > { %v1690_v10 = vpack.c.b16 %v1688_v6, %v1687_v5  ;;  %v1661_v12 = vpack.c.bf16 %v1657_v9, %v1657_v9  ;;  %v3652_v5 = vor.u32 %v4150_v3, %v3651_v2  ;;  %v4156_v6 = vld [vmem:[#allocation19 + $0x94] sm:$0xf0]  ;;  %v3667_v17 = vld [vmem:[#allocation19 + $0x80] sm:$0xf]  ;;  %v3605_v2 = vld [vmem:[#allocation19 + $0x8] sm:$0xf0] }
 0x28e   : > { %v1676_v21 = vunpack.c.l.b16 %v1664_v19  ;;  %2272 = vmatpush.bf16.msra.mxu3 %v3692_v51  ;;  %2311 = vmatpush.bf16.msrb.mxu1 %v3688_v1  ;;  %v3676_v9 = vor.u32 %v4156_v6, %v3675_v4  ;;  %v4154_v19 = vld [vmem:[#allocation19 + $0x84] sm:$0xf0]  ;;  %v4137_v1 = vld [vmem:[#allocation19 + $0x4] sm:$0xf] }
 0x28f   : > { %1824 = vmatmul.bf16.gmra.mxu0 %v1690_v10  ;;  %v1673_v13 = vunpack.c.l.b16 %v1661_v12  ;;  %v3656_v10 = vor.u32 %v4149_v7, %v3653_v8  ;;  %v4155_v12 = vld [vmem:[#allocation19 + $0x94] sm:$0xf]  ;;  %2250 = vmatpush.bf16.msra.mxu2 %v3652_v5  ;;  %v3608_v4 = vor.u32 %v4137_v1, %v3605_v2  ;;  %v4232_v1 = vld [vmem:[#allocation20 + $0x1f4] sm:$0xf0] }
 0x290   : > { %v1678_v23 = vpack.c.b16 %v1676_v21, %v1675_v22  ;;  %v3645_v21 = vld [vmem:[#allocation19 + $0x58] sm:$0xf0]  ;;  %v3668_v22 = vor.u32 %v4154_v19, %v3667_v17 }
 0x291   : > { %v1677_v15 = vpack.c.b16 %v1674_v14, %v1673_v13  ;;  %v3677_v13 = vld [vmem:[#allocation19 + $0x98] sm:$0xf0]  ;;  %2288 = vmatpush.bf16.msrb.mxu0 %v3656_v10 }
 0x292   : > { %2273 = vmatpush.bf16.msra.mxu3 %v3684_v61  ;;  %v3680_v14 = vor.u32 %v4155_v12, %v3677_v13  ;;  %v1896_v57 = vpop.f32.mrf.mxu1  ;;  %v4138_v61 = vld [vmem:[#allocation19 + $0x4] sm:$0xf0] }
 0x293   : > { %1800 = vmatmul.bf16.vlgmr.msrb.gmra.mxu3 %v1677_v15  ;;  %v3643_v15 = vld [vmem:[#allocation19 + $0x50] sm:$0xf]  ;;  %v3604_v63 = vor.u32 %v4138_v61, %v3603_v60  ;;  %v1897_v8 = vadd.f32 %v4427_v50, %v1896_v57 }
 0x294   : > { %2312 = vmatpush.bf16.msrb.mxu1 %v3680_v14  ;;  %v3644_v18 = vor.u32 %v4148_v16, %v3643_v15  ;;  %v3915_v61 = vld [vmem:[#allocation20 + $0x170] sm:$0xf] }
 0x296   : > { %2274 = vmatpush.bf16.msra.mxu3 %v3676_v9  ;;  %2251 = vmatpush.bf16.msra.mxu2 %v3644_v18 }
 0x298   : > { %2313 = vmatpush.bf16.msrb.mxu1 %v3672_v26 }
 0x29a   : > { %2275 = vmatpush.bf16.msra.mxu3 %v3668_v22  ;;  %2252 = vmatpush.bf16.msra.mxu2 %v3636_v30  ;;  %v1899_v12 = vpop.f32.mrf.mxu1 }
 0x29b   : > { %v1900_v24 = vadd.f32 %v4427_v50, %v1899_v12  ;;  %v3963_v12 = vld [vmem:[#allocation20 + $0x1d0] sm:$0xf] }
 0x29e   : > { %2253 = vmatpush.bf16.msra.mxu2 %v3628_v38 }
 0x2a2   : > { %2254 = vmatpush.bf16.msra.mxu2 %v3620_v46  ;;  %v1901_v29 = vpop.f32.mrf.mxu1 }
 0x2a3   : > { %1805 = vmatmul.bf16.gmra.mxu3 %v1678_v23  ;;  %v3648_v23 = vor.u32 %v4147_v20, %v3645_v21 }
 0x2a5   : > { %2289 = vmatpush.bf16.msrb.mxu0 %v3648_v23 }
 0x2a6   : > { %2255 = vmatpush.bf16.msra.mxu2 %v3612_v55 }
 0x2a9   : > { %2290 = vmatpush.bf16.msrb.mxu0 %v3640_v32  ;;  %v1902_v32 = vadd.f32 %v4427_v50, %v1901_v29  ;;  %v3787_v29 = vld [vmem:[#allocation20 + $0x70] sm:$0xf] }
 0x2aa   : > { %2256 = vmatpush.bf16.msra.mxu2 %v3604_v63  ;;  %v3979_v63 = vld [vmem:[#allocation20 + $0x1f0] sm:$0xf] }
 0x2ab   : > { %v3980_v2 = vor.u32 %v4232_v1, %v3979_v63  ;;  %v3923_v63 = vld [vmem:[#allocation20 + $0x180] sm:$0xf] }
 0x2ad   : > { %2291 = vmatpush.bf16.msrb.mxu0 %v3632_v41  ;;  %2787 = vmatpush.bf16.msra.mxu1 %v3980_v2  ;;  %v3763_v2 = vld [vmem:[#allocation20 + $0x40] sm:$0xf] }
 0x2b1   : > { %2292 = vmatpush.bf16.msrb.mxu0 %v3624_v49 }
 0x2b5   : > { %2293 = vmatpush.bf16.msrb.mxu0 %v3616_v59 }
 0x2b9   : > { %2294 = vmatpush.bf16.msrb.mxu0 %v3608_v4  ;;  %v4214_v4 = vld [vmem:[#allocation20 + $0x164] sm:$0xf0] }
 0x2fc   : > { %v1820_v37 = vpop.f32.mrf.mxu0 }
 0x304   : > { %v1822_v62 = vpop.f32.mrf.mxu0 }
 0x30c   : > { %v1825_v14 = vpop.f32.mrf.mxu0 }
 0x314   : > { %v1827_v30 = vpop.f32.mrf.mxu0 }
 0x316   : > { %v1801_v45 = vpop.f32.mrf.mxu3 }
 0x317   : > { %v1802_v48 = vadd.f32 %v4428_v40, %v1801_v45 }
 0x319   : > { %v1821_v51 = vadd.f32 %v1820_v37, %v1802_v48 }
 0x31b   : > { %v1830_v58 = vmax.f32 %v1821_v51, 0.0 }
 0x31d   : > { %v1904_v5 = vadd.f32 %v1895_v0, %v1830_v58 }
 0x31e   : > { %v1803_v3 = vpop.f32.mrf.mxu3 }
 0x31f   : > { %v1804_v6 = vadd.f32 %v4428_v40, %v1803_v3  ;;  %v1908_v9 = vmax.f32 %v1904_v5, 0.0  ;;  %v3907_v3 = vld [vmem:[#allocation20 + $0x160] sm:$0xf] }
 0x320   : > { %v3908_v5 = vor.u32 %v4214_v4, %v3907_v3  ;;  %v4178_v3 = vld [vmem:[#allocation20 + $0x44] sm:$0xf0]  ;;  %v3827_v4 = vld [vmem:[#allocation20 + $0xc0] sm:$0xf] }
 0x321   : > { %v1823_v7 = vadd.f32 %v1822_v62, %v1804_v6  ;;  %v2056_v16 = vpack.c.bf16 %v1908_v9, %v1908_v9  ;;  %v2031_v37 = vrot.slane %v1908_v9, 4  ;;  %v4216_v62 = vld [vmem:[#allocation20 + $0x174] sm:$0xf0]  ;;  %v3971_v6 = vld [vmem:[#allocation20 + $0x1e0] sm:$0xf] }
 0x322   : > { %v3916_v0 = vor.u32 %v4216_v62, %v3915_v61  ;;  %v3899_v9 = vld [vmem:[#allocation20 + $0x150] sm:$0xf] }
 0x323   : > { %v1831_v10 = vmax.f32 %v1823_v7, 0.0  ;;  %v2076_v21 = vunpack.c.l.b16 %v2056_v16  ;;  %v4230_v7 = vld [vmem:[#allocation20 + $0x1e4] sm:$0xf0]  ;;  %v3891_v16 = vld [vmem:[#allocation20 + $0x140] sm:$0xf] }
 0x324   : > { %2768 = vmatpush.bf16.msra.mxu0 %v3916_v0  ;;  %v4218_v0 = vld [vmem:[#allocation20 + $0x184] sm:$0xf0] }
 0x325   : > { %v1905_v13 = vadd.f32 %v1897_v8, %v1831_v10  ;;  %v3972_v8 = vor.u32 %v4230_v7, %v3971_v6  ;;  %v4212_v10 = vld [vmem:[#allocation20 + $0x154] sm:$0xf0]  ;;  %v3924_v1 = vor.u32 %v4218_v0, %v3923_v63  ;;  %v4194_v6 = vld [vmem:[#allocation20 + $0xc4] sm:$0xf0]  ;;  %v4215_v7 = vld [vmem:[#allocation20 + $0x174] sm:$0xf] }
 0x326   : > { %v1806_v15 = vpop.f32.mrf.mxu3 }
 0x327   : > { %v1909_v17 = vmax.f32 %v1905_v13, 0.0  ;;  %v1807_v18 = vadd.f32 %v4428_v40, %v1806_v15  ;;  %2788 = vmatpush.bf16.msra.mxu1 %v3972_v8  ;;  %v3900_v13 = vor.u32 %v4212_v10, %v3899_v9  ;;  %v3917_v8 = vld [vmem:[#allocation20 + $0x178] sm:$0xf0]  ;;  %v3828_v10 = vor.u32 %v4194_v6, %v3827_v4  ;;  %v4186_v6 = vld [vmem:[#allocation20 + $0x84] sm:$0xf0] }
 0x328   : > { %2769 = vmatpush.bf16.msra.mxu0 %v3908_v5  ;;  %v3764_v5 = vor.u32 %v4178_v3, %v3763_v2  ;;  %v4170_v2 = vld [vmem:[#allocation20 + $0x4] sm:$0xf0]  ;;  %v3795_v3 = vld [vmem:[#allocation20 + $0x80] sm:$0xf] }
 0x329   : > { %v2057_v19 = vpack.c.bf16 %v1909_v17, %v1909_v17  ;;  %v1826_v20 = vadd.f32 %v1825_v14, %v1807_v18  ;;  %v2032_v35 = vrot.slane %v1909_v17, 4  ;;  %v4228_v14 = vld [vmem:[#allocation20 + $0x1d4] sm:$0xf0]  ;;  %v4210_v17 = vld [vmem:[#allocation20 + $0x144] sm:$0xf0] }
 0x32a   : > { %v3964_v15 = vor.u32 %v4228_v14, %v3963_v12  ;;  %v3892_v18 = vor.u32 %v4210_v17, %v3891_v16  ;;  %v3920_v12 = vor.u32 %v4215_v7, %v3917_v8  ;;  %v3981_v14 = vld [vmem:[#allocation20 + $0x1f8] sm:$0xf0]  ;;  %v3755_v17 = vld [vmem:[#allocation20 + $0x30] sm:$0xf]  ;;  %v4207_v7 = vld [vmem:[#allocation20 + $0x134] sm:$0xf] }
 0x32b   : > { %v2077_v22 = vunpack.c.l.b16 %v2057_v19  ;;  %v1832_v23 = vmax.f32 %v1826_v20, 0.0  ;;  %v3955_v19 = vld [vmem:[#allocation20 + $0x1c0] sm:$0xf]  ;;  %v4226_v20 = vld [vmem:[#allocation20 + $0x1c4] sm:$0xf0] }
 0x32c   : > { %2770 = vmatpush.bf16.msra.mxu0 %v3900_v13  ;;  %2789 = vmatpush.bf16.msra.mxu1 %v3964_v15  ;;  %v4231_v13 = vld [vmem:[#allocation20 + $0x1f4] sm:$0xf]  ;;  %v1944_v15 = vld [vmem:[%s5589_s18] sm:$0x3]  ;;  %v3885_v8 = vld [vmem:[#allocation20 + $0x138] sm:$0xf0] }
 0x32d   : > { %v5318_v25 = vpack.c.b16 %v2077_v22, %v2076_v21  ;;  %v1906_v27 = vadd.f32 %v1900_v24, %v1832_v23  ;;  %v3956_v21 = vor.u32 %v4226_v20, %v3955_v19  ;;  %v3883_v22 = vld [vmem:[#allocation20 + $0x130] sm:$0xf]  ;;  %v4208_v23 = vld [vmem:[#allocation20 + $0x134] sm:$0xf0]  ;;  %v3984_v16 = vor.u32 %v4231_v13, %v3981_v14  ;;  %v4223_v14 = vld [vmem:[#allocation20 + $0x1b4] sm:$0xf] }
 0x32e   : > { %v1808_v26 = vpop.f32.mrf.mxu3  ;;  %v3947_v24 = vld [vmem:[#allocation20 + $0x1b0] sm:$0xf]  ;;  %v3888_v13 = vor.u32 %v4207_v7, %v3885_v8  ;;  %v3925_v7 = vld [vmem:[#allocation20 + $0x188] sm:$0xf0]  ;;  %s4835_s18 = scalar_lea.hbm %s4834_s14, 32 }
 0x32f   : > { %v1809_v28 = vadd.f32 %v4428_v40, %v1808_v26  ;;  %2276 = vmatmul.bf16.vlgmr.msra.gmra.mxu3 %v5318_v25  ;;  %2314 = vmatmul.bf16.vlgmr.msrb.gmra.mxu1 %v5318_v25  ;;  %v1910_v33 = vmax.f32 %v1906_v27, 0.0  ;;  %v2038_v40 = vsel %vm2035_vm4, %v2031_v37, %v2032_v35  ;;  %v3884_v26 = vor.u32 %v4208_v23, %v3883_v22  ;;  %v4224_v27 = vld [vmem:[#allocation20 + $0x1b4] sm:$0xf0]  ;;  %v3819_v19 = vld [vmem:[#allocation20 + $0xb0] sm:$0xf]  ;;  %p4836_p1 = scmp.ne.s32.totalorder %s4834_s14, %s4835_s18 }
 0x330   : > { %v2053_v46 = vpack.c.bf16 %v2038_v40, %v2038_v40  ;;  %2771 = vmatpush.bf16.msra.mxu0 %v3892_v18  ;;  %2790 = vmatpush.bf16.msra.mxu1 %v3956_v21  ;;  %v4176_v18 = vld [vmem:[#allocation20 + $0x34] sm:$0xf0]  ;;  %v4213_v22 = vld [vmem:[#allocation20 + $0x164] sm:$0xf]  ;;  %v3909_v23 = vld [vmem:[#allocation20 + $0x168] sm:$0xf0] }
 0x331   : > { %v1828_v31 = vadd.f32 %v1827_v30, %v1809_v28  ;;  %v2058_v38 = vpack.c.bf16 %v1910_v33, %v1910_v33  ;;  %v2033_v53 = vrot.slane %v1910_v33, 4  ;;  %v3948_v28 = vor.u32 %v4224_v27, %v3947_v24  ;;  %v4184_v30 = vld [vmem:[#allocation20 + $0x74] sm:$0xf0]  ;;  %p4837_p3 = pnand %p4836_p1, %p5183_p4 }
 0x332   : > { %v2065_v51 = vunpack.c.l.b16 %v2053_v46  ;;  %v4200_v33 = vld [vmem:[#allocation20 + $0xf4] sm:$0xf0]  ;;  %v3867_v46 = vld [vmem:[#allocation20 + $0x110] sm:$0xf]  ;;  %v3756_v20 = vor.u32 %v4176_v18, %v3755_v17  ;;  %v3912_v27 = vor.u32 %v4213_v22, %v3909_v23 }
 0x333   : > { %v1833_v34 = vmax.f32 %v1828_v31, 0.0  ;;  %v2078_v43 = vunpack.c.l.b16 %v2058_v38  ;;  %v2037_v55 = vsel %vm2035_vm4, %v2032_v35, %v2033_v53  ;;  %v3851_v31 = vld [vmem:[#allocation20 + $0xf0] sm:$0xf]  ;;  %v4206_v35 = vld [vmem:[#allocation20 + $0x124] sm:$0xf0]  ;;  %p4838_p5 = pneg %p4837_p3 }
 0x334   : > { %v2054_v57 = vpack.c.bf16 %v2037_v55, %v2037_v55  ;;  %2772 = vmatpush.bf16.msra.mxu0 %v3884_v26  ;;  %2791 = vmatpush.bf16.msra.mxu1 %v3948_v28  ;;  %v3939_v38 = vld [vmem:[#allocation20 + $0x1a0] sm:$0xf]  ;;  %v4180_v55 = vld [vmem:[#allocation20 + $0x54] sm:$0xf0]  ;;  %v4229_v28 = vld [vmem:[#allocation20 + $0x1e4] sm:$0xf] }
 0x335   : > { %v1907_v36 = vadd.f32 %v1902_v32, %v1833_v34  ;;  %v3788_v32 = vor.u32 %v4184_v30, %v3787_v29  ;;  %v3875_v34 = vld [vmem:[#allocation20 + $0x120] sm:$0xf]  ;;  %v4192_v21 = vld [vmem:[#allocation20 + $0xb4] sm:$0xf0]  ;;  %v3973_v29 = vld [vmem:[#allocation20 + $0x1e8] sm:$0xf0] }
 0x336   : > { %v2066_v59 = vunpack.c.l.b16 %v2054_v57  ;;  %v3820_v26 = vor.u32 %v4192_v21, %v3819_v19  ;;  %v5343_v30 = vperm.slane %v1944_v15, 1  ;;  %v4183_v19 = vld [vmem:[#allocation20 + $0x74] sm:$0xf] }
 0x337   : > { %v1911_v39 = vmax.f32 %v1907_v36, 0.0  ;;  %v3852_v36 = vor.u32 %v4200_v33, %v3851_v31  ;;  %2730 = vmatpush.bf16.msrb.mxu2 %v3788_v32  ;;  %v5345_v31 = vperm.slane %v1944_v15, 0  ;;  %v3976_v32 = vor.u32 %v4229_v28, %v3973_v29  ;;  %v3949_v15 = vld [vmem:[#allocation20 + $0x1b8] sm:$0xf0]  ;;  %v4199_v21 = vld [vmem:[#allocation20 + $0xf4] sm:$0xf] }
 0x338   : > { %v3952_v17 = vor.u32 %v4223_v14, %v3949_v15  ;;  %v4177_v14 = vld [vmem:[#allocation20 + $0x44] sm:$0xf]  ;;  %v3765_v15 = vld [vmem:[#allocation20 + $0x48] sm:$0xf0] }
 0x339   : > { %v2034_v41 = vrot.slane %v1911_v39, 4  ;;  %v2059_v42 = vpack.c.bf16 %v1911_v39, %v1911_v39  ;;  %v4222_v39 = vld [vmem:[#allocation20 + $0x1a4] sm:$0xf0]  ;;  %2749 = vmatpush.bf16.msrb.mxu3 %v3852_v36  ;;  %v3811_v36 = vld [vmem:[#allocation20 + $0xa0] sm:$0xf] }
 0x33a   : > { %v3940_v40 = vor.u32 %v4222_v39, %v3939_v38  ;;  %v4190_v38 = vld [vmem:[#allocation20 + $0xa4] sm:$0xf0]  ;;  %v4211_v39 = vld [vmem:[#allocation20 + $0x154] sm:$0xf] }
 0x33b   : > { %v2079_v44 = vunpack.c.l.b16 %v2059_v42  ;;  %v2039_v45 = vsel %vm2035_vm4, %v2034_v41, %v2031_v37  ;;  %v2036_v54 = vsel %vm2035_vm4, %v2033_v53, %v2034_v41  ;;  %v3876_v37 = vor.u32 %v4206_v35, %v3875_v34  ;;  %v3779_v41 = vld [vmem:[#allocation20 + $0x60] sm:$0xf]  ;;  %v4182_v42 = vld [vmem:[#allocation20 + $0x64] sm:$0xf0] }
 0x33c   : > { %v2048_v47 = vsel %vm2027_vm5, %v2039_v45, 0.0  ;;  %v2055_v56 = vpack.c.bf16 %v2036_v54, %v2036_v54  ;;  %2792 = vmatpush.bf16.msra.mxu1 %v3940_v40  ;;  %v4198_v45 = vld [vmem:[#allocation20 + $0xe4] sm:$0xf0]  ;;  %v3771_v54 = vld [vmem:[#allocation20 + $0x50] sm:$0xf] }
 0x33d   : > { %v5330_v48 = vpack.c.b16 %v2079_v44, %v2078_v43  ;;  %v2052_v49 = vpack.c.bf16 %v2048_v47, %v2048_v47  ;;  %2773 = vmatpush.bf16.msra.mxu0 %v3876_v37  ;;  %v3843_v43 = vld [vmem:[#allocation20 + $0xe0] sm:$0xf]  ;;  %v3780_v44 = vor.u32 %v4182_v42, %v3779_v41  ;;  %v4204_v47 = vld [vmem:[#allocation20 + $0x114] sm:$0xf0]  ;;  %v3772_v57 = vor.u32 %v4180_v55, %v3771_v54  ;;  %v4174_v35 = vld [vmem:[#allocation20 + $0x24] sm:$0xf0] }
 0x33e   : > { %v2067_v58 = vunpack.c.l.b16 %v2055_v56  ;;  %v3835_v56 = vld [vmem:[#allocation20 + $0xd0] sm:$0xf]  ;;  %v3747_v34 = vld [vmem:[#allocation20 + $0x20] sm:$0xf]  ;;  %v3901_v40 = vld [vmem:[#allocation20 + $0x158] sm:$0xf0]  ;;  %v3812_v41 = vor.u32 %v4190_v38, %v3811_v36 }
 0x33f   : > { %2281 = vmatmul.bf16.gmra.mxu3 %v5330_v48  ;;  %2319 = vmatmul.bf16.gmra.mxu1 %v5330_v48  ;;  %v2064_v50 = vunpack.c.l.b16 %v2052_v49  ;;  %v3844_v49 = vor.u32 %v4198_v45, %v3843_v43  ;;  %v3748_v37 = vor.u32 %v4174_v35, %v3747_v34  ;;  %v3904_v42 = vor.u32 %v4211_v39, %v3901_v40  ;;  %v4227_v43 = vld [vmem:[#allocation20 + $0x1d4] sm:$0xf]  ;;  %v4188_v55 = vld [vmem:[#allocation20 + $0x94] sm:$0xf0]  ;;  %v3877_v34 = vld [vmem:[#allocation20 + $0x128] sm:$0xf0] }
 0x340   : > { %v2069_v60 = vpack.c.b16 %v2067_v58, %v2066_v59  ;;  %2731 = vmatpush.bf16.msrb.mxu2 %v3780_v44  ;;  %v4196_v58 = vld [vmem:[#allocation20 + $0xd4] sm:$0xf0]  ;;  %v3859_v59 = vld [vmem:[#allocation20 + $0x100] sm:$0xf]  ;;  %v3965_v44 = vld [vmem:[#allocation20 + $0x1d8] sm:$0xf0] }
 0x341   : > { %v2068_v52 = vpack.c.b16 %v2065_v51, %v2064_v50  ;;  %v3868_v50 = vor.u32 %v4204_v47, %v3867_v46  ;;  %v3931_v51 = vld [vmem:[#allocation20 + $0x190] sm:$0xf]  ;;  %2750 = vmatpush.bf16.msrb.mxu3 %v3844_v49  ;;  %v3836_v61 = vor.u32 %v4196_v58, %v3835_v56  ;;  %v3968_v45 = vor.u32 %v4227_v43, %v3965_v44  ;;  %v4209_v56 = vld [vmem:[#allocation20 + $0x144] sm:$0xf]  ;;  %v3941_v36 = vld [vmem:[#allocation20 + $0x1a8] sm:$0xf0] }
 0x342   : > { %v4221_v35 = vld [vmem:[#allocation20 + $0x1a4] sm:$0xf]  ;;  %v3781_v40 = vld [vmem:[#allocation20 + $0x68] sm:$0xf0] }
 0x343   : > { %2257 = vmatmul.bf16.vlgmr.msra.gmra.mxu2 %v2068_v52  ;;  %2295 = vmatmul.bf16.vlgmr.msrb.gmra.mxu0 %v2068_v52  ;;  %v4220_v52 = vld [vmem:[#allocation20 + $0x194] sm:$0xf0]  ;;  %v4181_v39 = vld [vmem:[#allocation20 + $0x64] sm:$0xf]  ;;  %v3944_v43 = vor.u32 %v4221_v35, %v3941_v36 }
 0x344   : > { %v3932_v53 = vor.u32 %v4220_v52, %v3931_v51  ;;  %2774 = vmatpush.bf16.msra.mxu0 %v3868_v50  ;;  %2732 = vmatpush.bf16.msrb.mxu2 %v3772_v57  ;;  %v3739_v50 = vld [vmem:[#allocation20 + $0x10] sm:$0xf]  ;;  %v4172_v51 = vld [vmem:[#allocation20 + $0x14] sm:$0xf0]  ;;  %v3784_v44 = vor.u32 %v4181_v39, %v3781_v40 }
 0x345   : > { %2751 = vmatpush.bf16.msrb.mxu3 %v3836_v61  ;;  %v3803_v52 = vld [vmem:[#allocation20 + $0x90] sm:$0xf]  ;;  %v3740_v54 = vor.u32 %v4172_v51, %v3739_v50  ;;  %v3957_v61 = vld [vmem:[#allocation20 + $0x1c8] sm:$0xf0] }
 0x346   : > { %2793 = vmatpush.bf16.msra.mxu1 %v3932_v53  ;;  %v3804_v58 = vor.u32 %v4188_v55, %v3803_v52 }
 0x348   : > { %2733 = vmatpush.bf16.msrb.mxu2 %v3764_v5 }
 0x349   : > { %2752 = vmatpush.bf16.msrb.mxu3 %v3828_v10 }
 0x34a   : > { %2794 = vmatpush.bf16.msra.mxu1 %v3924_v1  ;;  %v3731_v1 = vld [vmem:[#allocation20] sm:$0xf] }
 0x34b   : > { %v3732_v5 = vor.u32 %v4170_v2, %v3731_v1 }
 0x34c   : > { %2734 = vmatpush.bf16.msrb.mxu2 %v3756_v20  ;;  %v3789_v20 = vld [vmem:[#allocation20 + $0x78] sm:$0xf0] }
 0x34d   : > { %2753 = vmatpush.bf16.msrb.mxu3 %v3820_v26  ;;  %v3853_v26 = vld [vmem:[#allocation20 + $0xf8] sm:$0xf0] }
 0x34e   : > { %2863 = vmatpush.bf16.msrb.mxu1 %v3984_v16 }
 0x350   : > { %2735 = vmatpush.bf16.msrb.mxu2 %v3748_v37 }
 0x351   : > { %2754 = vmatpush.bf16.msrb.mxu3 %v3812_v41  ;;  %v4197_v41 = vld [vmem:[#allocation20 + $0xe4] sm:$0xf] }
 0x352   : > { %2864 = vmatpush.bf16.msrb.mxu1 %v3976_v32  ;;  %v3792_v32 = vor.u32 %v4183_v19, %v3789_v20  ;;  %v4193_v20 = vld [vmem:[#allocation20 + $0xc4] sm:$0xf] }
 0x353   : > { %2262 = vmatmul.bf16.gmra.mxu2 %v2069_v60  ;;  %2300 = vmatmul.bf16.gmra.mxu0 %v2069_v60  ;;  %v4202_v60 = vld [vmem:[#allocation20 + $0x104] sm:$0xf0] }
 0x354   : > { %v3860_v62 = vor.u32 %v4202_v60, %v3859_v59  ;;  %v3893_v59 = vld [vmem:[#allocation20 + $0x148] sm:$0xf0]  ;;  %v4225_v60 = vld [vmem:[#allocation20 + $0x1c4] sm:$0xf]  ;;  %2736 = vmatpush.bf16.msrb.mxu2 %v3740_v54  ;;  %v3933_v54 = vld [vmem:[#allocation20 + $0x198] sm:$0xf0] }
 0x355   : > { %v3896_v63 = vor.u32 %v4209_v56, %v3893_v59  ;;  %v3960_v0 = vor.u32 %v4225_v60, %v3957_v61  ;;  %2755 = vmatpush.bf16.msrb.mxu3 %v3804_v58  ;;  %v4179_v56 = vld [vmem:[#allocation20 + $0x54] sm:$0xf]  ;;  %v3837_v60 = vld [vmem:[#allocation20 + $0xd8] sm:$0xf0]  ;;  %v4201_v61 = vld [vmem:[#allocation20 + $0x104] sm:$0xf] }
 0x356   : > { %2775 = vmatpush.bf16.msra.mxu0 %v3860_v62  ;;  %2865 = vmatpush.bf16.msrb.mxu1 %v3968_v45  ;;  %v3845_v45 = vld [vmem:[#allocation20 + $0xe8] sm:$0xf0]  ;;  %v4195_v58 = vld [vmem:[#allocation20 + $0xd4] sm:$0xf] }
 0x357   : > { %v3848_v51 = vor.u32 %v4197_v41, %v3845_v45 }
 0x358   : > { %2737 = vmatpush.bf16.msrb.mxu2 %v3732_v5  ;;  %v3861_v5 = vld [vmem:[#allocation20 + $0x108] sm:$0xf0] }
 0x35a   : > { %2844 = vmatpush.bf16.msrb.mxu0 %v3920_v12  ;;  %2866 = vmatpush.bf16.msrb.mxu1 %v3960_v0  ;;  %v3796_v12 = vor.u32 %v4186_v6, %v3795_v3  ;;  %v3840_v3 = vor.u32 %v4195_v58, %v3837_v60  ;;  %v4217_v6 = vld [vmem:[#allocation20 + $0x184] sm:$0xf]  ;;  %v4171_v58 = vld [vmem:[#allocation20 + $0x14] sm:$0xf] }
 0x35b   : > { %v3928_v19 = vor.u32 %v4217_v6, %v3925_v7 }
 0x35c   : > { %2756 = vmatpush.bf16.msrb.mxu3 %v3796_v12  ;;  %2806 = vmatpush.bf16.msra.mxu2 %v3792_v32 }
 0x35e   : > { %2845 = vmatpush.bf16.msrb.mxu0 %v3912_v27  ;;  %2867 = vmatpush.bf16.msrb.mxu1 %v3952_v17  ;;  %v4205_v27 = vld [vmem:[#allocation20 + $0x124] sm:$0xf] }
 0x35f   : > { %v3880_v38 = vor.u32 %v4205_v27, %v3877_v34 }
 0x360   : > { %2807 = vmatpush.bf16.msra.mxu2 %v3784_v44  ;;  %v3757_v44 = vld [vmem:[#allocation20 + $0x38] sm:$0xf0] }
 0x362   : > { %2846 = vmatpush.bf16.msrb.mxu0 %v3904_v42  ;;  %2868 = vmatpush.bf16.msrb.mxu1 %v3944_v43  ;;  %v4175_v43 = vld [vmem:[#allocation20 + $0x34] sm:$0xf] }
 0x366   : > { %2847 = vmatpush.bf16.msrb.mxu0 %v3896_v63 }
 0x36a   : > { %2848 = vmatpush.bf16.msrb.mxu0 %v3888_v13 }
 0x36e   : > { %2849 = vmatpush.bf16.msrb.mxu0 %v3880_v38 }
 0x3ac   : > { %v5338_v9 = vpop.f32.mrf.mxu1 }
 0x3b2   : > { %v2277_v33 = vpop.f32.mrf.mxu3 }
 0x3b4   : > { %v2317_v46 = vpop.f32.mrf.mxu1 }
 0x3ba   : > { %v2279_v16 = vpop.f32.mrf.mxu3 }
 0x3bc   : > { %v5360_v28 = vpop.f32.mrf.mxu1 }
 0x3c0   : > { %v2296_v24 = vpop.f32.mrf.mxu0 }
 0x3c1   : > { %v2297_v47 = vadd.f32 %v2296_v24, %v5343_v30 }
 0x3c2   : > { %v2282_v63 = vpop.f32.mrf.mxu3 }
 0x3c3   : > { %v5352_v4 = vadd.f32 %v5338_v9, %v2297_v47  ;;  %v3869_v47 = vld [vmem:[#allocation20 + $0x118] sm:$0xf0] }
 0x3c4   : > { %v2322_v27 = vpop.f32.mrf.mxu1 }
 0x3c5   : > { %v2326_v22 = vmax.f32 %v5352_v4, 0.0 }
 0x3c6   : > { %v2258_v49 = vpop.f32.mrf.mxu2 }
 0x3c7   : > { %v2259_v53 = vadd.f32 %v2258_v49, %v5345_v31 }
 0x3c8   : > { %v2298_v57 = vpop.f32.mrf.mxu0 }
 0x3c9   : > { %v5349_v62 = vadd.f32 %v2277_v33, %v2259_v53  ;;  %v2299_v10 = vadd.f32 %v2298_v57, %v5343_v30  ;;  %v3856_v33 = vor.u32 %v4199_v21, %v3853_v26  ;;  %v4219_v53 = vld [vmem:[#allocation20 + $0x194] sm:$0xf]  ;;  %v3773_v57 = vld [vmem:[#allocation20 + $0x58] sm:$0xf0]  ;;  %v3829_v21 = vld [vmem:[#allocation20 + $0xc8] sm:$0xf0] }
 0x3ca   : > { %v3936_v55 = vor.u32 %v4219_v53, %v3933_v54  ;;  %v3776_v2 = vor.u32 %v4179_v56, %v3773_v57  ;;  %v2284_v45 = vpop.f32.mrf.mxu3 }
 0x3cb   : > { %v2325_v18 = vmax.f32 %v5349_v62, 0.0  ;;  %v5357_v23 = vadd.f32 %v2317_v46, %v2299_v10  ;;  %2825 = vmatpush.bf16.msra.mxu3 %v3856_v33  ;;  %v4203_v46 = vld [vmem:[#allocation20 + $0x114] sm:$0xf]  ;;  %v3832_v33 = vor.u32 %v4193_v20, %v3829_v21  ;;  %v3760_v62 = vor.u32 %v4175_v43, %v3757_v44  ;;  %v4185_v20 = vld [vmem:[#allocation20 + $0x84] sm:$0xf] }
 0x3cc   : > { %v3872_v52 = vor.u32 %v4203_v46, %v3869_v47  ;;  %2869 = vmatpush.bf16.msrb.mxu1 %v3936_v55  ;;  %2808 = vmatpush.bf16.msra.mxu2 %v3776_v2  ;;  %v3821_v46 = vld [vmem:[#allocation20 + $0xb8] sm:$0xf0]  ;;  %v4173_v47 = vld [vmem:[#allocation20 + $0x24] sm:$0xf]  ;;  %v3797_v21 = vld [vmem:[#allocation20 + $0x88] sm:$0xf0] }
 0x3cd   : > { %v2361_v42 = vpack.c.bf16 %v2326_v22, %v2325_v18  ;;  %v2328_v49 = vmax.f32 %v5357_v23, 0.0  ;;  %v2333_v36 = vrot.slane %v2325_v18, 4  ;;  %v4191_v18 = vld [vmem:[#allocation20 + $0xb4] sm:$0xf]  ;;  %v4043_v43 = vld [vmem:[#allocation22 + $0x70] sm:$0xf] }
 0x3ce   : > { %v2260_v9 = vpop.f32.mrf.mxu2  ;;  %2850 = vmatpush.bf16.msrb.mxu0 %v3872_v52  ;;  %v3813_v52 = vld [vmem:[#allocation20 + $0xa8] sm:$0xf0]  ;;  %v3824_v54 = vor.u32 %v4191_v18, %v3821_v46  ;;  %v4248_v44 = vld [vmem:[#allocation22 + $0x74] sm:$0xf0]  ;;  %v4045_v18 = vld [vmem:[#allocation22 + $0x78] sm:$0xf0] }
 0x3cf   : > { %v2261_v24 = vadd.f32 %v2260_v9, %v5345_v31  ;;  %v2389_v0 = vunpack.c.l.b16 %v2361_v42  ;;  %2826 = vmatpush.bf16.msra.mxu3 %v3848_v51  ;;  %v2390_v8 = vunpack.c.h.b16 %v2361_v42  ;;  %v3864_v9 = vor.u32 %v4201_v61, %v3861_v5  ;;  %v4189_v51 = vld [vmem:[#allocation20 + $0xa4] sm:$0xf]  ;;  %v4035_v46 = vld [vmem:[#allocation22 + $0x60] sm:$0xf] }
 0x3d0   : > { %v2301_v29 = vpop.f32.mrf.mxu0  ;;  %2870 = vmatpush.bf16.msrb.mxu1 %v3928_v19  ;;  %v3816_v60 = vor.u32 %v4189_v51, %v3813_v52  ;;  %v4037_v51 = vld [vmem:[#allocation22 + $0x68] sm:$0xf0] }
 0x3d1   : > { %v5362_v37 = vadd.f32 %v2279_v16, %v2261_v24  ;;  %v2302_v13 = vadd.f32 %v2301_v29, %v5343_v30  ;;  %v3768_v29 = vor.u32 %v4177_v14, %v3765_v15 }
 0x3d2   : > { %2851 = vmatpush.bf16.msrb.mxu0 %v3864_v9 }
 0x3d3   : > { %v2327_v50 = vmax.f32 %v5362_v37, 0.0  ;;  %2827 = vmatpush.bf16.msra.mxu3 %v3840_v3  ;;  %v5380_v34 = vadd.f32 %v5360_v28, %v2302_v13  ;;  %v5386_v37 = vrot.slane %v2328_v49, 4  ;;  %2809 = vmatpush.bf16.msra.mxu2 %v3768_v29  ;;  %v3733_v13 = vld [vmem:[#allocation20 + $0x8] sm:$0xf0] }
 0x3d5   : > { %v2362_v59 = vpack.c.bf16 %v2328_v49, %v2327_v50  ;;  %v5388_v38 = vrot.slane %v2327_v50, 4  ;;  %v2330_v28 = vmax.f32 %v5380_v34, 0.0  ;;  %v3749_v50 = vld [vmem:[#allocation20 + $0x28] sm:$0xf0]  ;;  %v4243_v34 = vld [vmem:[#allocation22 + $0x54] sm:$0xf] }
 0x3d6   : > { %v2263_v1 = vpop.f32.mrf.mxu2  ;;  %v3752_v55 = vor.u32 %v4173_v47, %v3749_v50  ;;  %v4246_v47 = vld [vmem:[#allocation22 + $0x64] sm:$0xf0]  ;;  %v4245_v50 = vld [vmem:[#allocation22 + $0x64] sm:$0xf] }
 0x3d7   : > { %v2391_v10 = vunpack.c.l.b16 %v2362_v59  ;;  %v2392_v12 = vunpack.c.h.b16 %v2362_v59  ;;  %v2264_v16 = vadd.f32 %v2263_v1, %v5345_v31  ;;  %2828 = vmatpush.bf16.msra.mxu3 %v3832_v33  ;;  %2810 = vmatpush.bf16.msra.mxu2 %v3760_v62  ;;  %v2345_v56 = vsel %vm2035_vm4, %v2333_v36, %v5388_v38  ;;  %v3741_v59 = vld [vmem:[#allocation20 + $0x18] sm:$0xf0] }
 0x3d8   : > { %v2303_v17 = vpop.f32.mrf.mxu0  ;;  %v3805_v1 = vld [vmem:[#allocation20 + $0x98] sm:$0xf0]  ;;  %v3744_v5 = vor.u32 %v4171_v58, %v3741_v59  ;;  %v4044_v62 = vor.u32 %v4248_v44, %v4043_v43  ;;  %v4036_v52 = vor.u32 %v4246_v47, %v4035_v46  ;;  %v3989_v43 = vld [vmem:[#allocation22 + $0x8] sm:$0xf0] }
 0x3d9   : > { %v2304_v23 = vadd.f32 %v2303_v17, %v5343_v30  ;;  %v5373_v24 = vpack.c.b16 %v2391_v10, %v2389_v0  ;;  %v5375_v26 = vpack.c.b16 %v2392_v12, %v2390_v8  ;;  %v5377_v32 = vadd.f32 %v2282_v63, %v2264_v16  ;;  %v4169_v12 = vld [vmem:[#allocation20 + $0x4] sm:$0xf] }
 0x3db   : > { %v2323_v35 = vadd.f32 %v2322_v27, %v2304_v23  ;;  %2776 = vmatmul.bf16.vlgmr.msra.gmra.mxu0 %v5373_v24  ;;  %2795 = vmatmul.bf16.vlgmr.msra.gmra.mxu1 %v5375_v26  ;;  %v2329_v39 = vmax.f32 %v5377_v32, 0.0  ;;  %v3736_v23 = vor.u32 %v4169_v12, %v3733_v13  ;;  %v2338_v32 = vrot.slane %v2330_v28, 4  ;;  %v4013_v12 = vld [vmem:[#allocation22 + $0x38] sm:$0xf0]  ;;  %v4003_v13 = vld [vmem:[#allocation22 + $0x20] sm:$0xf] }
 0x3dc   : > { %2829 = vmatpush.bf16.msra.mxu3 %v3824_v54  ;;  %2811 = vmatpush.bf16.msra.mxu2 %v3752_v55  ;;  %v4027_v54 = vld [vmem:[#allocation22 + $0x50] sm:$0xf]  ;;  %v4244_v55 = vld [vmem:[#allocation22 + $0x54] sm:$0xf0] }
 0x3dd   : > { %v2332_v30 = vmax.f32 %v2323_v35, 0.0  ;;  %v2363_v53 = vpack.c.bf16 %v2330_v28, %v2329_v39  ;;  %v4029_v28 = vld [vmem:[#allocation22 + $0x58] sm:$0xf0]  ;;  %v2344_v58 = vsel %vm2035_vm4, %v5386_v37, %v2338_v32  ;;  %v4028_v59 = vor.u32 %v4244_v55, %v4027_v54 }
 0x3de   : > { %v2265_v40 = vpop.f32.mrf.mxu2 }
 0x3df   : > { %v5392_v41 = vrot.slane %v2332_v30, 4  ;;  %v2266_v42 = vadd.f32 %v2265_v40, %v5345_v31  ;;  %v2334_v31 = vrot.slane %v2326_v22, 4  ;;  %v4187_v22 = vld [vmem:[#allocation20 + $0x94] sm:$0xf]  ;;  %v2393_v3 = vunpack.c.l.b16 %v2363_v53 }
 0x3e0   : > { %v2394_v8 = vunpack.c.h.b16 %v2363_v53  ;;  %2830 = vmatpush.bf16.msra.mxu3 %v3816_v60  ;;  %v3808_v16 = vor.u32 %v4187_v22, %v3805_v1  ;;  %2812 = vmatpush.bf16.msra.mxu2 %v3744_v5  ;;  %v4040_v53 = vor.u32 %v4245_v50, %v4037_v51  ;;  %v4241_v22 = vld [vmem:[#allocation22 + $0x44] sm:$0xf]  ;;  %v4021_v1 = vld [vmem:[#allocation22 + $0x48] sm:$0xf0] }
 0x3e1   : > { %v2285_v49 = vadd.f32 %v2284_v45, %v2266_v42  ;;  %v2346_v61 = vsel %vm2035_vm4, %v2334_v31, %v5386_v37  ;;  %v2348_v63 = vsel %vm2035_vm4, %v5392_v41, %v2334_v31  ;;  %v2337_v42 = vrot.slane %v2329_v39, 4  ;;  %v4247_v45 = vld [vmem:[#allocation22 + $0x74] sm:$0xf] }
 0x3e2   : > { %v2358_v2 = vpack.c.bf16 %v2346_v61, %v2345_v56  ;;  %v2350_v14 = vsel %vm2027_vm5, %v2348_v63, 0.0  ;;  %v2342_v31 = vsel %vm2035_vm4, %v2338_v32, %v5392_v41  ;;  %v4019_v61 = vld [vmem:[#allocation22 + $0x40] sm:$0xf]  ;;  %v4242_v63 = vld [vmem:[#allocation22 + $0x44] sm:$0xf0]  ;;  %v4024_v37 = vor.u32 %v4241_v22, %v4021_v1 }
 0x3e3   : > { %v2331_v57 = vmax.f32 %v2285_v49, 0.0  ;;  %v4048_v49 = vor.u32 %v4247_v45, %v4045_v18  ;;  %v2343_v56 = vsel %vm2035_vm4, %v5388_v38, %v2337_v42  ;;  %v4020_v38 = vor.u32 %v4242_v63, %v4019_v61 }
 0x3e4   : > { %v2371_v29 = vunpack.c.l.b16 %v2358_v2  ;;  %v2372_v35 = vunpack.c.h.b16 %v2358_v2  ;;  %2831 = vmatpush.bf16.msra.mxu3 %v3808_v16  ;;  %2813 = vmatpush.bf16.msra.mxu2 %v3736_v23  ;;  %v2359_v60 = vpack.c.bf16 %v2344_v58, %v2343_v56  ;;  %v4235_v23 = vld [vmem:[#allocation22 + $0x14] sm:$0xf] }
 0x3e5   : > { %v2339_v0 = vrot.slane %v2331_v57, 4  ;;  %v2364_v4 = vpack.c.bf16 %v2332_v30, %v2331_v57  ;;  %v3800_v30 = vor.u32 %v4185_v20, %v3797_v21  ;;  %v4236_v20 = vld [vmem:[#allocation22 + $0x14] sm:$0xf0] }
 0x3e6   : > { %v2373_v2 = vunpack.c.l.b16 %v2359_v60  ;;  %v2374_v11 = vunpack.c.h.b16 %v2359_v60 }
 0x3e7   : > { %v2347_v6 = vsel %vm2035_vm4, %v2339_v0, %v2333_v36  ;;  %v2395_v7 = vunpack.c.l.b16 %v2364_v4  ;;  %v2396_v10 = vunpack.c.h.b16 %v2364_v4  ;;  %v2341_v39 = vsel %vm2035_vm4, %v2337_v42, %v2339_v0  ;;  %v4233_v42 = vld [vmem:[#allocation22 + $0x4] sm:$0xf] }
 0x3e8   : > { %v2349_v15 = vsel %vm2027_vm5, %v2347_v6, 0.0  ;;  %2832 = vmatpush.bf16.msra.mxu3 %v3800_v30  ;;  %v2360_v57 = vpack.c.bf16 %v2342_v31, %v2341_v39  ;;  %v4032_v0 = vor.u32 %v4243_v34, %v4029_v28  ;;  %v4011_v6 = vld [vmem:[#allocation22 + $0x30] sm:$0xf]  ;;  %v3992_v45 = vor.u32 %v4233_v42, %v3989_v43  ;;  %v2009_v31 = vld [vmem:[%s5590_s19] sm:$0x3]  ;;  %s4839_s19 = scalar_lea.hbm %s5592_s23, 64 }
 0x3e9   : > { %v5416_v17 = vpack.c.b16 %v2395_v7, %v2393_v3  ;;  %v5418_v9 = vpack.c.b16 %v2396_v10, %v2394_v8  ;;  %v2357_v19 = vpack.c.bf16 %v2350_v14, %v2349_v15  ;;  %v4240_v7 = vld [vmem:[#allocation22 + $0x34] sm:$0xf0]  ;;  %v4239_v8 = vld [vmem:[#allocation22 + $0x34] sm:$0xf]  ;;  %v4238_v14 = vld [vmem:[#allocation22 + $0x24] sm:$0xf0]  ;;  %p4841_p7 = scmp.lt.s32.totalorder %s4839_s19, %s4835_s18 }
 0x3ea   : > { %v2375_v4 = vunpack.c.l.b16 %v2360_v57  ;;  %v2376_v41 = vunpack.c.h.b16 %v2360_v57  ;;  %v4012_v10 = vor.u32 %v4240_v7, %v4011_v6  ;;  %v4237_v15 = vld [vmem:[#allocation22 + $0x24] sm:$0xf]  ;;  %v4004_v16 = vor.u32 %v4238_v14, %v4003_v13 }
 0x3eb   : > { %2781 = vmatmul.bf16.gmra.mxu0 %v5416_v17  ;;  %2800 = vmatmul.bf16.gmra.mxu1 %v5418_v9  ;;  %v2369_v27 = vunpack.c.l.b16 %v2357_v19  ;;  %v2370_v33 = vunpack.c.h.b16 %v2357_v19  ;;  %v3995_v19 = vld [vmem:[#allocation22 + $0x10] sm:$0xf]  ;;  %v2406_v57 = vperm.slane %v2009_v31, 0  ;;  %v2407_v34 = vperm.slane %v2009_v31, 1  ;;  %p4842_p8 = por %p4841_p7, %p4840_p12 }
 0x3ec   : > { %v2379_v3 = vpack.c.b16 %v2375_v4, %v2373_v2  ;;  %v2380_v5 = vpack.c.b16 %v2376_v41, %v2374_v11 }
 0x3ed   : > { %v5422_v36 = vpack.c.b16 %v2371_v29, %v2369_v27  ;;  %v5424_v40 = vpack.c.b16 %v2372_v35, %v2370_v33  ;;  %v3997_v27 = vld [vmem:[#allocation22 + $0x18] sm:$0xf0]  ;;  %v3996_v29 = vor.u32 %v4236_v20, %v3995_v19  ;;  %v3987_v33 = vld [vmem:[#allocation22] sm:$0xf]  ;;  %v4234_v35 = vld [vmem:[#allocation22 + $0x4] sm:$0xf0]  ;;  %p4843_p9 = pnand %p4842_p8, %p4838_p5 }
 0x3ee   : > { %v4000_v30 = vor.u32 %v4235_v23, %v3997_v27  ;;  %v3988_v44 = vor.u32 %v4234_v35, %v3987_v33 }
 0x3ef   : > { %2738 = vmatmul.bf16.vlgmr.msrb.gmra.mxu2 %v5422_v36  ;;  %2757 = vmatmul.bf16.vlgmr.msrb.gmra.mxu3 %v5424_v40 }
 0x3f0   : > { %2975 = vmatpush.bf16.msrb.mxu2 %v4044_v62  ;;  %2994 = vmatpush.bf16.msrb.mxu3 %v4048_v49 }
 0x3f4   : > { %2976 = vmatpush.bf16.msrb.mxu2 %v4036_v52  ;;  %2995 = vmatpush.bf16.msrb.mxu3 %v4040_v53 }
 0x3f8   : > { %2977 = vmatpush.bf16.msrb.mxu2 %v4028_v59  ;;  %2996 = vmatpush.bf16.msrb.mxu3 %v4032_v0 }
 0x3fb   : > { %2852 = vmatmul.bf16.vlgmr.msrb.gmra.mxu0 %v5373_v24  ;;  %2871 = vmatmul.bf16.vlgmr.msrb.gmra.mxu1 %v5375_v26  ;;  %v4016_v24 = vor.u32 %v4239_v8, %v4013_v12  ;;  %v4005_v26 = vld [vmem:[#allocation22 + $0x28] sm:$0xf0] }
 0x3fc   : > { %2978 = vmatpush.bf16.msrb.mxu2 %v4020_v38  ;;  %2997 = vmatpush.bf16.msrb.mxu3 %v4024_v37  ;;  %v4008_v21 = vor.u32 %v4237_v15, %v4005_v26  ;;  %v2026_v37 = vld [vmem:[%s5591_s15] sm:$0x3] }
 0x3fd   : > { %v5469_v12 = vperm.slane %v2026_v37, 1 }
 0x3ff   : > { %2743 = vmatmul.bf16.gmra.mxu2 %v2379_v3  ;;  %2762 = vmatmul.bf16.gmra.mxu3 %v2380_v5 }
 0x400   : > { %2979 = vmatpush.bf16.msrb.mxu2 %v4012_v10  ;;  %2998 = vmatpush.bf16.msrb.mxu3 %v4016_v24  ;;  %v5467_v10 = vperm.slane %v2026_v37, 0 }
 0x404   : > { %2980 = vmatpush.bf16.msrb.mxu2 %v4004_v16  ;;  %2999 = vmatpush.bf16.msrb.mxu3 %v4008_v21 }
 0x408   : > { %2981 = vmatpush.bf16.msrb.mxu2 %v3996_v29  ;;  %3000 = vmatpush.bf16.msrb.mxu3 %v4000_v30 }
 0x40b   : > { %2857 = vmatmul.bf16.gmra.mxu0 %v5416_v17  ;;  %2876 = vmatmul.bf16.gmra.mxu1 %v5418_v9 }
 0x40c   : > { %2982 = vmatpush.bf16.msrb.mxu2 %v3988_v44  ;;  %3001 = vmatpush.bf16.msrb.mxu3 %v3992_v45 }
 0x40f   : > { %2814 = vmatmul.bf16.vlgmr.msra.gmra.mxu2 %v5422_v36  ;;  %2833 = vmatmul.bf16.vlgmr.msra.gmra.mxu3 %v5424_v40 }
 0x41f   : > { %2819 = vmatmul.bf16.gmra.mxu2 %v2379_v3  ;;  %2838 = vmatmul.bf16.gmra.mxu3 %v2380_v5 }
 0x42f   : > { %2983 = vmatmul.bf16.vlgmr.msrb.gmra.mxu2 %v5318_v25  ;;  %3002 = vmatmul.bf16.vlgmr.msrb.gmra.mxu3 %v5318_v25 }
 0x43f   : > { %2988 = vmatmul.bf16.gmra.mxu2 %v5330_v48  ;;  %3007 = vmatmul.bf16.gmra.mxu3 %v5330_v48 }
 0x458   : > { %v2777_v46 = vpop.f32.mrf.mxu0  ;;  %v2796_v47 = vpop.f32.mrf.mxu1 }
 0x460   : > { %v2779_v40 = vpop.f32.mrf.mxu0  ;;  %v2798_v50 = vpop.f32.mrf.mxu1 }
 0x468   : > { %v2782_v39 = vpop.f32.mrf.mxu0  ;;  %v5455_v53 = vpop.f32.mrf.mxu1 }
 0x470   : > { %v5457_v54 = vpop.f32.mrf.mxu0  ;;  %v5462_v56 = vpop.f32.mrf.mxu1 }
 0x472   : > { %v2739_v17 = vpop.f32.mrf.mxu2  ;;  %v2758_v9 = vpop.f32.mrf.mxu3 }
 0x473   : > { %v2740_v28 = vadd.f32 %v2739_v17, %v2406_v57 }
 0x475   : > { %v2759_v63 = vadd.f32 %v2758_v9, %v2740_v28 }
 0x477   : > { %v2778_v41 = vadd.f32 %v2777_v46, %v2759_v63 }
 0x478   : > { %v2853_v60 = vpop.f32.mrf.mxu0  ;;  %v2872_v0 = vpop.f32.mrf.mxu1 }
 0x479   : > { %v2797_v5 = vadd.f32 %v2796_v47, %v2778_v41 }
 0x47a   : > { %v2741_v62 = vpop.f32.mrf.mxu2  ;;  %v2760_v18 = vpop.f32.mrf.mxu3 }
 0x47b   : > { %v2742_v22 = vadd.f32 %v2741_v62, %v2406_v57  ;;  %v2882_v26 = vmax.f32 %v2797_v5, 0.0 }
 0x47d   : > { %v2761_v6 = vadd.f32 %v2760_v18, %v2742_v22 }
 0x47f   : > { %v2780_v14 = vadd.f32 %v2779_v40, %v2761_v6 }
 0x480   : > { %v2855_v3 = vpop.f32.mrf.mxu0  ;;  %v2874_v13 = vpop.f32.mrf.mxu1 }
 0x481   : > { %v2799_v35 = vadd.f32 %v2798_v50, %v2780_v14 }
 0x482   : > { %v2744_v36 = vpop.f32.mrf.mxu2  ;;  %v2763_v49 = vpop.f32.mrf.mxu3 }
 0x483   : > { %v2745_v24 = vadd.f32 %v2744_v36, %v2406_v57  ;;  %v2884_v46 = vmax.f32 %v2799_v35, 0.0 }
 0x485   : > { %v2764_v30 = vadd.f32 %v2763_v49, %v2745_v24 }
 0x487   : > { %v2783_v62 = vadd.f32 %v2782_v39, %v2764_v30 }
 0x488   : > { %v2858_v43 = vpop.f32.mrf.mxu0 }
 0x48a   : > { %v2746_v51 = vpop.f32.mrf.mxu2  ;;  %v5453_v32 = vpop.f32.mrf.mxu3 }
 0x48b   : > { %v2747_v18 = vadd.f32 %v2746_v51, %v2406_v57  ;;  %v2802_v51 = vadd.f32 %v5455_v53, %v2783_v62 }
 0x48d   : > { %v2766_v39 = vadd.f32 %v5453_v32, %v2747_v18  ;;  %v2886_v63 = vmax.f32 %v2802_v51, 0.0 }
 0x492   : > { %v2815_v52 = vpop.f32.mrf.mxu2  ;;  %v2834_v25 = vpop.f32.mrf.mxu3 }
 0x493   : > { %v2816_v61 = vadd.f32 %v2815_v52, %v2407_v34 }
 0x495   : > { %v2835_v4 = vadd.f32 %v2834_v25, %v2816_v61  ;;  %v2785_v61 = vadd.f32 %v5457_v54, %v2766_v39 }
 0x497   : > { %v2854_v11 = vadd.f32 %v2853_v60, %v2835_v4 }
 0x499   : > { %v2873_v8 = vadd.f32 %v2872_v0, %v2854_v11  ;;  %v2804_v11 = vadd.f32 %v5462_v56, %v2785_v61 }
 0x49a   : > { %v2817_v48 = vpop.f32.mrf.mxu2  ;;  %v2836_v55 = vpop.f32.mrf.mxu3 }
 0x49b   : > { %v2818_v1 = vadd.f32 %v2817_v48, %v2407_v34  ;;  %v2883_v23 = vmax.f32 %v2873_v8, 0.0  ;;  %v2877_v48 = vpop.f32.mrf.mxu1  ;;  %v2888_v8 = vmax.f32 %v2804_v11, 0.0 }
 0x49d   : > { %v2837_v7 = vadd.f32 %v2836_v55, %v2818_v1 }
 0x49f   : > { %v2856_v15 = vadd.f32 %v2855_v3, %v2837_v7 }
 0x4a1   : > { %v2875_v42 = vadd.f32 %v2874_v13, %v2856_v15 }
 0x4a2   : > { %v2820_v58 = vpop.f32.mrf.mxu2  ;;  %v2839_v59 = vpop.f32.mrf.mxu3 }
 0x4a3   : > { %v2821_v20 = vadd.f32 %v2820_v58, %v2407_v34  ;;  %v2885_v36 = vmax.f32 %v2875_v42, 0.0 }
 0x4a5   : > { %v2840_v44 = vadd.f32 %v2839_v59, %v2821_v20  ;;  %v2860_v59 = vpop.f32.mrf.mxu0 }
 0x4a7   : > { %v2859_v52 = vadd.f32 %v2858_v43, %v2840_v44 }
 0x4a9   : > { %v2878_v57 = vadd.f32 %v2877_v48, %v2859_v52 }
 0x4aa   : > { %v2822_v38 = vpop.f32.mrf.mxu2  ;;  %v2841_v2 = vpop.f32.mrf.mxu3 }
 0x4ab   : > { %v2823_v25 = vadd.f32 %v2822_v38, %v2407_v34  ;;  %v2887_v53 = vmax.f32 %v2878_v57, 0.0 }
 0x4ad   : > { %v2842_v28 = vadd.f32 %v2841_v2, %v2823_v25  ;;  %v2879_v2 = vpop.f32.mrf.mxu1 }
 0x4af   : > { %v2861_v41 = vadd.f32 %v2860_v59, %v2842_v28 }
 0x4b1   : > { %v2880_v37 = vadd.f32 %v2879_v2, %v2861_v41 }
 0x4b2   : > { %v2984_v16 = vpop.f32.mrf.mxu2  ;;  %v3003_v19 = vpop.f32.mrf.mxu3 }
 0x4b3   : > { %v2985_v21 = vadd.f32 %v2984_v16, %v5467_v10  ;;  %v3004_v27 = vadd.f32 %v3003_v19, %v5469_v12  ;;  %v2889_v14 = vmax.f32 %v2880_v37, 0.0 }
 0x4b5   : > { %v3013_v29 = vadd.f32 %v2985_v21, %v2882_v26  ;;  %v3014_v33 = vadd.f32 %v3004_v27, %v2883_v23 }
 0x4b7   : > { %v3021_v45 = vmax.f32 %v3013_v29, 0.0  ;;  %v3022_v17 = vmax.f32 %v3014_v33, 0.0 }
 0x4b9   : > { %v3029_v9 = vpack.c.bf16 %v3022_v17, %v3021_v45 }
 0x4ba   : > { %v2986_v47 = vpop.f32.mrf.mxu2  ;;  %v3005_v40 = vpop.f32.mrf.mxu3 }
 0x4bb   : > { %3033 = vst [vmem:[%s5474_s6] sm:$0xff] %v3029_v9  ;;  %v2987_v49 = vadd.f32 %v2986_v47, %v5467_v10  ;;  %v3006_v50 = vadd.f32 %v3005_v40, %v5469_v12 }
 0x4bd   : > { %v3015_v55 = vadd.f32 %v2987_v49, %v2884_v46  ;;  %v3016_v31 = vadd.f32 %v3006_v50, %v2885_v36 }
 0x4bf   : > { %v3023_v58 = vmax.f32 %v3015_v55, 0.0  ;;  %v3024_v34 = vmax.f32 %v3016_v31, 0.0 }
 0x4c1   : > { %v3030_v60 = vpack.c.bf16 %v3024_v34, %v3023_v58 }
 0x4c2   : > { %v2989_v0 = vpop.f32.mrf.mxu2  ;;  %v3008_v4 = vpop.f32.mrf.mxu3 }
 0x4c3   : > { %3034 = vst [vmem:[%s5474_s6 + $0x8] sm:$0xff] %v3030_v60  ;;  %v2990_v22 = vadd.f32 %v2989_v0, %v5467_v10  ;;  %v3009_v32 = vadd.f32 %v3008_v4, %v5469_v12 }
 0x4c5   : > { %v3017_v1 = vadd.f32 %v2990_v22, %v2886_v63  ;;  %v3018_v38 = vadd.f32 %v3009_v32, %v2887_v53 }
 0x4c7   : > { %v3025_v54 = vmax.f32 %v3017_v1, 0.0  ;;  %v3026_v3 = vmax.f32 %v3018_v38, 0.0 }
 0x4c9   : > { %v3031_v5 = vpack.c.bf16 %v3026_v3, %v3025_v54 }
 0x4ca   : > { %v2991_v6 = vpop.f32.mrf.mxu2  ;;  %v3010_v7 = vpop.f32.mrf.mxu3 }
 0x4cb   : > { %3035 = vst [vmem:[%s5474_s6 + $0x10] sm:$0xff] %v3031_v5  ;;  %v2992_v13 = vadd.f32 %v2991_v6, %v5467_v10  ;;  %v3011_v24 = vadd.f32 %v3010_v7, %v5469_v12 }
 0x4cd   : > { %v3019_v56 = vadd.f32 %v2992_v13, %v2888_v8  ;;  %v3020_v15 = vadd.f32 %v3011_v24, %v2889_v14 }
 0x4cf   : > { %v3027_v26 = vmax.f32 %v3019_v56, 0.0  ;;  %v3028_v16 = vmax.f32 %v3020_v15, 0.0 }
 0x4d1   : > { %v3032_v19 = vpack.c.bf16 %v3028_v16, %v3027_v26 }
 0x4d3   : > { %3036 = vst [vmem:[%s5474_s6 + $0x18] sm:$0xff] %v3032_v19 }
 0x4d4   : > { %4846 = shalt.err (!%p4843_p9)
}
 0x4d5   : > { %s4927_s1 = smov 128   ;;  %s4928_s15 = smov 8  }
 0x4d6   : > { %4300 = dma.vmem_to_hbm [thread:$0]  (%p5183_p4), %s3051_s26, 512, %s3053_s24, %s3038_s3, %s4927_s1, %s4927_s1, %s4928_s15  }
 0x4d7 PF: > { %s3067_s28 = sand.u32 1, %s4897_s0   ;;  %p5593_p10 = scmp.ge.s32.totalorder %s4909_s21, 2 }
 0x4d8   : > { %s3068_s6 = scalar_lea.sflag [#allocation4], %s3067_s28 }
 0x4d9   : > { %p4344_p13 = pnand %p5593_p10, %p5187_p6 }
 0x4db   : > { %p4345_p11 = pneg %p4344_p13 }
 0x4dd   : > { %4892 = dma.done.wait (%p4345_p11), %s3068_s6, 512  }
 0x4de   : > { %4894 = vsyncadd (%p4345_p11), %s3068_s6, 4294966784  ;;  %p38_p0 = scmp.ge.s32.totalorder %s5157_s5, 4   ;;  %s5594_s0 = smov %s4901_s30 }
 0x4df   : > { %s5595_s30 = smov %s4905_s20  ;;  %s5596_s20 = smov %s5168_s16 }
 0x4e0   : > { %s5597_s21 = smov %s5157_s5  ;;  %40 = sbr.rel (!%p38_p0) target bundleno = 29 (0x1d), region = 189 }
 0x4e5   :  { %3074 = vsyncpa [#allocation3], 1 }
 0x4e6   :  { %3076 = vsyncpa [#allocation3 + $0x1], 1 }
 0x4e7   :  { %3077 = vsyncpa [#allocation6], 1 }
 0x4e8   :  { %3078 = vsyncpa [#allocation9], 1 }
 0x4e9   :  { %3079 = vsyncpa [#allocation12], 1 }
 0x4ea   :  { %3080 = vsyncpa [#allocation15], 1 }
 0x4eb   :  { %3081 = vsyncpa [#allocation18], 1 }
 0x4ec   :  { %3082 = vsyncpa [#allocation21], 1 }
 0x4ed   :  { %3083 = vsyncpa [#allocation4], 1 }
 0x4ee   :  { %3085 = vsyncpa [#allocation4 + $0x1], 1 }

</bundles_post_ra>
